<compile_context>
chip_gen: v7x
topology: tpu7x:2x2x1
jax: 0.10.0
libtpu: 0.0.40
codegen_flags: <defaults>
</compile_context>

<pallas_src>
import functools
import math

import jax
import jax.numpy as jnp
from jax.experimental import pallas as pl
from jax.experimental.pallas import tpu as pltpu


# ----------------------------------------------------------------------------
# Kernel 1: 3x3 conv expressed as matmul, bias + BN affine fused in epilogue.
#   a: [M, K] bf16 (im2col patches), b: [K, N] bf16 (weights)
#   grid = (N//tn, K//tk); j "parallel" (>=2 blocks for v7x), k "arbitrary" (reduction last)
#   f32 accumulation happens directly in the revisited output block (no scratch).
# ----------------------------------------------------------------------------
def conv_bn_mm_kernel(a_ref, b_ref, bias_ref, scale_ref, shift_ref, o_ref):
    k = pl.program_id(1)

    @pl.when(k == 0)
    def _():
        o_ref[...] = jnp.zeros_like(o_ref)

    o_ref[...] += jnp.dot(a_ref[...], b_ref[...],
                          preferred_element_type=jnp.float32)

    @pl.when(k == pl.num_programs(1) - 1)
    def _():
        o_ref[...] = (o_ref[...] + bias_ref[...]) * scale_ref[...] + shift_ref[...]


def conv_bn_matmul(patches_bf16, w_bf16, bias, scale, shift, *, tn=256, tk=4608):
    M, K = patches_bf16.shape
    K2, N = w_bf16.shape
    assert K == K2
    tn = min(tn, N)
    tk = min(tk, K)
    assert M % 8 == 0 and N % tn == 0 and K % tk == 0

    bias2 = bias.reshape(1, N).astype(jnp.float32)
    scale2 = scale.reshape(1, N).astype(jnp.float32)
    shift2 = shift.reshape(1, N).astype(jnp.float32)

    # VMEM budget (double-buffered, bf16): a (M,tk)=1.1MB + b (tk,tn)=2.3MB + out 0.25MB
    #   -> ~7 MB, well inside the scoped default on v5e/v6e/v7x.
    return pl.pallas_call(
        conv_bn_mm_kernel,
        out_shape=jax.ShapeDtypeStruct((M, N), jnp.float32),
        grid_spec=pltpu.PrefetchScalarGridSpec(
            num_scalar_prefetch=0,
            grid=(N // tn, K // tk),
            in_specs=[
                pl.BlockSpec((M, tk), lambda j, k: (0, k)),
                pl.BlockSpec((tk, tn), lambda j, k: (k, j)),
                pl.BlockSpec((1, tn), lambda j, k: (0, j)),
                pl.BlockSpec((1, tn), lambda j, k: (0, j)),
                pl.BlockSpec((1, tn), lambda j, k: (0, j)),
            ],
            out_specs=pl.BlockSpec((M, tn), lambda j, k: (0, j)),
        ),
        compiler_params=pltpu.CompilerParams(
            dimension_semantics=("parallel", "arbitrary")),
    )(patches_bf16, w_bf16, bias2, scale2, shift2)


# ----------------------------------------------------------------------------
# Kernel 2: fused post-conv1 tail, single invocation, everything in VMEM.
#   qkv projection (fused [512,1536] matmul) -> block-diagonal batched attention
#   with hop propagation -> output projection + residual -> top 1x1 conv + BN + ReLU.
# Matmul operands are bf16 (weights stored bf16, activations cast at the dot);
# accumulation, softmax and the bias/BN/ReLU epilogue stay in f32.
# ----------------------------------------------------------------------------
def ha_tail_kernel(x1_ref, wqkv_ref, bqkv_ref, wo_ref, bo_ref,
                   wtop_ref, btop_ref, scale2_ref, shift2_ref, o_ref,
                   *, delta, hop, nsp, channels):
    x1 = x1_ref[...]                                   # [M, C] f32, M = B*Nsp
    x1_16 = x1.astype(jnp.bfloat16)

    # fused q/k/v 1x1 convs
    qkv = jnp.dot(x1_16, wqkv_ref[...],
                  preferred_element_type=jnp.float32) + bqkv_ref[...]
    q = qkv[:, :channels]
    k = qkv[:, channels:2 * channels]
    v = qkv[:, 2 * channels:]

    # Block-diagonal batched attention: both batches computed as one [M, M]
    # affinity matrix (full 128-lane utilization); cross-batch pairs are masked.
    m = x1.shape[0]
    rb = jax.lax.broadcasted_iota(jnp.int32, (m, m), 0) // nsp
    cb = jax.lax.broadcasted_iota(jnp.int32, (m, m), 1) // nsp
    same_batch = rb == cb

    # contract last dims of both operands (no materialized transpose)
    scores = jax.lax.dot_general(
        q.astype(jnp.bfloat16), k.astype(jnp.bfloat16),
        dimension_numbers=(((1,), (1,)), ((), ())),
        preferred_element_type=jnp.float32)            # [M, M]
    scores = jnp.where(same_batch, scores, -1e30)
    scores = scores - jnp.max(scores, axis=-1, keepdims=True)
    e = jnp.exp(scores)
    a = e / jnp.sum(e, axis=-1, keepdims=True)

    # hop propagation: sum_{h=1..hop} delta^h A^h V   (A block-diagonal per batch)
    a16 = a.astype(jnp.bfloat16)
    y = v
    acc = jnp.zeros_like(v)
    for _ in range(hop):                               # hop is small and static
        y = delta * jnp.dot(a16, y.astype(jnp.bfloat16),
                            preferred_element_type=jnp.float32)
        acc = acc + y

    # output projection + residual
    x2 = jnp.dot(acc.astype(jnp.bfloat16), wo_ref[...],
                 preferred_element_type=jnp.float32) + bo_ref[...] + x1

    # top_conv: 1x1 conv + BN + Dropout(eval identity) + ReLU
    top = jnp.dot(x2.astype(jnp.bfloat16), wtop_ref[...],
                  preferred_element_type=jnp.float32) + btop_ref[...]
    top = top * scale2_ref[...] + shift2_ref[...]
    o_ref[...] = jnp.maximum(top, 0.0)


def ha_tail(x1, w_qkv_bf16, b_qkv, w_o_bf16, b_o, w_top_bf16, b_top,
            bn2_scale, bn2_shift, *, delta, hop, nsp, channels):
    M = x1.shape[0]
    n_out = w_top_bf16.shape[1]
    kernel = functools.partial(ha_tail_kernel, delta=delta, hop=hop,
                               nsp=nsp, channels=channels)
    # No grid: every operand (all tail weights ~2.4 MB bf16 + tiny activations)
    # lives fully in VMEM for the single invocation.
    return pl.pallas_call(
        kernel,
        out_shape=jax.ShapeDtypeStruct((M, n_out), jnp.float32),
    )(x1,
      w_qkv_bf16, b_qkv.reshape(1, -1).astype(jnp.float32),
      w_o_bf16, b_o.reshape(1, -1).astype(jnp.float32),
      w_top_bf16, b_top.reshape(1, -1).astype(jnp.float32),
      bn2_scale.reshape(1, -1).astype(jnp.float32),
      bn2_shift.reshape(1, -1).astype(jnp.float32))


# ----------------------------------------------------------------------------
# Glue: im2col (3x3, pad 1, stride 1), parameter init, full forward
# ----------------------------------------------------------------------------
def im2col_3x3(x_nhwc):
    B, H, W, C = x_nhwc.shape
    xp = jnp.pad(x_nhwc, ((0, 0), (1, 1), (1, 1), (0, 0)))
    cols = []
    for dh in range(3):
        for dw in range(3):
            cols.append(xp[:, dh:dh + H, dw:dw + W, :])
    return jnp.concatenate(cols, axis=-1).reshape(B * H * W, 9 * C)


def kaiming_normal(key, shape, fan_in):
    std = math.sqrt(2.0) / math.sqrt(fan_in)
    return std * jax.random.normal(key, shape, dtype=jnp.float32)


def conv_bias(key, shape, fan_in):
    bound = 1.0 / math.sqrt(fan_in)
    return jax.random.uniform(key, shape, jnp.float32, -bound, bound)


def init_params(key):
    C_IN, C_MID, C_TOP = 2048, 512, 256
    ks = jax.random.split(key, 12)
    eps = 1e-5
    bn_scale = 1.0 / math.sqrt(1.0 + eps)   # gamma=1, running_var=1, mean=0, beta=0
    p = {}
    # HA[0]: Conv2d(2048 -> 512, k=3, pad=1) stored as [kh*kw*Cin, Cout], bf16 weights
    p["w_conv1"] = kaiming_normal(ks[0], (9 * C_IN, C_MID), 9 * C_IN).astype(jnp.bfloat16)
    p["b_conv1"] = conv_bias(ks[1], (C_MID,), 9 * C_IN)
    p["bn1_scale"] = jnp.full((C_MID,), bn_scale, jnp.float32)
    p["bn1_shift"] = jnp.zeros((C_MID,), jnp.float32)
    # HA_unit: q/k/v 1x1 convs fused into one [512, 1536] weight, plus out proj
    wq = kaiming_normal(ks[2], (C_MID, C_MID), C_MID)
    wk = kaiming_normal(ks[3], (C_MID, C_MID), C_MID)
    wv = kaiming_normal(ks[4], (C_MID, C_MID), C_MID)
    p["w_qkv"] = jnp.concatenate([wq, wk, wv], axis=1).astype(jnp.bfloat16)
    p["b_qkv"] = jnp.concatenate([conv_bias(ks[5], (C_MID,), C_MID),
                                  conv_bias(ks[6], (C_MID,), C_MID),
                                  conv_bias(ks[7], (C_MID,), C_MID)])
    p["w_o"] = kaiming_normal(ks[8], (C_MID, C_MID), C_MID).astype(jnp.bfloat16)
    p["b_o"] = conv_bias(ks[9], (C_MID,), C_MID)
    # top_conv: 1x1 conv (512 -> 256) + BN + Dropout + ReLU
    p["w_top"] = kaiming_normal(ks[10], (C_MID, C_TOP), C_MID).astype(jnp.bfloat16)
    p["b_top"] = conv_bias(ks[11], (C_TOP,), C_MID)
    p["bn2_scale"] = jnp.full((C_TOP,), bn_scale, jnp.float32)
    p["bn2_shift"] = jnp.zeros((C_TOP,), jnp.float32)
    return p


def ha_module_forward(x_nchw, params, delta=0.5, hop=3):
    B, C_in, H, W = x_nchw.shape
    x_nhwc = jnp.transpose(x_nchw, (0, 2, 3, 1))              # NCHW -> NHWC
    # TODO(synk): im2col is materialized in HBM; fusing the 9 taps into the conv
    # kernel via a tap grid axis would remove ~19 MB of traffic for large inputs.
    patches = im2col_3x3(x_nhwc).astype(jnp.bfloat16)         # [B*H*W, 9*Cin] bf16

    # Conv3x3 + bias + BN (Pallas kernel 1)
    x1 = conv_bn_matmul(patches, params["w_conv1"], params["b_conv1"],
                        params["bn1_scale"], params["bn1_shift"])   # [B*H*W, 512] f32

    # Fused HA_unit (qkv + attention + o-proj + residual) + top_conv + BN + ReLU
    y = ha_tail(x1, params["w_qkv"], params["b_qkv"],
                params["w_o"], params["b_o"],
                params["w_top"], params["b_top"],
                params["bn2_scale"], params["bn2_shift"],
                delta=delta, hop=hop, nsp=H * W, channels=512)      # [B*H*W, 256]

    y = y.reshape(B, H, W, 256)
    return jnp.transpose(y, (0, 3, 1, 2))                      # NHWC -> NCHW


if __name__ == "__main__":
    key = jax.random.PRNGKey(0)
    k_param, k_x = jax.random.split(key)

    B, C_IN, H, W = 2, 2048, 8, 8          # small spatial; channels fixed by the module
    x = jax.random.normal(k_x, (B, C_IN, H, W), dtype=jnp.float32)
    params = init_params(k_param)

    out = ha_module_forward(x, params, delta=0.5, hop=3)
    out = jax.block_until_ready(out)
    assert out.shape == (B, 256, H, W)
    assert bool(jnp.all(jnp.isfinite(out)))
    print("KERNEL_OK")
</pallas_src>

<mosaic_0001>
module attributes {stable_mosaic.version = 11 : i64} {
  func.func @conv_bn_mm_kernel(%arg0: i32, %arg1: i32, %arg2: memref<128x4608xbf16, #tpu.memory_space<vmem>>, %arg3: memref<4608x256xbf16, #tpu.memory_space<vmem>>, %arg4: memref<1x256xf32, #tpu.memory_space<vmem>>, %arg5: memref<1x256xf32, #tpu.memory_space<vmem>>, %arg6: memref<1x256xf32, #tpu.memory_space<vmem>>, %arg7: memref<128x256xf32, #tpu.memory_space<vmem>>) attributes {dimension_semantics = [#tpu.dimension_semantics<parallel>, #tpu.dimension_semantics<arbitrary>], iteration_bounds = array<i64: 2, 4>, scalar_prefetch = 0 : i64, scratch_operands = 0 : i64, tpu.core_type = #tpu.core_type<tc>, window_params = [{transform_indices = @transform_0, window_bounds = array<i64: 128, 4608>}, {transform_indices = @transform_1, window_bounds = array<i64: 4608, 256>}, {transform_indices = @transform_2, window_bounds = array<i64: 1, 256>}, {transform_indices = @transform_3, window_bounds = array<i64: 1, 256>}, {transform_indices = @transform_4, window_bounds = array<i64: 1, 256>}, {transform_indices = @transform_5, window_bounds = array<i64: 128, 256>}]} {
    %c0_i32 = arith.constant 0 : i32
    %0 = arith.cmpi eq, %arg1, %c0_i32 : i32
    %1 = arith.extui %0 : i1 to i32
    %c0_i32_0 = arith.constant 0 : i32
    %2 = arith.cmpi ne, %1, %c0_i32_0 : i32
    scf.if %2 {
      %cst_9 = arith.constant 0.000000e+00 : f32
      %12 = vector.broadcast %cst_9 : f32 to vector<128x256xf32>
      %c0_10 = arith.constant 0 : index
      %c0_11 = arith.constant 0 : index
      %13 = vector.load %arg7[%c0_10, %c0_11] : memref<128x256xf32, #tpu.memory_space<vmem>>, vector<128x256xf32>
      tpu.vector_store %arg7[%c0_10, %c0_11], %12 {strides = array<i32>} : memref<128x256xf32, #tpu.memory_space<vmem>>, vector<128x256xf32>,
    } else {
    }
    %c0 = arith.constant 0 : index
    %c0_1 = arith.constant 0 : index
    %3 = vector.load %arg7[%c0, %c0_1] : memref<128x256xf32, #tpu.memory_space<vmem>>, vector<128x256xf32>
    %c0_2 = arith.constant 0 : index
    %c0_3 = arith.constant 0 : index
    %4 = vector.load %arg2[%c0_2, %c0_3] : memref<128x4608xbf16, #tpu.memory_space<vmem>>, vector<128x4608xbf16>
    %c0_4 = arith.constant 0 : index
    %c0_5 = arith.constant 0 : index
    %5 = vector.load %arg3[%c0_4, %c0_5] : memref<4608x256xbf16, #tpu.memory_space<vmem>>, vector<4608x256xbf16>
    %cst = arith.constant dense<0.000000e+00> : vector<128x256xf32>
    %6 = tpu.matmul %4, %5, %cst {dimension_numbers = #tpu.dot_dimension_numbers<[1], [0], [0], [1], [0, 0, 1, 1], [], []>} : vector<128x4608xbf16>, vector<4608x256xbf16>, vector<128x256xf32> -> vector<128x256xf32>
    %7 = arith.addf %3, %6 : vector<128x256xf32>
    %c0_6 = arith.constant 0 : index
    %c0_7 = arith.constant 0 : index
    %8 = vector.load %arg7[%c0_6, %c0_7] : memref<128x256xf32, #tpu.memory_space<vmem>>, vector<128x256xf32>
    tpu.vector_store %arg7[%c0_6, %c0_7], %7 {strides = array<i32>} : memref<128x256xf32, #tpu.memory_space<vmem>>, vector<128x256xf32>,
    %c3_i32 = arith.constant 3 : i32
    %9 = arith.cmpi eq, %arg1, %c3_i32 : i32
    %10 = arith.extui %9 : i1 to i32
    %c0_i32_8 = arith.constant 0 : i32
    %11 = arith.cmpi ne, %10, %c0_i32_8 : i32
    scf.if %11 {
      %c0_9 = arith.constant 0 : index
      %c0_10 = arith.constant 0 : index
      %12 = vector.load %arg7[%c0_9, %c0_10] : memref<128x256xf32, #tpu.memory_space<vmem>>, vector<128x256xf32>
      %c0_11 = arith.constant 0 : index
      %c0_12 = arith.constant 0 : index
      %13 = vector.load %arg4[%c0_11, %c0_12] : memref<1x256xf32, #tpu.memory_space<vmem>>, vector<1x256xf32>
      %14 = vector.broadcast %13 : vector<1x256xf32> to vector<128x256xf32>
      %15 = arith.addf %12, %14 : vector<128x256xf32>
      %c0_13 = arith.constant 0 : index
      %c0_14 = arith.constant 0 : index
      %16 = vector.load %arg5[%c0_13, %c0_14] : memref<1x256xf32, #tpu.memory_space<vmem>>, vector<1x256xf32>
      %17 = vector.broadcast %16 : vector<1x256xf32> to vector<128x256xf32>
      %18 = arith.mulf %15, %17 : vector<128x256xf32>
      %c0_15 = arith.constant 0 : index
      %c0_16 = arith.constant 0 : index
      %19 = vector.load %arg6[%c0_15, %c0_16] : memref<1x256xf32, #tpu.memory_space<vmem>>, vector<1x256xf32>
      %20 = vector.broadcast %19 : vector<1x256xf32> to vector<128x256xf32>
      %21 = arith.addf %18, %20 : vector<128x256xf32>
      %c0_17 = arith.constant 0 : index
      %c0_18 = arith.constant 0 : index
      %22 = vector.load %arg7[%c0_17, %c0_18] : memref<128x256xf32, #tpu.memory_space<vmem>>, vector<128x256xf32>
      tpu.vector_store %arg7[%c0_17, %c0_18], %21 {strides = array<i32>} : memref<128x256xf32, #tpu.memory_space<vmem>>, vector<128x256xf32>,
    } else {
    }
    return
  }
  func.func @transform_0(%arg0: i32, %arg1: i32) -> (i32, i32) {
    %c0_i32 = arith.constant 0 : i32
    %c0_i32_0 = arith.constant 0 : i32
    return %c0_i32, %arg1 : i32, i32
  }
  func.func @transform_1(%arg0: i32, %arg1: i32) -> (i32, i32) {
    %c0_i32 = arith.constant 0 : i32
    return %arg1, %arg0 : i32, i32
  }
  func.func @transform_2(%arg0: i32, %arg1: i32) -> (i32, i32) {
    %c0_i32 = arith.constant 0 : i32
    %c0_i32_0 = arith.constant 0 : i32
    return %c0_i32, %arg0 : i32, i32
  }
  func.func @transform_3(%arg0: i32, %arg1: i32) -> (i32, i32) {
    %c0_i32 = arith.constant 0 : i32
    %c0_i32_0 = arith.constant 0 : i32
    return %c0_i32, %arg0 : i32, i32
  }
  func.func @transform_4(%arg0: i32, %arg1: i32) -> (i32, i32) {
    %c0_i32 = arith.constant 0 : i32
    %c0_i32_0 = arith.constant 0 : i32
    return %c0_i32, %arg0 : i32, i32
  }
  func.func @transform_5(%arg0: i32, %arg1: i32) -> (i32, i32) {
    %c0_i32 = arith.constant 0 : i32
    %c0_i32_0 = arith.constant 0 : i32
    return %c0_i32, %arg0 : i32, i32
  }
}

</mosaic_0001>

<bundles_post_ra>
// kernel: tpu_custom_call.1
= control target key start
LH: loop header
LB: loop body
LE: loop exit
PB: predicated region body
PF: predicated region fallthrough
CT: control target
= control target key end

     0   :  { %s13037_s0 = inlined_call_operand.hbm [shape: bf16[128,18432], index: 0, kind: input, shape index: {}]   ;;  %s13038_s1 = inlined_call_operand.hbm [shape: bf16[18432,512], index: 1, kind: input, shape index: {}]   ;;  %s13039_s2 = inlined_call_operand.hbm [shape: f32[1,512], index: 2, kind: input, shape index: {}]   ;;  %s13040_s3 = inlined_call_operand.hbm [shape: f32[1,512], index: 3, kind: input, shape index: {}]   ;;  %s13041_s4 = inlined_call_operand.hbm [shape: f32[1,512], index: 4, kind: input, shape index: {}]   ;;  %s13042_s5 = inlined_call_operand.hbm [shape: f32[128,512], index: 5, kind: output, shape index: {}]  }
   0x1   :  { %13070 = sst [smem:[#allocation33_spill]] %s13037_s0 }
   0x2   :  { %13071 = sst [smem:[#allocation34_spill]] %s13038_s1 }
   0x3   :  { %13072 = sst [smem:[#allocation35_spill]] %s13039_s2 }
   0x4   :  { %13073 = sst [smem:[#allocation36_spill]] %s13040_s3 }
   0x5   :  { %13074 = sst [smem:[#allocation37_spill]] %s13041_s4 }
   0x6   :  { %13075 = sst [smem:[#allocation38_spill]] %s13042_s5 }
   0x7   :  { %10 = vsyncpa [#allocation3], 0 }
   0x8   :  { %12 = vsyncpa [#allocation3 + $0x1], 0 }
   0x9   :  { %13 = vsyncpa [#allocation6], 0 }
   0xa   :  { %15 = vsyncpa [#allocation6 + $0x1], 0 }
   0xb   :  { %16 = vsyncpa [#allocation9], 0 }
   0xc   :  { %18 = vsyncpa [#allocation9 + $0x1], 0 }
   0xd   :  { %19 = vsyncpa [#allocation4], 0 }
   0xe   :  { %21 = vsyncpa [#allocation4 + $0x1], 0  ;;  %s11407_s18 = smov 0   ;;  %s11409_s19 = smov 0  }
   0xf   :  { %s11411_s20 = smov 0   ;;  %s11413_s21 = smov 0  }
  0x10   :  { %s11415_s22 = smov 0   ;;  %s11417_s23 = smov 0  }
  0x11   :  { %s11419_s24 = smov 0   ;;  %s11421_s25 = smov 0  }
  0x12   :  { %s11423_s26 = smov 0   ;;  %s11425_s27 = smov 0  }
  0x13   :  { %s11427_s28 = smov 0   ;;  %s11429_s29 = smov 0  }
  0x14   :  { %s11431_s30 = smov 0   ;;  %s11433_s6 = smov 0  }
  0x15 LB: > { %13076 = sst [smem:[#allocation17_spill]] %s11307_s18  ;;  %s36_s7 = sadd.s32 1, %s11351_s29  ;;  %s11359_s6 = sphi %s11433_s6, %s27_s6   ;;  %s11355_s30 = sphi %s11431_s30, %s13145_s30   ;;  %s11351_s29 = sphi %s11429_s29, %s13144_s29   ;;  %s11347_s28 = sphi %s11427_s28, %s13143_s28   ;;  %s11343_s27 = sphi %s11425_s27, %s13142_s27   ;;  %s11339_s26 = sphi %s11423_s26, %s13141_s26   ;;  %s11335_s25 = sphi %s11421_s25, %s13151_s25   ;;  %s11331_s24 = sphi %s11419_s24, %s13150_s24   ;;  %s11327_s23 = sphi %s11417_s23, %s13139_s23   ;;  %s11323_s22 = sphi %s11415_s22, %s13149_s22   ;;  %s11319_s21 = sphi %s11413_s21, %s13148_s21   ;;  %s11315_s20 = sphi %s11411_s20, %s13137_s20   ;;  %s11311_s19 = sphi %s11409_s19, %s13147_s19   ;;  %s11307_s18 = sphi %s11407_s18, %s13146_s18  }
  0x16   : > { %13077 = sst [smem:[#allocation18_spill]] %s11315_s20  ;;  %s39_s8 = sadd.s32 1, %s11355_s30 }
  0x17   : > { %13078 = sst [smem:[#allocation19_spill]] %s11327_s23  ;;  %p37_p0 = scmp.ge.s32.totalorder %s36_s7, 4 }
  0x18   : > { %13079 = sst [smem:[#allocation20_spill]] %s11331_s24  ;;  %p13050_p1 = scmp.eq.s32.totalorder %s11359_s6, 0 }
  0x19   : > { %13080 = sst [smem:[#allocation21_spill]] %s11339_s26  ;;  %s74_s9 = sadd.s32 1, %s11327_s23 }
  0x1a   : > { %13081 = sst [smem:[#allocation22_spill]] %s11343_s27  ;;  %p81_p2 = scmp.ne.s32.totalorder %s11327_s23, %s11323_s22 }
  0x1b   : > { %13082 = sst [smem:[#allocation23_spill]] %s11347_s28  ;;  %s13153_s7 = smov (%p37_p0, %s36_s7), 0 }
  0x1c   : > { %13083 = sst [smem:[#allocation24_spill]] %s11351_s29  ;;  %s13155_s8 = smov (!%p37_p0, %s39_s8), %s11355_s30 }
  0x1d   : > { %13084 = sst [smem:[#allocation25_spill]] %s11355_s30  ;;  %s11488_s10 = ssub.s32 %s11351_s29, %s13153_s7 }
  0x1e   : > { %13085 = sst [smem:[#allocation26_spill]] %s11359_s6  ;;  %p11492_p3 = por %p81_p2, %p13050_p1 }
  0x1f   : > { %13086 = sst [smem:[#allocation27_spill]] %s13153_s7  ;;  %p41_p4 = scmp.ge.s32.totalorder %s13155_s8, 2 }
  0x20   : > { %p13049_p7 = scmp.lt.s32.totalorder %s11359_s6, 8  ;;  %s13051_s12 = smul.u32 2304, %s11351_s29 }
  0x21   : > { %s13157_s8 = smov (%p41_p4, %s13155_s8), 0  ;;  %s13052_s14 = sand.u32 1, %s11359_s6  }
  0x22   : > { %13088 = sst [smem:[#allocation28_spill]] %s13157_s8  ;;  %s11505_s13 = ssub.s32 %s11355_s30, %s13157_s8 }
  0x23   : > { %s71_s15 = sor.u32 %s11505_s13, %s11488_s10  ;;  %s238_s16 = sand.u32 1, %s11327_s23  }
  0x24   : > { %p72_p8 = scmp.eq.s32.totalorder %s71_s15, 0  ;;  %s9596_s17 = smul.u32 4608, %s238_s16 }
  0x25   : > { %s8157_s7 = sshll.u32 %s11355_s30, 1  ;;  %s13090_s1 = sld [smem:[#allocation34_spill]] }
  0x26   : > { %s11513_s5 = scalar_select %p72_p8, %s11327_s23, %s74_s9  }
  0x27   : > { %s247_s28 = sadd.s32 %s13051_s12, %s8157_s7  ;;  %s240_s4 = scalar_lea.vmem [#allocation5], %s9596_s17 }
  0x28   : > { %13089 = sst [smem:[#allocation29_spill]] %s11513_s5  ;;  %s8159_s27 = sshll.u32 %s247_s28, 6 }
  0x29   : > { %s250_s2 = sshll.u32 %s240_s4, 4  ;;  %p11528_p9 = pnand %p13049_p7, %p11492_p3  ;;  %s11522_s2 = int_to_ptr.vmem [resolvable:$true] %s250_s2 }
  0x2a   : > { %p8169_p10 = scmp.ge.s32.totalorder %s11359_s6, 1  ;;  %s11535_s4 = scalar_lea.sflag [#allocation6], %s13052_s14 }
  0x2b   : > { %s11520_s8 = scalar_lea.hbm %s13090_s1, %s8159_s27  ;;  %p11053_p12 = pneg %p11528_p9 }
  0x2c   : > { %s11051_s0 = scalar_lea.hbm %s11520_s8, 73728  ;;  %s11056_s28 = scalar_lea.hbm %s13090_s1, 589824 }
  0x2d   : > { %p11052_p11 = scmp.ne.s32.totalorder %s11520_s8, %s11051_s0  ;;  %p11057_p2 = scmp.lt.u32.totalorder %s11520_s8, %s13090_s1 }
  0x2e   : > { %p11058_p3 = scmp.lt.u32.totalorder %s11056_s28, %s11051_s0  ;;  %p11060_p8 = scmp.lt.u32.totalorder %s11051_s0, %s11520_s8 }
  0x2f   : > { %p11054_p13 = pnand %p11053_p12, %p11052_p11 }
  0x30   : > { %p11059_p4 = por %p11058_p3, %p11057_p2 }
  0x31   : > { %p11055_p0 = pneg %p11054_p13 }
  0x32   : > { %p11061_p5 = por %p11060_p8, %p11059_p4 }
  0x34   : > { %p11062_p7 = pnand %p11061_p5, %p11055_p0 }
  0x36   : > { %11065 = shalt.err (!%p11062_p7)
}
  0x37   : > { %s11066_s15 = scalar_lea.vmem %s11522_s2, 73728  ;;  %s11361_s16 = smov [#allocation5]  }
  0x38   : > { %p11067_p11 = scmp.ne.s32.totalorder %s11522_s2, %s11066_s15  ;;  %s11071_s17 = sshll.u32 %s11361_s16, 4  ;;  %s11072_s17 = int_to_ptr.vmem [resolvable:$false] %s11071_s17 }
  0x39   : > { %s11073_s24 = scalar_lea.vmem %s11072_s17, 147456  ;;  %p11074_p6 = scmp.lt.s32.totalorder %s11522_s2, %s11072_s17 }
  0x3a   : > { %p11069_p13 = pnand %p11067_p11, %p11053_p12  ;;  %p11075_p2 = scmp.lt.s32.totalorder %s11073_s24, %s11066_s15 }
  0x3c   : > { %p11070_p1 = pneg %p11069_p13  ;;  %p11076_p3 = por %p11075_p2, %p11074_p6 }
  0x3e   : > { %p11077_p4 = pnand %p11076_p3, %p11070_p1 }
  0x40   : > { %11080 = shalt.err (!%p11077_p4)
}
  0x41   : > { %s11362_s0 = smov 256   ;;  %s11363_s27 = smov 128  }
  0x42   : > { %s11364_s28 = smov 8   ;;  %p315_p1 = scmp.lt.s32.totalorder %s11359_s6, 9 }
  0x43   : > { %9617 = dma.hbm_to_vmem [thread:$0]  (!%p11528_p9), %s11520_s8, 73728, %s11522_s2, %s11535_s4, %s11362_s0, %s11363_s27, %s11364_s28  }
  0x44   : > { %p11566_p5 = pnand %p8169_p10, %p315_p1  ;;  %s11571_s11 = sadd.s32 4294967295, %s11359_s6  }
  0x45   : > { %s8153_s15 = sadd.s32 4294967294, %s11359_s6   ;;  %p13055_p6 = scmp.eq.s32.totalorder %s11571_s11, 0 }
  0x46   : > { %s13092_s7 = scalar_select %p11566_p5, 1, 0 }
  0x47   : > { %p98_p7 = scmp.eq.s32.totalorder %s11505_s13, 0  ;;  %s100_s9 = sadd.s32 1, %s11315_s20 }
  0x48   : > { %p107_p9 = scmp.ne.s32.totalorder %s11315_s20, %s11311_s19  ;;  %p13093_p12 = scmp.ne.s32.totalorder %s11323_s22, %s11319_s21 }
  0x49   : > { %p113_p10 = scmp.ne.s32.totalorder %s11311_s19, %s11307_s18  ;;  %p13096_p8 = scmp.eq.s32.totalorder %s11359_s6, 0 }
  0x4a   : > { %p11584_p0 = por %p13093_p12, %p13055_p6  ;;  %p189_p2 = scmp.eq.s32.totalorder %s11571_s11, 7 }
  0x4b   : > { %s11591_s8 = scalar_select %p98_p7, %s11315_s20, %s100_s9  }
  0x4c   : > { %s13094_s2 = scalar_select %p11584_p0, 1, 0 }
  0x4d   : > { %13095 = sst [smem:[#allocation30_spill]] %s11591_s8  ;;  %p109_p11 = por %p107_p9, %p13096_p8 }
  0x4e   : > { %p11597_p13 = por %p113_p10, %p13055_p6  ;;  %p195_p3 = scmp.eq.s32.totalorder %s8153_s15, 7 }
  0x4f   : > { %s262_s13 = sand.u32 1, %s11315_s20   ;;  %s11604_s17 = sshll.u32 %s11355_s30, 5 }
  0x50   : > { %s13097_s16 = scalar_select %p11597_p13, 1, 0 }
  0x51   : > { %p11606_p4 = por %p189_p2, %p107_p9  ;;  %p11610_p1 = por %p195_p3, %p113_p10 }
  0x52   : > { %s11614_s0 = sshll.u32 %s262_s13, 1  ;;  %p13101_p7 = scmp.lt.s32.totalorder %s11359_s6, 8 }
  0x53   : > { %s13098_s21 = scalar_select %p11606_p4, 1, 0 }
  0x54   : > { %s13099_s24 = scalar_select %p11610_p1, 1, 0 }
  0x55   : > { %p11618_p12 = pnand %p13101_p7, %p109_p11  ;;  %s13103_s3 = sld [smem:[#allocation36_spill]] }
  0x56   : > { %13100 = sst [smem:[#allocation31_spill]] %s13099_s24  ;;  %s283_s12 = scalar_lea.vmem [#allocation8], %s11614_s0 }
  0x57   : > { %s13102_s27 = scalar_select %p11618_p12, 1, 0 }
  0x58   : > { %s291_s14 = sshll.u32 %s283_s12, 4  ;;  %s13104_s13 = sand.u32 1, %s11359_s6   ;;  %s11629_s14 = int_to_ptr.vmem [resolvable:$true] %s291_s14 }
  0x59   : > { %s11633_s1 = scalar_lea.sflag [#allocation9], %s13104_s13  ;;  %p11639_p10 = pneg %p11618_p12 }
  0x5b   : > { %s11626_s9 = scalar_lea.hbm %s13103_s3, %s11604_s17  ;;  %s11086_s12 = scalar_lea.hbm %s13103_s3, 64 }
  0x5c   : > { %s11081_s30 = scalar_lea.hbm %s11626_s9, 32  ;;  %p11087_p2 = scmp.lt.u32.totalorder %s11626_s9, %s13103_s3 }
  0x5d   : > { %p11082_p9 = scmp.ne.s32.totalorder %s11626_s9, %s11081_s30  ;;  %p11088_p3 = scmp.lt.u32.totalorder %s11086_s12, %s11081_s30 }
  0x5e   : > { %p11090_p6 = scmp.lt.u32.totalorder %s11081_s30, %s11626_s9 }
  0x5f   : > { %p11084_p8 = pnand %p11639_p10, %p11082_p9  ;;  %p11089_p7 = por %p11088_p3, %p11087_p2 }
  0x61   : > { %p11085_p11 = pneg %p11084_p8  ;;  %p11091_p1 = por %p11090_p6, %p11089_p7 }
  0x63   : > { %p11092_p4 = pnand %p11091_p1, %p11085_p11 }
  0x65   : > { %11095 = shalt.err (!%p11092_p4)
}
  0x66   : > { %s11096_s13 = scalar_lea.vmem %s11629_s14, 32  ;;  %s11365_s28 = smov [#allocation8]  }
  0x67   : > { %p11097_p9 = scmp.ne.s32.totalorder %s11629_s14, %s11096_s13  ;;  %s11101_s15 = sshll.u32 %s11365_s28, 4  ;;  %s11102_s15 = int_to_ptr.vmem [resolvable:$false] %s11101_s15 }
  0x68   : > { %s11103_s23 = scalar_lea.vmem %s11102_s15, 64  ;;  %p11104_p0 = scmp.lt.s32.totalorder %s11629_s14, %s11102_s15 }
  0x69   : > { %p11099_p8 = pnand %p11097_p9, %p11639_p10  ;;  %p11105_p5 = scmp.lt.s32.totalorder %s11103_s23, %s11096_s13 }
  0x6b   : > { %p11100_p13 = pneg %p11099_p8  ;;  %p11106_p2 = por %p11105_p5, %p11104_p0 }
  0x6d   : > { %p11107_p3 = pnand %p11106_p2, %p11100_p13 }
  0x6f   : > { %11110 = shalt.err (!%p11107_p3)
}
  0x70   : > { %s13106_s30 = sld [smem:[#allocation20_spill]]  ;;  %s46_s8 = sadd.s32 1, %s11339_s26 }
  0x71   : > { %9623 = dma.hbm_to_vmem [thread:$0]  (!%p11618_p12), %s11626_s9, 32, %s11629_s14, %s11633_s1  }
  0x72   : > { %p53_p5 = scmp.ne.s32.totalorder %s11339_s26, %s11335_s25  ;;  %p13107_p6 = scmp.eq.s32.totalorder %s11488_s10, 0 }
  0x73   : > { %p13109_p0 = scmp.eq.s32.totalorder %s11359_s6, 0  ;;  %s215_s13 = sand.u32 1, %s11339_s26  }
  0x74   : > { %s11669_s12 = scalar_select %p13107_p6, %s11339_s26, %s46_s8  }
  0x75   : > { %p55_p13 = por %p13109_p0, %p53_p5  ;;  %s13110_s28 = smul.u32 2304, %s11351_s29 }
  0x76   : > { %13108 = sst [smem:[#allocation32_spill]] %s11669_s12  ;;  %p59_p4 = scmp.ne.s32.totalorder %s11335_s25, %s13106_s30 }
  0x77   : > { %s13111_s3 = sld [smem:[#allocation33_spill]]  ;;  %p13112_p1 = scmp.eq.s32.totalorder %s11571_s11, 0 }
  0x78   : > { %s9595_s10 = smul.u32 2304, %s215_s13  ;;  %p13114_p7 = scmp.lt.s32.totalorder %s11359_s6, 8 }
  0x79   : > { %p11685_p11 = por %p13112_p1, %p59_p4 }
  0x7a   : > { %p11691_p9 = pnand %p13114_p7, %p55_p13  ;;  %s219_s30 = scalar_lea.vmem [#allocation2], %s9595_s10 }
  0x7b   : > { %s13113_s14 = scalar_select %p11685_p11, 1, 0 }
  0x7c   : > { %s226_s8 = sshll.u32 %s219_s30, 4  ;;  %p11113_p2 = pneg %p11691_p9  ;;  %s11695_s8 = int_to_ptr.vmem [resolvable:$true] %s226_s8 }
  0x7d   : > { %s11681_s20 = scalar_lea.hbm %s13111_s3, %s13110_s28  ;;  %s11697_s28 = scalar_lea.sflag [#allocation3], %s215_s13 }
  0x7e   : > { %s11111_s15 = scalar_lea.hbm %s11681_s20, 36864  ;;  %s11116_s12 = scalar_lea.hbm %s13111_s3, 147456 }
  0x7f   : > { %p11112_p8 = scmp.ne.s32.totalorder %s11681_s20, %s11111_s15  ;;  %p11117_p6 = scmp.lt.u32.totalorder %s11681_s20, %s13111_s3 }
  0x80   : > { %p11118_p0 = scmp.lt.u32.totalorder %s11116_s12, %s11111_s15  ;;  %p11120_p4 = scmp.lt.u32.totalorder %s11111_s15, %s11681_s20 }
  0x81   : > { %p11114_p3 = pnand %p11113_p2, %p11112_p8 }
  0x82   : > { %p11119_p13 = por %p11118_p0, %p11117_p6 }
  0x83   : > { %p11115_p5 = pneg %p11114_p3 }
  0x84   : > { %p11121_p1 = por %p11120_p4, %p11119_p13 }
  0x86   : > { %p11122_p7 = pnand %p11121_p1, %p11115_p5 }
  0x88   : > { %11125 = shalt.err (!%p11122_p7)
}
  0x89   : > { %s11126_s13 = scalar_lea.vmem %s11695_s8, 36864  ;;  %s11366_s29 = smov [#allocation2]  }
  0x8a   : > { %p11127_p8 = scmp.ne.s32.totalorder %s11695_s8, %s11126_s13  ;;  %s11131_s10 = sshll.u32 %s11366_s29, 4  ;;  %s11132_s10 = int_to_ptr.vmem [resolvable:$false] %s11131_s10 }
  0x8b   : > { %s11133_s26 = scalar_lea.vmem %s11132_s10, 73728  ;;  %p11134_p12 = scmp.lt.s32.totalorder %s11695_s8, %s11132_s10 }
  0x8c   : > { %p11129_p3 = pnand %p11127_p8, %p11113_p2  ;;  %p11135_p6 = scmp.lt.s32.totalorder %s11133_s26, %s11126_s13 }
  0x8e   : > { %p11130_p11 = pneg %p11129_p3  ;;  %p11136_p0 = por %p11135_p6, %p11134_p12 }
  0x90   : > { %p11137_p13 = pnand %p11136_p0, %p11130_p11 }
  0x92   : > { %11140 = shalt.err (!%p11137_p13)
}
  0x93   : > { %s11367_s24 = smov 9216   ;;  %s11368_s12 = smov 2304  }
  0x94   : > { %s11369_s30 = smov 144   ;;  %s13116_s29 = sld [smem:[#allocation35_spill]] }
  0x95   : > { %9614 = dma.hbm_to_vmem [thread:$0]  (!%p11691_p9), %s11681_s20, 36864, %s11695_s8, %s11697_s28, %s11367_s24, %s11368_s12, %s11369_s30  }
  0x96   : > { %s264_s13 = scalar_lea.vmem [#allocation7], %s11614_s0 }
  0x97   : > { %s272_s26 = sshll.u32 %s264_s13, 4  ;;  %s273_s26 = int_to_ptr.vmem [resolvable:$true] %s272_s26 }
  0x9a   : > { %s13117_s3 = smov %s13116_s29  ;;  %s11729_s10 = scalar_lea.hbm %s13116_s29, %s11604_s17 }
  0x9b   : > { %s11141_s18 = scalar_lea.hbm %s11729_s10, 32  ;;  %s11146_s20 = scalar_lea.hbm %s13117_s3, 64 }
  0x9c   : > { %p11142_p12 = scmp.ne.s32.totalorder %s11729_s10, %s11141_s18  ;;  %p11147_p9 = scmp.lt.u32.totalorder %s11729_s10, %s13117_s3 }
  0x9d   : > { %p11148_p5 = scmp.lt.u32.totalorder %s11146_s20, %s11141_s18  ;;  %p11150_p1 = scmp.lt.u32.totalorder %s11141_s18, %s11729_s10 }
  0x9e   : > { %p11144_p11 = pnand %p11142_p12, %p11639_p10 }
  0x9f   : > { %p11149_p4 = por %p11148_p5, %p11147_p9 }
  0xa0   : > { %p11145_p2 = pneg %p11144_p11 }
  0xa1   : > { %p11151_p7 = por %p11150_p1, %p11149_p4 }
  0xa3   : > { %p11152_p8 = pnand %p11151_p7, %p11145_p2 }
  0xa5   : > { %11155 = shalt.err (!%p11152_p8)
}
  0xa6   : > { %s11156_s24 = scalar_lea.vmem %s273_s26, 32  ;;  %s11370_s12 = smov [#allocation7]  }
  0xa7   : > { %p11157_p3 = scmp.ne.s32.totalorder %s273_s26, %s11156_s24  ;;  %s11161_s30 = sshll.u32 %s11370_s12, 4  ;;  %s11162_s30 = int_to_ptr.vmem [resolvable:$false] %s11161_s30 }
  0xa8   : > { %s11163_s6 = scalar_lea.vmem %s11162_s30, 64  ;;  %p11164_p13 = scmp.lt.s32.totalorder %s273_s26, %s11162_s30 }
  0xa9   : > { %p11159_p6 = pnand %p11157_p3, %p11639_p10  ;;  %p11165_p12 = scmp.lt.s32.totalorder %s11163_s6, %s11156_s24 }
  0xab   : > { %p11160_p0 = pneg %p11159_p6  ;;  %p11166_p11 = por %p11165_p12, %p11164_p13 }
  0xad   : > { %p11167_p5 = pnand %p11166_p11, %p11160_p0 }
  0xaf   : > { %11170 = shalt.err (!%p11167_p5)
}
  0xb0   : > { %p13118_p9 = scmp.ne.s32.totalorder %s13102_s27, 0  ;;  %s13119_s23 = sld [smem:[#allocation37_spill]] }
  0xb1   : > { %s302_s9 = scalar_lea.vmem [#allocation10], %s11614_s0 }
  0xb2   : > { %9620 = dma.hbm_to_vmem [thread:$0]  (!%p13118_p9), %s11729_s10, 32, %s273_s26, %s11535_s4  }
  0xb3   : > { %s310_s20 = sshll.u32 %s302_s9, 4  ;;  %s311_s20 = int_to_ptr.vmem [resolvable:$true] %s310_s20 }
  0xb6   : > { %s13120_s13 = smov %s13119_s23  ;;  %s11754_s29 = scalar_lea.hbm %s13119_s23, %s11604_s17 }
  0xb7   : > { %s11171_s8 = scalar_lea.hbm %s11754_s29, 32  ;;  %s11176_s4 = scalar_lea.hbm %s13120_s13, 64 }
  0xb8   : > { %p11172_p2 = scmp.ne.s32.totalorder %s11754_s29, %s11171_s8  ;;  %p11177_p7 = scmp.lt.u32.totalorder %s11754_s29, %s13120_s13 }
  0xb9   : > { %p11178_p8 = scmp.lt.u32.totalorder %s11176_s4, %s11171_s8  ;;  %p11180_p6 = scmp.lt.u32.totalorder %s11171_s8, %s11754_s29 }
  0xba   : > { %p11174_p4 = pnand %p11172_p2, %p11639_p10 }
  0xbb   : > { %p11179_p3 = por %p11178_p8, %p11177_p7 }
  0xbc   : > { %p11175_p1 = pneg %p11174_p4 }
  0xbd   : > { %p11181_p0 = por %p11180_p6, %p11179_p3 }
  0xbf   : > { %p11182_p13 = pnand %p11181_p0, %p11175_p1 }
  0xc1   : > { %11185 = shalt.err (!%p11182_p13)
}
  0xc2   : > { %s11186_s17 = scalar_lea.vmem %s311_s20, 32  ;;  %s11371_s0 = smov [#allocation10]  }
  0xc3   : > { %p11187_p12 = scmp.ne.s32.totalorder %s311_s20, %s11186_s17  ;;  %s11191_s12 = sshll.u32 %s11371_s0, 4  ;;  %s11192_s12 = int_to_ptr.vmem [resolvable:$false] %s11191_s12 }
  0xc4   : > { %s11193_s30 = scalar_lea.vmem %s11192_s12, 64  ;;  %p11194_p2 = scmp.lt.s32.totalorder %s311_s20, %s11192_s12 }
  0xc5   : > { %p11189_p11 = pnand %p11187_p12, %p11639_p10  ;;  %p11195_p4 = scmp.lt.s32.totalorder %s11193_s30, %s11186_s17 }
  0xc7   : > { %p11190_p5 = pneg %p11189_p11  ;;  %p11196_p9 = por %p11195_p4, %p11194_p2 }
  0xc9   : > { %p11197_p7 = pnand %p11196_p9, %p11190_p5 }
  0xcb   : > { %11200 = shalt.err (!%p11197_p7)
}
  0xcc   : > { %p13121_p8 = scmp.ne.s32.totalorder %s13102_s27, 0  ;;  %p13122_p1 = scmp.ne.s32.totalorder %s13092_s7, 0 }
  0xcd   : > { %s321_s5 = sand.u32 (!%p13122_p1), 1, %s11335_s25   ;;  %p13123_p10 = scmp.ne.s32.totalorder (!%p13122_p1), %s13113_s14, 0 }
  0xce   : > { %9626 = dma.hbm_to_vmem [thread:$0]  (!%p13121_p8), %s11754_s29, 32, %s311_s20, %s11633_s1  }
  0xcf   : > { %319 = sbr.rel (%p13122_p1) target bundleno = 1154 (0x482), region = 40  ;;  %s322_s18 = scalar_lea.sflag (!%p13122_p1), [#allocation3], %s321_s5 }
  0xd0   : > { %s9597_s6 = smul.u32 (!%p13122_p1), 2304, %s321_s5 }
  0xd2   : > { %s11778_s15 = scalar_lea.vmem (!%p13122_p1), [#allocation2], %s9597_s6 }
  0xd6   : > { %11286 = dma.done.wait (%p13123_p10), %s322_s18, 36864  }
  0xd7   : > { %11288 = vsyncadd (%p13123_p10), %s322_s18, 4294930432  ;;  %s330_s27 = sand.u32 1, %s11571_s11   ;;  %s332_s1 = sand.u32 1, %s11323_s22  }
  0xd8   : > { %s9598_s23 = smul.u32 4608, %s332_s1  ;;  %s331_s7 = scalar_lea.sflag [#allocation6], %s330_s27 }
  0xd9   : > { %p13124_p9 = scmp.ne.s32.totalorder %s13094_s2, 0 }
  0xda   : > { %s11786_s29 = scalar_lea.vmem [#allocation5], %s9598_s23 }
  0xdb   : > { %11290 = dma.done.wait (%p13124_p9), %s331_s7, 73728  }
  0xdc   : > { %11292 = vsyncadd (%p13124_p9), %s331_s7, 4294893568  ;;  %s11793_s9 = sand.u32 1, %s11311_s19   ;;  %p13125_p3 = scmp.ne.s32.totalorder %s13097_s16, 0 }
  0xdd   : > { %s11796_s14 = sshll.u32 %s11793_s9, 1 }
  0xde   : > { %s343_s20 = scalar_lea.vmem [#allocation7], %s11796_s14 }
  0xdf   : > { %11294 = dma.done.wait (%p13125_p3), %s331_s7, 32  }
  0xe0   : > { %11296 = vsyncadd (%p13125_p3), %s331_s7, 4294967264  ;;  %s349_s11 = scalar_lea.sflag [#allocation9], %s330_s27  ;;  %s352_s8 = scalar_lea.vmem [#allocation8], %s11796_s14 }
  0xe1   : > { %11298 = dma.done.wait (%p13125_p3), %s349_s11, 64  }
  0xe2   : > { %11300 = vsyncadd (%p13125_p3), %s349_s11, 4294967232  ;;  %s8173_s2 = sshll.u32 %s11793_s9, 8  ;;  %s361_s28 = scalar_lea.vmem [#allocation10], %s11796_s14 }
  0xe3   : > { %s11810_s24 = scalar_lea.vmem [#allocation11], %s8173_s2  ;;  %s13126_s4 = sld [smem:[#allocation22_spill]] }
  0xe9   : > { %p8174_p6 = scmp.ne.s32.totalorder %s13126_s4, 0 }
  0xea   : > { %v11372_v0 = vmov (!%p8174_p6), 0.0  }
  0xeb   : > { %418 = sbr.rel (%p8174_p6) target bundleno = 251 (0xfb), region = 64  ;;  %419 = vst [vmem:[%s11810_s24] sm:$0xff] (!%p8174_p6), %v11372_v0  ;;  %420 = vst [vmem:[%s11810_s24 + $0x8] sm:$0xff] (!%p8174_p6), %v11372_v0 }
  0xec   : > { %421 = vst [vmem:[%s11810_s24 + $0x10] sm:$0xff] (!%p8174_p6), %v11372_v0  ;;  %422 = vst [vmem:[%s11810_s24 + $0x18] sm:$0xff] (!%p8174_p6), %v11372_v0 }
  0xed   : > { %423 = vst [vmem:[%s11810_s24 + $0x20] sm:$0xff] (!%p8174_p6), %v11372_v0  ;;  %424 = vst [vmem:[%s11810_s24 + $0x28] sm:$0xff] (!%p8174_p6), %v11372_v0 }
  0xee   : > { %425 = vst [vmem:[%s11810_s24 + $0x30] sm:$0xff] (!%p8174_p6), %v11372_v0  ;;  %426 = vst [vmem:[%s11810_s24 + $0x38] sm:$0xff] (!%p8174_p6), %v11372_v0 }
  0xef   : > { %427 = vst [vmem:[%s11810_s24 + $0x40] sm:$0xff] (!%p8174_p6), %v11372_v0  ;;  %428 = vst [vmem:[%s11810_s24 + $0x48] sm:$0xff] (!%p8174_p6), %v11372_v0 }
  0xf0   : > { %429 = vst [vmem:[%s11810_s24 + $0x50] sm:$0xff] (!%p8174_p6), %v11372_v0  ;;  %430 = vst [vmem:[%s11810_s24 + $0x58] sm:$0xff] (!%p8174_p6), %v11372_v0 }
  0xf1   : > { %431 = vst [vmem:[%s11810_s24 + $0x60] sm:$0xff] (!%p8174_p6), %v11372_v0  ;;  %432 = vst [vmem:[%s11810_s24 + $0x68] sm:$0xff] (!%p8174_p6), %v11372_v0 }
  0xf2   : > { %433 = vst [vmem:[%s11810_s24 + $0x70] sm:$0xff] %v11372_v0  ;;  %434 = vst [vmem:[%s11810_s24 + $0x78] sm:$0xff] %v11372_v0 }
  0xf3   : > { %435 = vst [vmem:[%s11810_s24 + $0x80] sm:$0xff] %v11372_v0  ;;  %436 = vst [vmem:[%s11810_s24 + $0x88] sm:$0xff] %v11372_v0 }
  0xf4   : > { %437 = vst [vmem:[%s11810_s24 + $0x90] sm:$0xff] %v11372_v0  ;;  %438 = vst [vmem:[%s11810_s24 + $0x98] sm:$0xff] %v11372_v0 }
  0xf5   : > { %439 = vst [vmem:[%s11810_s24 + $0xa0] sm:$0xff] %v11372_v0  ;;  %440 = vst [vmem:[%s11810_s24 + $0xa8] sm:$0xff] %v11372_v0 }
  0xf6   : > { %441 = vst [vmem:[%s11810_s24 + $0xb0] sm:$0xff] %v11372_v0  ;;  %442 = vst [vmem:[%s11810_s24 + $0xb8] sm:$0xff] %v11372_v0 }
  0xf7   : > { %443 = vst [vmem:[%s11810_s24 + $0xc0] sm:$0xff] %v11372_v0  ;;  %444 = vst [vmem:[%s11810_s24 + $0xc8] sm:$0xff] %v11372_v0 }
  0xf8   : > { %445 = vst [vmem:[%s11810_s24 + $0xd0] sm:$0xff] %v11372_v0  ;;  %446 = vst [vmem:[%s11810_s24 + $0xd8] sm:$0xff] %v11372_v0 }
  0xf9   : > { %447 = vst [vmem:[%s11810_s24 + $0xe0] sm:$0xff] %v11372_v0  ;;  %448 = vst [vmem:[%s11810_s24 + $0xe8] sm:$0xff] %v11372_v0 }
  0xfa   : > { %449 = vst [vmem:[%s11810_s24 + $0xf0] sm:$0xff] %v11372_v0  ;;  %450 = vst [vmem:[%s11810_s24 + $0xf8] sm:$0xff] %v11372_v0 }
  0xfb PF: > { %v9755_v1 = vld [vmem:[%s11786_s29 + $0x4] ss:$8 sps:$4 sm:$0xff]   ;;  %v9759_v3 = vld [vmem:[%s11786_s29] ss:$8 sps:$4 sm:$0xff]   ;;  %v9761_v5 = vld [vmem:[%s11786_s29 + $0x14] ss:$8 sps:$4 sm:$0xff]  }
  0xfc   : > { %v9757_v2 = vld [vmem:[%s11786_s29 + $0x904] ss:$8 sps:$4 sm:$0xff]   ;;  %5667 = vmatprep.subr.bf16.mxu1 %v9755_v1  ;;  %v9760_v4 = vld [vmem:[%s11786_s29 + $0x900] ss:$8 sps:$4 sm:$0xff]   ;;  %v9763_v6 = vld [vmem:[%s11786_s29 + $0x914] ss:$8 sps:$4 sm:$0xff]  }
  0xfd   : > { %6684 = vmatprep.subr.bf16.mxu0 %v9757_v2  ;;  %5668 = vmatpush1.bf16.msra.mxu1 %v9759_v3  ;;  %v9765_v7 = vld [vmem:[%s11786_s29 + $0x10] ss:$8 sps:$4 sm:$0xff]   ;;  %v9767_v9 = vld [vmem:[%s11786_s29 + $0x24] ss:$8 sps:$4 sm:$0xff]   ;;  %v9771_v11 = vld [vmem:[%s11786_s29 + $0x20] ss:$8 sps:$4 sm:$0xff]  }
  0xfe   : > { %6685 = vmatpush1.bf16.msra.mxu0 %v9760_v4  ;;  %5669 = vmatprep.subr.bf16.mxu1 %v9761_v5  ;;  %v9766_v8 = vld [vmem:[%s11786_s29 + $0x910] ss:$8 sps:$4 sm:$0xff]   ;;  %v9769_v10 = vld [vmem:[%s11786_s29 + $0x924] ss:$8 sps:$4 sm:$0xff]   ;;  %v9772_v12 = vld [vmem:[%s11786_s29 + $0x920] ss:$8 sps:$4 sm:$0xff]  }
  0xff   : > { %6686 = vmatprep.subr.bf16.mxu0 %v9763_v6  ;;  %v9773_v13 = vld [vmem:[%s11786_s29 + $0x34] ss:$8 sps:$4 sm:$0xff]   ;;  %v9777_v15 = vld [vmem:[%s11786_s29 + $0x30] ss:$8 sps:$4 sm:$0xff]   ;;  %v9779_v17 = vld [vmem:[%s11786_s29 + $0x44] ss:$8 sps:$4 sm:$0xff]  }
 0x100   : > { %v9775_v14 = vld [vmem:[%s11786_s29 + $0x934] ss:$8 sps:$4 sm:$0xff]   ;;  %v9778_v16 = vld [vmem:[%s11786_s29 + $0x930] ss:$8 sps:$4 sm:$0xff]   ;;  %v9781_v18 = vld [vmem:[%s11786_s29 + $0x944] ss:$8 sps:$4 sm:$0xff]  }
 0x101   : > { %5670 = vmatpush1.bf16.msra.mxu1 %v9765_v7  ;;  %v9783_v19 = vld [vmem:[%s11786_s29 + $0x40] ss:$8 sps:$4 sm:$0xff]   ;;  %v9785_v21 = vld [vmem:[%s11786_s29 + $0x54] ss:$8 sps:$4 sm:$0xff]   ;;  %v9789_v23 = vld [vmem:[%s11786_s29 + $0x50] ss:$8 sps:$4 sm:$0xff]  }
 0x102   : > { %6687 = vmatpush1.bf16.msra.mxu0 %v9766_v8  ;;  %5671 = vmatprep.subr.bf16.mxu1 %v9767_v9  ;;  %v9784_v20 = vld [vmem:[%s11786_s29 + $0x940] ss:$8 sps:$4 sm:$0xff]   ;;  %v9787_v22 = vld [vmem:[%s11786_s29 + $0x954] ss:$8 sps:$4 sm:$0xff]   ;;  %v9790_v24 = vld [vmem:[%s11786_s29 + $0x950] ss:$8 sps:$4 sm:$0xff]  }
 0x103   : > { %6688 = vmatprep.subr.bf16.mxu0 %v9769_v10  ;;  %v9791_v25 = vld [vmem:[%s11786_s29 + $0x64] ss:$8 sps:$4 sm:$0xff]   ;;  %v9795_v27 = vld [vmem:[%s11786_s29 + $0x60] ss:$8 sps:$4 sm:$0xff]   ;;  %v9797_v29 = vld [vmem:[%s11786_s29 + $0x74] ss:$8 sps:$4 sm:$0xff]  }
 0x104   : > { %v9793_v26 = vld [vmem:[%s11786_s29 + $0x964] ss:$8 sps:$4 sm:$0xff]   ;;  %v9796_v28 = vld [vmem:[%s11786_s29 + $0x960] ss:$8 sps:$4 sm:$0xff]   ;;  %v9799_v30 = vld [vmem:[%s11786_s29 + $0x974] ss:$8 sps:$4 sm:$0xff]  }
 0x105   : > { %5672 = vmatpush1.bf16.msra.mxu1 %v9771_v11  ;;  %v9801_v31 = vld [vmem:[%s11786_s29 + $0x70] ss:$8 sps:$4 sm:$0xff]   ;;  %v9803_v33 = vld [vmem:[%s11786_s29 + $0x84] ss:$8 sps:$4 sm:$0xff]   ;;  %v9807_v35 = vld [vmem:[%s11786_s29 + $0x80] ss:$8 sps:$4 sm:$0xff]  }
 0x106   : > { %6689 = vmatpush1.bf16.msra.mxu0 %v9772_v12  ;;  %5673 = vmatprep.subr.bf16.mxu1 %v9773_v13  ;;  %v9802_v32 = vld [vmem:[%s11786_s29 + $0x970] ss:$8 sps:$4 sm:$0xff]   ;;  %v9805_v34 = vld [vmem:[%s11786_s29 + $0x984] ss:$8 sps:$4 sm:$0xff]   ;;  %v9808_v36 = vld [vmem:[%s11786_s29 + $0x980] ss:$8 sps:$4 sm:$0xff]  }
 0x107   : > { %6690 = vmatprep.subr.bf16.mxu0 %v9775_v14  ;;  %v9809_v37 = vld [vmem:[%s11786_s29 + $0x94] ss:$8 sps:$4 sm:$0xff]   ;;  %v9813_v39 = vld [vmem:[%s11786_s29 + $0x90] ss:$8 sps:$4 sm:$0xff]   ;;  %v9815_v41 = vld [vmem:[%s11786_s29 + $0xa4] ss:$8 sps:$4 sm:$0xff]  }
 0x108   : > { %v9811_v38 = vld [vmem:[%s11786_s29 + $0x994] ss:$8 sps:$4 sm:$0xff]   ;;  %v9814_v40 = vld [vmem:[%s11786_s29 + $0x990] ss:$8 sps:$4 sm:$0xff]   ;;  %v9817_v42 = vld [vmem:[%s11786_s29 + $0x9a4] ss:$8 sps:$4 sm:$0xff]  }
 0x109   : > { %5674 = vmatpush1.bf16.msra.mxu1 %v9777_v15  ;;  %v9819_v43 = vld [vmem:[%s11786_s29 + $0xa0] ss:$8 sps:$4 sm:$0xff]   ;;  %v9821_v45 = vld [vmem:[%s11786_s29 + $0xb4] ss:$8 sps:$4 sm:$0xff]   ;;  %v9825_v47 = vld [vmem:[%s11786_s29 + $0xb0] ss:$8 sps:$4 sm:$0xff]  }
 0x10a   : > { %6691 = vmatpush1.bf16.msra.mxu0 %v9778_v16  ;;  %5675 = vmatprep.subr.bf16.mxu1 %v9779_v17  ;;  %v9820_v44 = vld [vmem:[%s11786_s29 + $0x9a0] ss:$8 sps:$4 sm:$0xff]   ;;  %v9823_v46 = vld [vmem:[%s11786_s29 + $0x9b4] ss:$8 sps:$4 sm:$0xff]   ;;  %v9826_v48 = vld [vmem:[%s11786_s29 + $0x9b0] ss:$8 sps:$4 sm:$0xff]  }
 0x10b   : > { %6692 = vmatprep.subr.bf16.mxu0 %v9781_v18  ;;  %v9827_v49 = vld [vmem:[%s11786_s29 + $0xc4] ss:$8 sps:$4 sm:$0xff]   ;;  %v9831_v53 = vld [vmem:[%s11786_s29 + $0xc0] ss:$8 sps:$4 sm:$0xff]   ;;  %v9833_v55 = vld [vmem:[%s11786_s29 + $0xd4] ss:$8 sps:$4 sm:$0xff]  }
 0x10c   : > { %v9853_v50 = vld [vmem:[%s11778_s15 + $0x4] ss:$144 sps:$4 sm:$0xff]   ;;  %v9856_v52 = vld [vmem:[%s11778_s15 + $0x4c] ss:$144 sps:$4 sm:$0xff]   ;;  %v9832_v54 = vld [vmem:[%s11786_s29 + $0x9c0] ss:$8 sps:$4 sm:$0xff]  }
 0x10d   : > { %5676 = vmatpush1.bf16.msra.mxu1 %v9783_v19  ;;  %v9829_v51 = vld [vmem:[%s11786_s29 + $0x9c4] ss:$8 sps:$4 sm:$0xff]   ;;  %5699 = vmatprep.mubr.bf16.mxu1 %v9853_v50  ;;  %v9835_v56 = vld [vmem:[%s11786_s29 + $0x9d4] ss:$8 sps:$4 sm:$0xff]   ;;  %v9837_v57 = vld [vmem:[%s11786_s29 + $0xd0] ss:$8 sps:$4 sm:$0xff]  }
 0x10e   : > { %6693 = vmatpush1.bf16.msra.mxu0 %v9784_v20  ;;  %5677 = vmatprep.subr.bf16.mxu1 %v9785_v21  ;;  %v9838_v58 = vld [vmem:[%s11786_s29 + $0x9d0] ss:$8 sps:$4 sm:$0xff]   ;;  %v9839_v59 = vld [vmem:[%s11786_s29 + $0xe4] ss:$8 sps:$4 sm:$0xff]   ;;  %v9843_v61 = vld [vmem:[%s11786_s29 + $0xe0] ss:$8 sps:$4 sm:$0xff]  }
 0x10f   : > { %6694 = vmatprep.subr.bf16.mxu0 %v9787_v22  ;;  %6716 = vmatprep.mubr.bf16.mxu0 %v9856_v52  ;;  %v9841_v60 = vld [vmem:[%s11786_s29 + $0x9e4] ss:$8 sps:$4 sm:$0xff]   ;;  %v9844_v62 = vld [vmem:[%s11786_s29 + $0x9e0] ss:$8 sps:$4 sm:$0xff]   ;;  %v9845_v63 = vld [vmem:[%s11786_s29 + $0xf4] ss:$8 sps:$4 sm:$0xff]  }
 0x110   : > { %v9847_v0 = vld [vmem:[%s11786_s29 + $0x9f4] ss:$8 sps:$4 sm:$0xff]   ;;  %v9849_v1 = vld [vmem:[%s11786_s29 + $0xf0] ss:$8 sps:$4 sm:$0xff]   ;;  %v9859_v3 = vld [vmem:[%s11786_s29 + $0x104] ss:$8 sps:$4 sm:$0xff]  }
 0x111   : > { %5678 = vmatpush1.bf16.msra.mxu1 %v9789_v23  ;;  %v9850_v2 = vld [vmem:[%s11786_s29 + $0x9f0] ss:$8 sps:$4 sm:$0xff]   ;;  %v9862_v4 = vld [vmem:[%s11786_s29 + $0xa04] ss:$8 sps:$4 sm:$0xff]   ;;  %v9857_v7 = vld [vmem:[%s11786_s29 + $0x100] ss:$8 sps:$4 sm:$0xff]  }
 0x112   : > { %6695 = vmatpush1.bf16.msra.mxu0 %v9790_v24  ;;  %5679 = vmatprep.subr.bf16.mxu1 %v9791_v25  ;;  %v9851_v5 = vld [vmem:[%s11778_s15] ss:$144 sps:$4 sm:$0xff]   ;;  %v9854_v6 = vld [vmem:[%s11778_s15 + $0x48] ss:$144 sps:$4 sm:$0xff]   ;;  %v9865_v9 = vld [vmem:[%s11786_s29 + $0x114] ss:$8 sps:$4 sm:$0xff]  }
 0x113   : > { %6696 = vmatprep.subr.bf16.mxu0 %v9793_v26  ;;  %v9860_v8 = vld [vmem:[%s11786_s29 + $0xa00] ss:$8 sps:$4 sm:$0xff]   ;;  %v9868_v10 = vld [vmem:[%s11786_s29 + $0xa14] ss:$8 sps:$4 sm:$0xff]   ;;  %v9863_v13 = vld [vmem:[%s11786_s29 + $0x110] ss:$8 sps:$4 sm:$0xff]  }
 0x114   : > { %v9869_v11 = vld [vmem:[%s11778_s15 + $0x124] ss:$144 sps:$4 sm:$0xff]   ;;  %v9871_v12 = vld [vmem:[%s11778_s15 + $0x16c] ss:$144 sps:$4 sm:$0xff]   ;;  %v9866_v14 = vld [vmem:[%s11786_s29 + $0xa10] ss:$8 sps:$4 sm:$0xff]  }
 0x115   : > { %5680 = vmatpush1.bf16.msra.mxu1 %v9795_v27  ;;  %v9876_v15 = vld [vmem:[%s11786_s29 + $0x124] ss:$8 sps:$4 sm:$0xff]   ;;  %v9873_v17 = vld [vmem:[%s11778_s15 + $0x120] ss:$144 sps:$4 sm:$0xff]   ;;  %v9877_v19 = vld [vmem:[%s11778_s15 + $0x168] ss:$144 sps:$4 sm:$0xff]  }
 0x116   : > { %6697 = vmatpush1.bf16.msra.mxu0 %v9796_v28  ;;  %5681 = vmatprep.subr.bf16.mxu1 %v9797_v29  ;;  %v9880_v16 = vld [vmem:[%s11786_s29 + $0xa24] ss:$8 sps:$4 sm:$0xff]   ;;  %v9874_v18 = vld [vmem:[%s11786_s29 + $0x120] ss:$8 sps:$4 sm:$0xff]   ;;  %v9883_v21 = vld [vmem:[%s11786_s29 + $0x134] ss:$8 sps:$4 sm:$0xff]  }
 0x117   : > { %6698 = vmatprep.subr.bf16.mxu0 %v9799_v30  ;;  %v9878_v20 = vld [vmem:[%s11786_s29 + $0xa20] ss:$8 sps:$4 sm:$0xff]   ;;  %v9886_v22 = vld [vmem:[%s11786_s29 + $0xa34] ss:$8 sps:$4 sm:$0xff]   ;;  %v9881_v25 = vld [vmem:[%s11786_s29 + $0x130] ss:$8 sps:$4 sm:$0xff]  }
 0x118   : > { %v9887_v23 = vld [vmem:[%s11778_s15 + $0x244] ss:$144 sps:$4 sm:$0xff]   ;;  %v9889_v24 = vld [vmem:[%s11778_s15 + $0x28c] ss:$144 sps:$4 sm:$0xff]   ;;  %v9884_v26 = vld [vmem:[%s11786_s29 + $0xa30] ss:$8 sps:$4 sm:$0xff]  }
 0x119   : > { %5682 = vmatpush1.bf16.msra.mxu1 %v9801_v31  ;;  %v9894_v27 = vld [vmem:[%s11786_s29 + $0x144] ss:$8 sps:$4 sm:$0xff]   ;;  %v9891_v29 = vld [vmem:[%s11778_s15 + $0x240] ss:$144 sps:$4 sm:$0xff]   ;;  %v9895_v31 = vld [vmem:[%s11778_s15 + $0x288] ss:$144 sps:$4 sm:$0xff]  }
 0x11a   : > { %6699 = vmatpush1.bf16.msra.mxu0 %v9802_v32  ;;  %5683 = vmatprep.subr.bf16.mxu1 %v9803_v33  ;;  %v9898_v28 = vld [vmem:[%s11786_s29 + $0xa44] ss:$8 sps:$4 sm:$0xff]   ;;  %v9892_v30 = vld [vmem:[%s11786_s29 + $0x140] ss:$8 sps:$4 sm:$0xff]   ;;  %v9901_v33 = vld [vmem:[%s11786_s29 + $0x154] ss:$8 sps:$4 sm:$0xff]  }
 0x11b   : > { %6700 = vmatprep.subr.bf16.mxu0 %v9805_v34  ;;  %v9896_v32 = vld [vmem:[%s11786_s29 + $0xa40] ss:$8 sps:$4 sm:$0xff]   ;;  %v9904_v34 = vld [vmem:[%s11786_s29 + $0xa54] ss:$8 sps:$4 sm:$0xff]   ;;  %v9920_v50 = vld [vmem:[%s11786_s29 + $0xa70] ss:$8 sps:$4 sm:$0xff]  }
 0x11c   : > { %v9934_v52 = vld [vmem:[%s11786_s29 + $0xa84] ss:$8 sps:$4 sm:$0xff]   ;;  %s13127_s16 = sld [smem:[#allocation22_spill]] }
 0x11d   : > { %5684 = vmatpush1.bf16.msra.mxu1 %v9807_v35  ;;  %v9905_v35 = vld [vmem:[%s11778_s15 + $0x364] ss:$144 sps:$4 sm:$0xff]  }
 0x11e   : > { %6701 = vmatpush1.bf16.msra.mxu0 %v9808_v36  ;;  %5685 = vmatprep.subr.bf16.mxu1 %v9809_v37  ;;  %v9907_v36 = vld [vmem:[%s11778_s15 + $0x3ac] ss:$144 sps:$4 sm:$0xff]   ;;  %v9899_v37 = vld [vmem:[%s11786_s29 + $0x150] ss:$8 sps:$4 sm:$0xff]  }
 0x11f   : > { %6702 = vmatprep.subr.bf16.mxu0 %v9811_v38  ;;  %v9902_v38 = vld [vmem:[%s11786_s29 + $0xa50] ss:$8 sps:$4 sm:$0xff]  }
 0x121   : > { %5686 = vmatpush1.bf16.msra.mxu1 %v9813_v39  ;;  %v9912_v39 = vld [vmem:[%s11786_s29 + $0x164] ss:$8 sps:$4 sm:$0xff]  }
 0x122   : > { %6703 = vmatpush1.bf16.msra.mxu0 %v9814_v40  ;;  %5687 = vmatprep.subr.bf16.mxu1 %v9815_v41  ;;  %v9916_v40 = vld [vmem:[%s11786_s29 + $0xa64] ss:$8 sps:$4 sm:$0xff]   ;;  %v9909_v41 = vld [vmem:[%s11778_s15 + $0x360] ss:$144 sps:$4 sm:$0xff]   ;;  %p9039_p0 = scmp.ne.s32.totalorder %s13127_s16, 3 }
 0x123   : > { %6704 = vmatprep.subr.bf16.mxu0 %v9817_v42  ;;  %v9910_v42 = vld [vmem:[%s11786_s29 + $0x160] ss:$8 sps:$4 sm:$0xff]  }
 0x125   : > { %5688 = vmatpush1.bf16.msra.mxu1 %v9819_v43  ;;  %v9913_v43 = vld [vmem:[%s11778_s15 + $0x3a8] ss:$144 sps:$4 sm:$0xff]  }
 0x126   : > { %6705 = vmatpush1.bf16.msra.mxu0 %v9820_v44  ;;  %5689 = vmatprep.subr.bf16.mxu1 %v9821_v45  ;;  %v9914_v44 = vld [vmem:[%s11786_s29 + $0xa60] ss:$8 sps:$4 sm:$0xff]   ;;  %v9919_v45 = vld [vmem:[%s11786_s29 + $0x174] ss:$8 sps:$4 sm:$0xff]  }
 0x127   : > { %6706 = vmatprep.subr.bf16.mxu0 %v9823_v46  ;;  %v9922_v46 = vld [vmem:[%s11786_s29 + $0xa74] ss:$8 sps:$4 sm:$0xff]  }
 0x129   : > { %5690 = vmatpush1.bf16.msra.mxu1 %v9825_v47  ;;  %v9923_v47 = vld [vmem:[%s11778_s15 + $0x484] ss:$144 sps:$4 sm:$0xff]  }
 0x12a   : > { %6707 = vmatpush1.bf16.msra.mxu0 %v9826_v48  ;;  %5691 = vmatprep.subr.bf16.mxu1 %v9827_v49  ;;  %v9925_v48 = vld [vmem:[%s11778_s15 + $0x4cc] ss:$144 sps:$4 sm:$0xff]   ;;  %v9917_v49 = vld [vmem:[%s11786_s29 + $0x170] ss:$8 sps:$4 sm:$0xff]  }
 0x12b   : > { %6708 = vmatprep.subr.bf16.mxu0 %v9829_v51  ;;  %v9930_v51 = vld [vmem:[%s11786_s29 + $0x184] ss:$8 sps:$4 sm:$0xff]  }
 0x12d   : > { %5692 = vmatpush1.bf16.msra.mxu1 %v9831_v53  ;;  %v9927_v53 = vld [vmem:[%s11778_s15 + $0x480] ss:$144 sps:$4 sm:$0xff]  }
 0x12e   : > { %6709 = vmatpush1.bf16.msra.mxu0 %v9832_v54  ;;  %5693 = vmatprep.subr.bf16.mxu1 %v9833_v55  ;;  %v9928_v54 = vld [vmem:[%s11786_s29 + $0x180] ss:$8 sps:$4 sm:$0xff]  }
 0x12f   : > { %6710 = vmatprep.subr.bf16.mxu0 %v9835_v56  ;;  %v9931_v55 = vld [vmem:[%s11778_s15 + $0x4c8] ss:$144 sps:$4 sm:$0xff]  }
 0x130   : > { %v9932_v56 = vld [vmem:[%s11786_s29 + $0xa80] ss:$8 sps:$4 sm:$0xff]  }
 0x131   : > { %5694 = vmatpush1.bf16.msra.mxu1 %v9837_v57  ;;  %v9937_v57 = vld [vmem:[%s11786_s29 + $0x194] ss:$8 sps:$4 sm:$0xff]  }
 0x132   : > { %6711 = vmatpush1.bf16.msra.mxu0 %v9838_v58  ;;  %5695 = vmatprep.subr.bf16.mxu1 %v9839_v59  ;;  %v9940_v58 = vld [vmem:[%s11786_s29 + $0xa94] ss:$8 sps:$4 sm:$0xff]  }
 0x133   : > { %6712 = vmatprep.subr.bf16.mxu0 %v9841_v60  ;;  %v9941_v59 = vld [vmem:[%s11778_s15 + $0x5a4] ss:$144 sps:$4 sm:$0xff]   ;;  %v9943_v60 = vld [vmem:[%s11778_s15 + $0x5ec] ss:$144 sps:$4 sm:$0xff]  }
 0x135   : > { %5696 = vmatpush1.bf16.msra.mxu1 %v9843_v61  ;;  %v9935_v61 = vld [vmem:[%s11786_s29 + $0x190] ss:$8 sps:$4 sm:$0xff]  }
 0x136   : > { %6713 = vmatpush1.bf16.msra.mxu0 %v9844_v62  ;;  %5697 = vmatprep.subr.bf16.mxu1 %v9845_v63  ;;  %v9938_v62 = vld [vmem:[%s11786_s29 + $0xa90] ss:$8 sps:$4 sm:$0xff]   ;;  %v9948_v63 = vld [vmem:[%s11786_s29 + $0x1a4] ss:$8 sps:$4 sm:$0xff]  }
 0x137   : > { %6714 = vmatprep.subr.bf16.mxu0 %v9847_v0  ;;  %v9952_v0 = vld [vmem:[%s11786_s29 + $0xaa4] ss:$8 sps:$4 sm:$0xff]  }
 0x139   : > { %5698 = vmatpush1.bf16.msra.mxu1 %v9849_v1  ;;  %v9945_v1 = vld [vmem:[%s11778_s15 + $0x5a0] ss:$144 sps:$4 sm:$0xff]  }
 0x13a   : > { %6715 = vmatpush1.bf16.msra.mxu0 %v9850_v2  ;;  %5780 = vmatprep.subr.bf16.mxu1 %v9859_v3  ;;  %v9946_v2 = vld [vmem:[%s11786_s29 + $0x1a0] ss:$8 sps:$4 sm:$0xff]  }
 0x13b   : > { %6797 = vmatprep.subr.bf16.mxu0 %v9862_v4  ;;  %v9949_v3 = vld [vmem:[%s11778_s15 + $0x5e8] ss:$144 sps:$4 sm:$0xff]  }
 0x13c   : > { %5700 = vmatmul.mubr.bf16.vlgmr.msra.gmra.mrb[0].mxu1 %v9851_v5  ;;  %v9950_v4 = vld [vmem:[%s11786_s29 + $0xaa0] ss:$8 sps:$4 sm:$0xff]   ;;  %v9955_v5 = vld [vmem:[%s11786_s29 + $0x1b4] ss:$8 sps:$4 sm:$0xff]  }
 0x13d   : > { %6717 = vmatmul.mubr.bf16.vlgmr.msra.gmra.mrb[0].mxu0 %v9854_v6  ;;  %5781 = vmatpush1.bf16.msra.mxu1 %v9857_v7  ;;  %v9958_v6 = vld [vmem:[%s11786_s29 + $0xab4] ss:$8 sps:$4 sm:$0xff]  }
 0x13e   : > { %6798 = vmatpush1.bf16.msra.mxu0 %v9860_v8  ;;  %5782 = vmatprep.subr.bf16.mxu1 %v9865_v9  ;;  %v9959_v7 = vld [vmem:[%s11778_s15 + $0x6c4] ss:$144 sps:$4 sm:$0xff]   ;;  %v9961_v8 = vld [vmem:[%s11778_s15 + $0x70c] ss:$144 sps:$4 sm:$0xff]   ;;  %v9953_v9 = vld [vmem:[%s11786_s29 + $0x1b0] ss:$8 sps:$4 sm:$0xff]  }
 0x13f   : > { %6799 = vmatprep.subr.bf16.mxu0 %v9868_v10  ;;  %5709 = vmatprep.mubr.bf16.mxu1 %v9869_v11  ;;  %v9956_v10 = vld [vmem:[%s11786_s29 + $0xab0] ss:$8 sps:$4 sm:$0xff]   ;;  %v9966_v11 = vld [vmem:[%s11786_s29 + $0x1c4] ss:$8 sps:$4 sm:$0xff]  }
 0x140   : > { %6726 = vmatprep.mubr.bf16.mxu0 %v9871_v12  ;;  %v9970_v12 = vld [vmem:[%s11786_s29 + $0xac4] ss:$8 sps:$4 sm:$0xff]  }
 0x141   : > { %5783 = vmatpush1.bf16.msra.mxu1 %v9863_v13  ;;  %v9963_v13 = vld [vmem:[%s11778_s15 + $0x6c0] ss:$144 sps:$4 sm:$0xff]  }
 0x142   : > { %6800 = vmatpush1.bf16.msra.mxu0 %v9866_v14  ;;  %5784 = vmatprep.subr.bf16.mxu1 %v9876_v15  ;;  %v9964_v14 = vld [vmem:[%s11786_s29 + $0x1c0] ss:$8 sps:$4 sm:$0xff]  }
 0x143   : > { %6801 = vmatprep.subr.bf16.mxu0 %v9880_v16  ;;  %v9967_v15 = vld [vmem:[%s11778_s15 + $0x708] ss:$144 sps:$4 sm:$0xff]  }
 0x144   : > { %5710 = vmatmul.mubr.bf16.gmra.mrb[4].mxu1 %v9873_v17  ;;  %v9968_v16 = vld [vmem:[%s11786_s29 + $0xac0] ss:$8 sps:$4 sm:$0xff]   ;;  %v9973_v17 = vld [vmem:[%s11786_s29 + $0x1d4] ss:$8 sps:$4 sm:$0xff]  }
 0x145   : > { %6727 = vmatmul.mubr.bf16.gmra.mrb[4].mxu0 %v9877_v19  ;;  %5785 = vmatpush1.bf16.msra.mxu1 %v9874_v18  ;;  %v9976_v18 = vld [vmem:[%s11786_s29 + $0xad4] ss:$8 sps:$4 sm:$0xff]  }
 0x146   : > { %6802 = vmatpush1.bf16.msra.mxu0 %v9878_v20  ;;  %5786 = vmatprep.subr.bf16.mxu1 %v9883_v21  ;;  %v9977_v19 = vld [vmem:[%s11778_s15 + $0x7e4] ss:$144 sps:$4 sm:$0xff]   ;;  %v9979_v20 = vld [vmem:[%s11778_s15 + $0x82c] ss:$144 sps:$4 sm:$0xff]   ;;  %v9971_v21 = vld [vmem:[%s11786_s29 + $0x1d0] ss:$8 sps:$4 sm:$0xff]  }
 0x147   : > { %6803 = vmatprep.subr.bf16.mxu0 %v9886_v22  ;;  %5719 = vmatprep.mubr.bf16.mxu1 %v9887_v23  ;;  %v9974_v22 = vld [vmem:[%s11786_s29 + $0xad0] ss:$8 sps:$4 sm:$0xff]   ;;  %v9984_v23 = vld [vmem:[%s11786_s29 + $0x1e4] ss:$8 sps:$4 sm:$0xff]  }
 0x148   : > { %6736 = vmatprep.mubr.bf16.mxu0 %v9889_v24  ;;  %v9988_v24 = vld [vmem:[%s11786_s29 + $0xae4] ss:$8 sps:$4 sm:$0xff]  }
 0x149   : > { %5787 = vmatpush1.bf16.msra.mxu1 %v9881_v25  ;;  %v9981_v25 = vld [vmem:[%s11778_s15 + $0x7e0] ss:$144 sps:$4 sm:$0xff]  }
 0x14a   : > { %6804 = vmatpush1.bf16.msra.mxu0 %v9884_v26  ;;  %5788 = vmatprep.subr.bf16.mxu1 %v9894_v27  ;;  %v9982_v26 = vld [vmem:[%s11786_s29 + $0x1e0] ss:$8 sps:$4 sm:$0xff]  }
 0x14b   : > { %6805 = vmatprep.subr.bf16.mxu0 %v9898_v28  ;;  %v9985_v27 = vld [vmem:[%s11778_s15 + $0x828] ss:$144 sps:$4 sm:$0xff]  }
 0x14c   : > { %5720 = vmatmul.mubr.bf16.gmra.mrb[8].mxu1 %v9891_v29  ;;  %v9986_v28 = vld [vmem:[%s11786_s29 + $0xae0] ss:$8 sps:$4 sm:$0xff]   ;;  %v9991_v29 = vld [vmem:[%s11786_s29 + $0x1f4] ss:$8 sps:$4 sm:$0xff]  }
 0x14d   : > { %6737 = vmatmul.mubr.bf16.gmra.mrb[8].mxu0 %v9895_v31  ;;  %5789 = vmatpush1.bf16.msra.mxu1 %v9892_v30  ;;  %v9994_v30 = vld [vmem:[%s11786_s29 + $0xaf4] ss:$8 sps:$4 sm:$0xff]  }
 0x14e   : > { %6806 = vmatpush1.bf16.msra.mxu0 %v9896_v32  ;;  %5790 = vmatprep.subr.bf16.mxu1 %v9901_v33  ;;  %v9997_v31 = vld [vmem:[%s11778_s15 + $0xc] ss:$144 sps:$4 sm:$0xff]   ;;  %v10000_v32 = vld [vmem:[%s11778_s15 + $0x54] ss:$144 sps:$4 sm:$0xff]   ;;  %v9989_v33 = vld [vmem:[%s11786_s29 + $0x1f0] ss:$8 sps:$4 sm:$0xff]  }
 0x14f   : > { %6807 = vmatprep.subr.bf16.mxu0 %v9904_v34  ;;  %5729 = vmatprep.mubr.bf16.mxu1 %v9905_v35  ;;  %v9992_v34 = vld [vmem:[%s11786_s29 + $0xaf0] ss:$8 sps:$4 sm:$0xff]   ;;  %v10003_v35 = vld [vmem:[%s11786_s29 + $0x204] ss:$8 sps:$4 sm:$0xff]  }
 0x150   : > { %6746 = vmatprep.mubr.bf16.mxu0 %v9907_v36  ;;  %v10006_v36 = vld [vmem:[%s11786_s29 + $0xb04] ss:$8 sps:$4 sm:$0xff]  }
 0x151   : > { %5791 = vmatpush1.bf16.msra.mxu1 %v9899_v37  ;;  %v9995_v37 = vld [vmem:[%s11778_s15 + $0x8] ss:$144 sps:$4 sm:$0xff]  }
 0x152   : > { %6808 = vmatpush1.bf16.msra.mxu0 %v9902_v38  ;;  %5792 = vmatprep.subr.bf16.mxu1 %v9912_v39  ;;  %v9998_v38 = vld [vmem:[%s11778_s15 + $0x50] ss:$144 sps:$4 sm:$0xff]  }
 0x153   : > { %6809 = vmatprep.subr.bf16.mxu0 %v9916_v40  ;;  %v10001_v39 = vld [vmem:[%s11786_s29 + $0x200] ss:$8 sps:$4 sm:$0xff]  }
 0x154   : > { %5730 = vmatmul.mubr.bf16.gmra.mrb[12].mxu1 %v9909_v41  ;;  %v10004_v40 = vld [vmem:[%s11786_s29 + $0xb00] ss:$8 sps:$4 sm:$0xff]   ;;  %v10009_v41 = vld [vmem:[%s11786_s29 + $0x214] ss:$8 sps:$4 sm:$0xff]  }
 0x155   : > { %6747 = vmatmul.mubr.bf16.gmra.mrb[12].mxu0 %v9913_v43  ;;  %5793 = vmatpush1.bf16.msra.mxu1 %v9910_v42  ;;  %v10012_v42 = vld [vmem:[%s11786_s29 + $0xb14] ss:$8 sps:$4 sm:$0xff]  }
 0x156   : > { %6810 = vmatpush1.bf16.msra.mxu0 %v9914_v44  ;;  %5794 = vmatprep.subr.bf16.mxu1 %v9919_v45  ;;  %v10013_v43 = vld [vmem:[%s11778_s15 + $0x12c] ss:$144 sps:$4 sm:$0xff]   ;;  %v10015_v44 = vld [vmem:[%s11778_s15 + $0x174] ss:$144 sps:$4 sm:$0xff]   ;;  %v10007_v45 = vld [vmem:[%s11786_s29 + $0x210] ss:$8 sps:$4 sm:$0xff]  }
 0x157   : > { %6811 = vmatprep.subr.bf16.mxu0 %v9922_v46  ;;  %5739 = vmatprep.mubr.bf16.mxu1 %v9923_v47  ;;  %v10010_v46 = vld [vmem:[%s11786_s29 + $0xb10] ss:$8 sps:$4 sm:$0xff]   ;;  %v10020_v47 = vld [vmem:[%s11786_s29 + $0x224] ss:$8 sps:$4 sm:$0xff]  }
 0x158   : > { %6756 = vmatprep.mubr.bf16.mxu0 %v9925_v48  ;;  %v10024_v48 = vld [vmem:[%s11786_s29 + $0xb24] ss:$8 sps:$4 sm:$0xff]  }
 0x159   : > { %5795 = vmatpush1.bf16.msra.mxu1 %v9917_v49  ;;  %v10017_v49 = vld [vmem:[%s11778_s15 + $0x128] ss:$144 sps:$4 sm:$0xff]  }
 0x15a   : > { %6812 = vmatpush1.bf16.msra.mxu0 %v9920_v50  ;;  %5796 = vmatprep.subr.bf16.mxu1 %v9930_v51  ;;  %v10018_v50 = vld [vmem:[%s11786_s29 + $0x220] ss:$8 sps:$4 sm:$0xff]  }
 0x15b   : > { %6813 = vmatprep.subr.bf16.mxu0 %v9934_v52  ;;  %v10021_v51 = vld [vmem:[%s11778_s15 + $0x170] ss:$144 sps:$4 sm:$0xff]  }
 0x15c   : > { %5740 = vmatmul.mubr.bf16.gmra.mrb[16].mxu1 %v9927_v53  ;;  %v10022_v52 = vld [vmem:[%s11786_s29 + $0xb20] ss:$8 sps:$4 sm:$0xff]   ;;  %v10027_v53 = vld [vmem:[%s11786_s29 + $0x234] ss:$8 sps:$4 sm:$0xff]  }
 0x15d   : > { %6757 = vmatmul.mubr.bf16.gmra.mrb[16].mxu0 %v9931_v55  ;;  %5797 = vmatpush1.bf16.msra.mxu1 %v9928_v54  ;;  %v10030_v54 = vld [vmem:[%s11786_s29 + $0xb34] ss:$8 sps:$4 sm:$0xff]  }
 0x15e   : > { %6814 = vmatpush1.bf16.msra.mxu0 %v9932_v56  ;;  %5798 = vmatprep.subr.bf16.mxu1 %v9937_v57  ;;  %v10031_v55 = vld [vmem:[%s11778_s15 + $0x24c] ss:$144 sps:$4 sm:$0xff]   ;;  %v10033_v56 = vld [vmem:[%s11778_s15 + $0x294] ss:$144 sps:$4 sm:$0xff]   ;;  %v10025_v57 = vld [vmem:[%s11786_s29 + $0x230] ss:$8 sps:$4 sm:$0xff]  }
 0x15f   : > { %6815 = vmatprep.subr.bf16.mxu0 %v9940_v58  ;;  %5749 = vmatprep.mubr.bf16.mxu1 %v9941_v59  ;;  %v10028_v58 = vld [vmem:[%s11786_s29 + $0xb30] ss:$8 sps:$4 sm:$0xff]   ;;  %v10038_v59 = vld [vmem:[%s11786_s29 + $0x244] ss:$8 sps:$4 sm:$0xff]  }
 0x160   : > { %6766 = vmatprep.mubr.bf16.mxu0 %v9943_v60  ;;  %v10042_v60 = vld [vmem:[%s11786_s29 + $0xb44] ss:$8 sps:$4 sm:$0xff]  }
 0x161   : > { %5799 = vmatpush1.bf16.msra.mxu1 %v9935_v61  ;;  %v10035_v61 = vld [vmem:[%s11778_s15 + $0x248] ss:$144 sps:$4 sm:$0xff]  }
 0x162   : > { %6816 = vmatpush1.bf16.msra.mxu0 %v9938_v62  ;;  %5800 = vmatprep.subr.bf16.mxu1 %v9948_v63  ;;  %v10036_v62 = vld [vmem:[%s11786_s29 + $0x240] ss:$8 sps:$4 sm:$0xff]  }
 0x163   : > { %6817 = vmatprep.subr.bf16.mxu0 %v9952_v0  ;;  %v10039_v63 = vld [vmem:[%s11778_s15 + $0x290] ss:$144 sps:$4 sm:$0xff]  }
 0x164   : > { %5750 = vmatmul.mubr.bf16.gmra.mrb[20].mxu1 %v9945_v1  ;;  %v10040_v0 = vld [vmem:[%s11786_s29 + $0xb40] ss:$8 sps:$4 sm:$0xff]   ;;  %v10045_v1 = vld [vmem:[%s11786_s29 + $0x254] ss:$8 sps:$4 sm:$0xff]  }
 0x165   : > { %6767 = vmatmul.mubr.bf16.gmra.mrb[20].mxu0 %v9949_v3  ;;  %5801 = vmatpush1.bf16.msra.mxu1 %v9946_v2  ;;  %v10048_v2 = vld [vmem:[%s11786_s29 + $0xb54] ss:$8 sps:$4 sm:$0xff]  }
 0x166   : > { %6818 = vmatpush1.bf16.msra.mxu0 %v9950_v4  ;;  %5802 = vmatprep.subr.bf16.mxu1 %v9955_v5  ;;  %v10049_v3 = vld [vmem:[%s11778_s15 + $0x36c] ss:$144 sps:$4 sm:$0xff]   ;;  %v10051_v4 = vld [vmem:[%s11778_s15 + $0x3b4] ss:$144 sps:$4 sm:$0xff]   ;;  %v10043_v5 = vld [vmem:[%s11786_s29 + $0x250] ss:$8 sps:$4 sm:$0xff]  }
 0x167   : > { %6819 = vmatprep.subr.bf16.mxu0 %v9958_v6  ;;  %5759 = vmatprep.mubr.bf16.mxu1 %v9959_v7  ;;  %v10046_v6 = vld [vmem:[%s11786_s29 + $0xb50] ss:$8 sps:$4 sm:$0xff]   ;;  %v10056_v7 = vld [vmem:[%s11786_s29 + $0x264] ss:$8 sps:$4 sm:$0xff]  }
 0x168   : > { %6776 = vmatprep.mubr.bf16.mxu0 %v9961_v8  ;;  %v10060_v8 = vld [vmem:[%s11786_s29 + $0xb64] ss:$8 sps:$4 sm:$0xff]  }
 0x169   : > { %5803 = vmatpush1.bf16.msra.mxu1 %v9953_v9  ;;  %v10053_v9 = vld [vmem:[%s11778_s15 + $0x368] ss:$144 sps:$4 sm:$0xff]  }
 0x16a   : > { %6820 = vmatpush1.bf16.msra.mxu0 %v9956_v10  ;;  %5804 = vmatprep.subr.bf16.mxu1 %v9966_v11  ;;  %v10054_v10 = vld [vmem:[%s11786_s29 + $0x260] ss:$8 sps:$4 sm:$0xff]  }
 0x16b   : > { %6821 = vmatprep.subr.bf16.mxu0 %v9970_v12  ;;  %v10057_v11 = vld [vmem:[%s11778_s15 + $0x3b0] ss:$144 sps:$4 sm:$0xff]  }
 0x16c   : > { %5760 = vmatmul.mubr.bf16.gmra.mrb[24].mxu1 %v9963_v13  ;;  %v10058_v12 = vld [vmem:[%s11786_s29 + $0xb60] ss:$8 sps:$4 sm:$0xff]   ;;  %v10063_v13 = vld [vmem:[%s11786_s29 + $0x274] ss:$8 sps:$4 sm:$0xff]  }
 0x16d   : > { %6777 = vmatmul.mubr.bf16.gmra.mrb[24].mxu0 %v9967_v15  ;;  %5805 = vmatpush1.bf16.msra.mxu1 %v9964_v14  ;;  %v10066_v14 = vld [vmem:[%s11786_s29 + $0xb74] ss:$8 sps:$4 sm:$0xff]  }
 0x16e   : > { %6822 = vmatpush1.bf16.msra.mxu0 %v9968_v16  ;;  %5806 = vmatprep.subr.bf16.mxu1 %v9973_v17  ;;  %v10067_v15 = vld [vmem:[%s11778_s15 + $0x48c] ss:$144 sps:$4 sm:$0xff]   ;;  %v10069_v16 = vld [vmem:[%s11778_s15 + $0x4d4] ss:$144 sps:$4 sm:$0xff]   ;;  %v10061_v17 = vld [vmem:[%s11786_s29 + $0x270] ss:$8 sps:$4 sm:$0xff]  }
 0x16f   : > { %6823 = vmatprep.subr.bf16.mxu0 %v9976_v18  ;;  %5769 = vmatprep.mubr.bf16.mxu1 %v9977_v19  ;;  %v10064_v18 = vld [vmem:[%s11786_s29 + $0xb70] ss:$8 sps:$4 sm:$0xff]   ;;  %v10074_v19 = vld [vmem:[%s11786_s29 + $0x284] ss:$8 sps:$4 sm:$0xff]  }
 0x170   : > { %6786 = vmatprep.mubr.bf16.mxu0 %v9979_v20  ;;  %v10078_v20 = vld [vmem:[%s11786_s29 + $0xb84] ss:$8 sps:$4 sm:$0xff]  }
 0x171   : > { %5807 = vmatpush1.bf16.msra.mxu1 %v9971_v21  ;;  %v10071_v21 = vld [vmem:[%s11778_s15 + $0x488] ss:$144 sps:$4 sm:$0xff]  }
 0x172   : > { %6824 = vmatpush1.bf16.msra.mxu0 %v9974_v22  ;;  %5808 = vmatprep.subr.bf16.mxu1 %v9984_v23  ;;  %v10072_v22 = vld [vmem:[%s11786_s29 + $0x280] ss:$8 sps:$4 sm:$0xff]  }
 0x173   : > { %6825 = vmatprep.subr.bf16.mxu0 %v9988_v24  ;;  %v10075_v23 = vld [vmem:[%s11778_s15 + $0x4d0] ss:$144 sps:$4 sm:$0xff]  }
 0x174   : > { %5770 = vmatmul.mubr.bf16.gmra.mrb[28].mxu1 %v9981_v25  ;;  %v10076_v24 = vld [vmem:[%s11786_s29 + $0xb80] ss:$8 sps:$4 sm:$0xff]   ;;  %v10081_v25 = vld [vmem:[%s11786_s29 + $0x294] ss:$8 sps:$4 sm:$0xff]  }
 0x175   : > { %6787 = vmatmul.mubr.bf16.gmra.mrb[28].mxu0 %v9985_v27  ;;  %5809 = vmatpush1.bf16.msra.mxu1 %v9982_v26  ;;  %v10084_v26 = vld [vmem:[%s11786_s29 + $0xb94] ss:$8 sps:$4 sm:$0xff]  }
 0x176   : > { %6826 = vmatpush1.bf16.msra.mxu0 %v9986_v28  ;;  %5810 = vmatprep.subr.bf16.mxu1 %v9991_v29  ;;  %v10085_v27 = vld [vmem:[%s11778_s15 + $0x5ac] ss:$144 sps:$4 sm:$0xff]   ;;  %v10087_v28 = vld [vmem:[%s11778_s15 + $0x5f4] ss:$144 sps:$4 sm:$0xff]   ;;  %v10079_v29 = vld [vmem:[%s11786_s29 + $0x290] ss:$8 sps:$4 sm:$0xff]  }
 0x177   : > { %6827 = vmatprep.subr.bf16.mxu0 %v9994_v30  ;;  %5812 = vmatprep.mubr.bf16.mxu1 %v9997_v31  ;;  %v10082_v30 = vld [vmem:[%s11786_s29 + $0xb90] ss:$8 sps:$4 sm:$0xff]   ;;  %v10092_v31 = vld [vmem:[%s11786_s29 + $0x2a4] ss:$8 sps:$4 sm:$0xff]  }
 0x178   : > { %6829 = vmatprep.mubr.bf16.mxu0 %v10000_v32  ;;  %v10096_v32 = vld [vmem:[%s11786_s29 + $0xba4] ss:$8 sps:$4 sm:$0xff]  }
 0x179   : > { %5811 = vmatpush1.bf16.msra.mxu1 %v9989_v33  ;;  %v10089_v33 = vld [vmem:[%s11778_s15 + $0x5a8] ss:$144 sps:$4 sm:$0xff]  }
 0x17a   : > { %6828 = vmatpush1.bf16.msra.mxu0 %v9992_v34  ;;  %5893 = vmatprep.subr.bf16.mxu1 %v10003_v35  ;;  %v10090_v34 = vld [vmem:[%s11786_s29 + $0x2a0] ss:$8 sps:$4 sm:$0xff]  }
 0x17b   : > { %6910 = vmatprep.subr.bf16.mxu0 %v10006_v36  ;;  %v10093_v35 = vld [vmem:[%s11778_s15 + $0x5f0] ss:$144 sps:$4 sm:$0xff]  }
 0x17c   : > { %5813 = vmatmul.mubr.bf16.vlgmr.msra.gmra.mrb[0].mxu1 %v9995_v37  ;;  %v10094_v36 = vld [vmem:[%s11786_s29 + $0xba0] ss:$8 sps:$4 sm:$0xff]   ;;  %v10099_v37 = vld [vmem:[%s11786_s29 + $0x2b4] ss:$8 sps:$4 sm:$0xff]  }
 0x17d   : > { %6830 = vmatmul.mubr.bf16.vlgmr.msra.gmra.mrb[0].mxu0 %v9998_v38  ;;  %5894 = vmatpush1.bf16.msra.mxu1 %v10001_v39  ;;  %v10102_v38 = vld [vmem:[%s11786_s29 + $0xbb4] ss:$8 sps:$4 sm:$0xff]  }
 0x17e   : > { %6911 = vmatpush1.bf16.msra.mxu0 %v10004_v40  ;;  %5895 = vmatprep.subr.bf16.mxu1 %v10009_v41  ;;  %v10103_v39 = vld [vmem:[%s11778_s15 + $0x6cc] ss:$144 sps:$4 sm:$0xff]   ;;  %v10105_v40 = vld [vmem:[%s11778_s15 + $0x714] ss:$144 sps:$4 sm:$0xff]   ;;  %v10097_v41 = vld [vmem:[%s11786_s29 + $0x2b0] ss:$8 sps:$4 sm:$0xff]  }
 0x17f   : > { %6912 = vmatprep.subr.bf16.mxu0 %v10012_v42  ;;  %5822 = vmatprep.mubr.bf16.mxu1 %v10013_v43  ;;  %v10100_v42 = vld [vmem:[%s11786_s29 + $0xbb0] ss:$8 sps:$4 sm:$0xff]   ;;  %v10110_v43 = vld [vmem:[%s11786_s29 + $0x2c4] ss:$8 sps:$4 sm:$0xff]  }
 0x180   : > { %6839 = vmatprep.mubr.bf16.mxu0 %v10015_v44  ;;  %v10114_v44 = vld [vmem:[%s11786_s29 + $0xbc4] ss:$8 sps:$4 sm:$0xff]  }
 0x181   : > { %5896 = vmatpush1.bf16.msra.mxu1 %v10007_v45  ;;  %v10107_v45 = vld [vmem:[%s11778_s15 + $0x6c8] ss:$144 sps:$4 sm:$0xff]  }
 0x182   : > { %6913 = vmatpush1.bf16.msra.mxu0 %v10010_v46  ;;  %5897 = vmatprep.subr.bf16.mxu1 %v10020_v47  ;;  %v10108_v46 = vld [vmem:[%s11786_s29 + $0x2c0] ss:$8 sps:$4 sm:$0xff]  }
 0x183   : > { %6914 = vmatprep.subr.bf16.mxu0 %v10024_v48  ;;  %v10111_v47 = vld [vmem:[%s11778_s15 + $0x710] ss:$144 sps:$4 sm:$0xff]  }
 0x184   : > { %5823 = vmatmul.mubr.bf16.gmra.mrb[4].mxu1 %v10017_v49  ;;  %v10112_v48 = vld [vmem:[%s11786_s29 + $0xbc0] ss:$8 sps:$4 sm:$0xff]   ;;  %v10117_v49 = vld [vmem:[%s11786_s29 + $0x2d4] ss:$8 sps:$4 sm:$0xff]  }
 0x185   : > { %6840 = vmatmul.mubr.bf16.gmra.mrb[4].mxu0 %v10021_v51  ;;  %5898 = vmatpush1.bf16.msra.mxu1 %v10018_v50  ;;  %v10120_v50 = vld [vmem:[%s11786_s29 + $0xbd4] ss:$8 sps:$4 sm:$0xff]  }
 0x186   : > { %6915 = vmatpush1.bf16.msra.mxu0 %v10022_v52  ;;  %5899 = vmatprep.subr.bf16.mxu1 %v10027_v53  ;;  %v10121_v51 = vld [vmem:[%s11778_s15 + $0x7ec] ss:$144 sps:$4 sm:$0xff]   ;;  %v10123_v52 = vld [vmem:[%s11778_s15 + $0x834] ss:$144 sps:$4 sm:$0xff]   ;;  %v10115_v53 = vld [vmem:[%s11786_s29 + $0x2d0] ss:$8 sps:$4 sm:$0xff]  }
 0x187   : > { %6916 = vmatprep.subr.bf16.mxu0 %v10030_v54  ;;  %5832 = vmatprep.mubr.bf16.mxu1 %v10031_v55  ;;  %v10118_v54 = vld [vmem:[%s11786_s29 + $0xbd0] ss:$8 sps:$4 sm:$0xff]   ;;  %v10128_v55 = vld [vmem:[%s11786_s29 + $0x2e4] ss:$8 sps:$4 sm:$0xff]  }
 0x188   : > { %6849 = vmatprep.mubr.bf16.mxu0 %v10033_v56  ;;  %v10132_v56 = vld [vmem:[%s11786_s29 + $0xbe4] ss:$8 sps:$4 sm:$0xff]  }
 0x189   : > { %5900 = vmatpush1.bf16.msra.mxu1 %v10025_v57  ;;  %v10125_v57 = vld [vmem:[%s11778_s15 + $0x7e8] ss:$144 sps:$4 sm:$0xff]  }
 0x18a   : > { %6917 = vmatpush1.bf16.msra.mxu0 %v10028_v58  ;;  %5901 = vmatprep.subr.bf16.mxu1 %v10038_v59  ;;  %v10126_v58 = vld [vmem:[%s11786_s29 + $0x2e0] ss:$8 sps:$4 sm:$0xff]  }
 0x18b   : > { %6918 = vmatprep.subr.bf16.mxu0 %v10042_v60  ;;  %v10129_v59 = vld [vmem:[%s11778_s15 + $0x830] ss:$144 sps:$4 sm:$0xff]  }
 0x18c   : > { %5833 = vmatmul.mubr.bf16.gmra.mrb[8].mxu1 %v10035_v61  ;;  %v10130_v60 = vld [vmem:[%s11786_s29 + $0xbe0] ss:$8 sps:$4 sm:$0xff]   ;;  %v10135_v61 = vld [vmem:[%s11786_s29 + $0x2f4] ss:$8 sps:$4 sm:$0xff]  }
 0x18d   : > { %6850 = vmatmul.mubr.bf16.gmra.mrb[8].mxu0 %v10039_v63  ;;  %5902 = vmatpush1.bf16.msra.mxu1 %v10036_v62  ;;  %v10138_v62 = vld [vmem:[%s11786_s29 + $0xbf4] ss:$8 sps:$4 sm:$0xff]  }
 0x18e   : > { %6919 = vmatpush1.bf16.msra.mxu0 %v10040_v0  ;;  %5903 = vmatprep.subr.bf16.mxu1 %v10045_v1  ;;  %v10141_v63 = vld [vmem:[%s11778_s15 + $0x14] ss:$144 sps:$4 sm:$0xff]   ;;  %v10144_v0 = vld [vmem:[%s11778_s15 + $0x5c] ss:$144 sps:$4 sm:$0xff]   ;;  %v10133_v1 = vld [vmem:[%s11786_s29 + $0x2f0] ss:$8 sps:$4 sm:$0xff]  }
 0x18f   : > { %6920 = vmatprep.subr.bf16.mxu0 %v10048_v2  ;;  %5842 = vmatprep.mubr.bf16.mxu1 %v10049_v3  ;;  %v10136_v2 = vld [vmem:[%s11786_s29 + $0xbf0] ss:$8 sps:$4 sm:$0xff]   ;;  %v10147_v3 = vld [vmem:[%s11786_s29 + $0x304] ss:$8 sps:$4 sm:$0xff]  }
 0x190   : > { %6859 = vmatprep.mubr.bf16.mxu0 %v10051_v4  ;;  %v10150_v4 = vld [vmem:[%s11786_s29 + $0xc04] ss:$8 sps:$4 sm:$0xff]  }
 0x191   : > { %5904 = vmatpush1.bf16.msra.mxu1 %v10043_v5  ;;  %v10139_v5 = vld [vmem:[%s11778_s15 + $0x10] ss:$144 sps:$4 sm:$0xff]  }
 0x192   : > { %6921 = vmatpush1.bf16.msra.mxu0 %v10046_v6  ;;  %5905 = vmatprep.subr.bf16.mxu1 %v10056_v7  ;;  %v10142_v6 = vld [vmem:[%s11778_s15 + $0x58] ss:$144 sps:$4 sm:$0xff]  }
 0x193   : > { %6922 = vmatprep.subr.bf16.mxu0 %v10060_v8  ;;  %v10145_v7 = vld [vmem:[%s11786_s29 + $0x300] ss:$8 sps:$4 sm:$0xff]  }
 0x194   : > { %5843 = vmatmul.mubr.bf16.gmra.mrb[12].mxu1 %v10053_v9  ;;  %v10148_v8 = vld [vmem:[%s11786_s29 + $0xc00] ss:$8 sps:$4 sm:$0xff]   ;;  %v10153_v9 = vld [vmem:[%s11786_s29 + $0x314] ss:$8 sps:$4 sm:$0xff]  }
 0x195   : > { %6860 = vmatmul.mubr.bf16.gmra.mrb[12].mxu0 %v10057_v11  ;;  %5906 = vmatpush1.bf16.msra.mxu1 %v10054_v10  ;;  %v10156_v10 = vld [vmem:[%s11786_s29 + $0xc14] ss:$8 sps:$4 sm:$0xff]  }
 0x196   : > { %6923 = vmatpush1.bf16.msra.mxu0 %v10058_v12  ;;  %5907 = vmatprep.subr.bf16.mxu1 %v10063_v13  ;;  %v10157_v11 = vld [vmem:[%s11778_s15 + $0x134] ss:$144 sps:$4 sm:$0xff]   ;;  %v10159_v12 = vld [vmem:[%s11778_s15 + $0x17c] ss:$144 sps:$4 sm:$0xff]   ;;  %v10151_v13 = vld [vmem:[%s11786_s29 + $0x310] ss:$8 sps:$4 sm:$0xff]  }
 0x197   : > { %6924 = vmatprep.subr.bf16.mxu0 %v10066_v14  ;;  %5852 = vmatprep.mubr.bf16.mxu1 %v10067_v15  ;;  %v10154_v14 = vld [vmem:[%s11786_s29 + $0xc10] ss:$8 sps:$4 sm:$0xff]   ;;  %v10164_v15 = vld [vmem:[%s11786_s29 + $0x324] ss:$8 sps:$4 sm:$0xff]  }
 0x198   : > { %6869 = vmatprep.mubr.bf16.mxu0 %v10069_v16  ;;  %v10168_v16 = vld [vmem:[%s11786_s29 + $0xc24] ss:$8 sps:$4 sm:$0xff]  }
 0x199   : > { %5908 = vmatpush1.bf16.msra.mxu1 %v10061_v17  ;;  %v10161_v17 = vld [vmem:[%s11778_s15 + $0x130] ss:$144 sps:$4 sm:$0xff]  }
 0x19a   : > { %6925 = vmatpush1.bf16.msra.mxu0 %v10064_v18  ;;  %5909 = vmatprep.subr.bf16.mxu1 %v10074_v19  ;;  %v10162_v18 = vld [vmem:[%s11786_s29 + $0x320] ss:$8 sps:$4 sm:$0xff]  }
 0x19b   : > { %6926 = vmatprep.subr.bf16.mxu0 %v10078_v20  ;;  %v10165_v19 = vld [vmem:[%s11778_s15 + $0x178] ss:$144 sps:$4 sm:$0xff]  }
 0x19c   : > { %5853 = vmatmul.mubr.bf16.gmra.mrb[16].mxu1 %v10071_v21  ;;  %v10166_v20 = vld [vmem:[%s11786_s29 + $0xc20] ss:$8 sps:$4 sm:$0xff]   ;;  %v10171_v21 = vld [vmem:[%s11786_s29 + $0x334] ss:$8 sps:$4 sm:$0xff]  }
 0x19d   : > { %6870 = vmatmul.mubr.bf16.gmra.mrb[16].mxu0 %v10075_v23  ;;  %5910 = vmatpush1.bf16.msra.mxu1 %v10072_v22  ;;  %v10174_v22 = vld [vmem:[%s11786_s29 + $0xc34] ss:$8 sps:$4 sm:$0xff]  }
 0x19e   : > { %6927 = vmatpush1.bf16.msra.mxu0 %v10076_v24  ;;  %5911 = vmatprep.subr.bf16.mxu1 %v10081_v25  ;;  %v10175_v23 = vld [vmem:[%s11778_s15 + $0x254] ss:$144 sps:$4 sm:$0xff]   ;;  %v10177_v24 = vld [vmem:[%s11778_s15 + $0x29c] ss:$144 sps:$4 sm:$0xff]   ;;  %v10169_v25 = vld [vmem:[%s11786_s29 + $0x330] ss:$8 sps:$4 sm:$0xff]  }
 0x19f   : > { %6928 = vmatprep.subr.bf16.mxu0 %v10084_v26  ;;  %5862 = vmatprep.mubr.bf16.mxu1 %v10085_v27  ;;  %v10172_v26 = vld [vmem:[%s11786_s29 + $0xc30] ss:$8 sps:$4 sm:$0xff]   ;;  %v10182_v27 = vld [vmem:[%s11786_s29 + $0x344] ss:$8 sps:$4 sm:$0xff]  }
 0x1a0   : > { %6879 = vmatprep.mubr.bf16.mxu0 %v10087_v28  ;;  %v10186_v28 = vld [vmem:[%s11786_s29 + $0xc44] ss:$8 sps:$4 sm:$0xff]  }
 0x1a1   : > { %5912 = vmatpush1.bf16.msra.mxu1 %v10079_v29  ;;  %v10179_v29 = vld [vmem:[%s11778_s15 + $0x250] ss:$144 sps:$4 sm:$0xff]  }
 0x1a2   : > { %6929 = vmatpush1.bf16.msra.mxu0 %v10082_v30  ;;  %5913 = vmatprep.subr.bf16.mxu1 %v10092_v31  ;;  %v10180_v30 = vld [vmem:[%s11786_s29 + $0x340] ss:$8 sps:$4 sm:$0xff]  }
 0x1a3   : > { %6930 = vmatprep.subr.bf16.mxu0 %v10096_v32  ;;  %v10183_v31 = vld [vmem:[%s11778_s15 + $0x298] ss:$144 sps:$4 sm:$0xff]  }
 0x1a4   : > { %5863 = vmatmul.mubr.bf16.gmra.mrb[20].mxu1 %v10089_v33  ;;  %v10184_v32 = vld [vmem:[%s11786_s29 + $0xc40] ss:$8 sps:$4 sm:$0xff]   ;;  %v10189_v33 = vld [vmem:[%s11786_s29 + $0x354] ss:$8 sps:$4 sm:$0xff]  }
 0x1a5   : > { %6880 = vmatmul.mubr.bf16.gmra.mrb[20].mxu0 %v10093_v35  ;;  %5914 = vmatpush1.bf16.msra.mxu1 %v10090_v34  ;;  %v10192_v34 = vld [vmem:[%s11786_s29 + $0xc54] ss:$8 sps:$4 sm:$0xff]  }
 0x1a6   : > { %6931 = vmatpush1.bf16.msra.mxu0 %v10094_v36  ;;  %5915 = vmatprep.subr.bf16.mxu1 %v10099_v37  ;;  %v10193_v35 = vld [vmem:[%s11778_s15 + $0x374] ss:$144 sps:$4 sm:$0xff]   ;;  %v10195_v36 = vld [vmem:[%s11778_s15 + $0x3bc] ss:$144 sps:$4 sm:$0xff]   ;;  %v10187_v37 = vld [vmem:[%s11786_s29 + $0x350] ss:$8 sps:$4 sm:$0xff]  }
 0x1a7   : > { %6932 = vmatprep.subr.bf16.mxu0 %v10102_v38  ;;  %5872 = vmatprep.mubr.bf16.mxu1 %v10103_v39  ;;  %v10190_v38 = vld [vmem:[%s11786_s29 + $0xc50] ss:$8 sps:$4 sm:$0xff]   ;;  %v10200_v39 = vld [vmem:[%s11786_s29 + $0x364] ss:$8 sps:$4 sm:$0xff]  }
 0x1a8   : > { %6889 = vmatprep.mubr.bf16.mxu0 %v10105_v40  ;;  %v10204_v40 = vld [vmem:[%s11786_s29 + $0xc64] ss:$8 sps:$4 sm:$0xff]  }
 0x1a9   : > { %5916 = vmatpush1.bf16.msra.mxu1 %v10097_v41  ;;  %v10197_v41 = vld [vmem:[%s11778_s15 + $0x370] ss:$144 sps:$4 sm:$0xff]  }
 0x1aa   : > { %6933 = vmatpush1.bf16.msra.mxu0 %v10100_v42  ;;  %5917 = vmatprep.subr.bf16.mxu1 %v10110_v43  ;;  %v10198_v42 = vld [vmem:[%s11786_s29 + $0x360] ss:$8 sps:$4 sm:$0xff]  }
 0x1ab   : > { %6934 = vmatprep.subr.bf16.mxu0 %v10114_v44  ;;  %v10201_v43 = vld [vmem:[%s11778_s15 + $0x3b8] ss:$144 sps:$4 sm:$0xff]  }
 0x1ac   : > { %5873 = vmatmul.mubr.bf16.gmra.mrb[24].mxu1 %v10107_v45  ;;  %v10202_v44 = vld [vmem:[%s11786_s29 + $0xc60] ss:$8 sps:$4 sm:$0xff]   ;;  %v10207_v45 = vld [vmem:[%s11786_s29 + $0x374] ss:$8 sps:$4 sm:$0xff]  }
 0x1ad   : > { %6890 = vmatmul.mubr.bf16.gmra.mrb[24].mxu0 %v10111_v47  ;;  %5918 = vmatpush1.bf16.msra.mxu1 %v10108_v46  ;;  %v10210_v46 = vld [vmem:[%s11786_s29 + $0xc74] ss:$8 sps:$4 sm:$0xff]  }
 0x1ae   : > { %6935 = vmatpush1.bf16.msra.mxu0 %v10112_v48  ;;  %5919 = vmatprep.subr.bf16.mxu1 %v10117_v49  ;;  %v10211_v47 = vld [vmem:[%s11778_s15 + $0x494] ss:$144 sps:$4 sm:$0xff]   ;;  %v10213_v48 = vld [vmem:[%s11778_s15 + $0x4dc] ss:$144 sps:$4 sm:$0xff]   ;;  %v10205_v49 = vld [vmem:[%s11786_s29 + $0x370] ss:$8 sps:$4 sm:$0xff]  }
 0x1af   : > { %6936 = vmatprep.subr.bf16.mxu0 %v10120_v50  ;;  %5882 = vmatprep.mubr.bf16.mxu1 %v10121_v51  ;;  %v10208_v50 = vld [vmem:[%s11786_s29 + $0xc70] ss:$8 sps:$4 sm:$0xff]   ;;  %v10218_v51 = vld [vmem:[%s11786_s29 + $0x384] ss:$8 sps:$4 sm:$0xff]  }
 0x1b0   : > { %6899 = vmatprep.mubr.bf16.mxu0 %v10123_v52  ;;  %v10222_v52 = vld [vmem:[%s11786_s29 + $0xc84] ss:$8 sps:$4 sm:$0xff]  }
 0x1b1   : > { %5920 = vmatpush1.bf16.msra.mxu1 %v10115_v53  ;;  %v10215_v53 = vld [vmem:[%s11778_s15 + $0x490] ss:$144 sps:$4 sm:$0xff]  }
 0x1b2   : > { %6937 = vmatpush1.bf16.msra.mxu0 %v10118_v54  ;;  %5921 = vmatprep.subr.bf16.mxu1 %v10128_v55  ;;  %v10216_v54 = vld [vmem:[%s11786_s29 + $0x380] ss:$8 sps:$4 sm:$0xff]  }
 0x1b3   : > { %6938 = vmatprep.subr.bf16.mxu0 %v10132_v56  ;;  %v10219_v55 = vld [vmem:[%s11778_s15 + $0x4d8] ss:$144 sps:$4 sm:$0xff]  }
 0x1b4   : > { %5883 = vmatmul.mubr.bf16.gmra.mrb[28].mxu1 %v10125_v57  ;;  %v10220_v56 = vld [vmem:[%s11786_s29 + $0xc80] ss:$8 sps:$4 sm:$0xff]   ;;  %v10225_v57 = vld [vmem:[%s11786_s29 + $0x394] ss:$8 sps:$4 sm:$0xff]  }
 0x1b5   : > { %6900 = vmatmul.mubr.bf16.gmra.mrb[28].mxu0 %v10129_v59  ;;  %5922 = vmatpush1.bf16.msra.mxu1 %v10126_v58  ;;  %v10228_v58 = vld [vmem:[%s11786_s29 + $0xc94] ss:$8 sps:$4 sm:$0xff]  }
 0x1b6   : > { %6939 = vmatpush1.bf16.msra.mxu0 %v10130_v60  ;;  %5923 = vmatprep.subr.bf16.mxu1 %v10135_v61  ;;  %v10229_v59 = vld [vmem:[%s11778_s15 + $0x5b4] ss:$144 sps:$4 sm:$0xff]   ;;  %v10231_v60 = vld [vmem:[%s11778_s15 + $0x5fc] ss:$144 sps:$4 sm:$0xff]   ;;  %v10223_v61 = vld [vmem:[%s11786_s29 + $0x390] ss:$8 sps:$4 sm:$0xff]  }
 0x1b7   : > { %6940 = vmatprep.subr.bf16.mxu0 %v10138_v62  ;;  %5925 = vmatprep.mubr.bf16.mxu1 %v10141_v63  ;;  %v10226_v62 = vld [vmem:[%s11786_s29 + $0xc90] ss:$8 sps:$4 sm:$0xff]   ;;  %v10236_v63 = vld [vmem:[%s11786_s29 + $0x3a4] ss:$8 sps:$4 sm:$0xff]  }
 0x1b8   : > { %6942 = vmatprep.mubr.bf16.mxu0 %v10144_v0  ;;  %v10240_v0 = vld [vmem:[%s11786_s29 + $0xca4] ss:$8 sps:$4 sm:$0xff]  }
 0x1b9   : > { %5924 = vmatpush1.bf16.msra.mxu1 %v10133_v1  ;;  %v10233_v1 = vld [vmem:[%s11778_s15 + $0x5b0] ss:$144 sps:$4 sm:$0xff]  }
 0x1ba   : > { %6941 = vmatpush1.bf16.msra.mxu0 %v10136_v2  ;;  %6006 = vmatprep.subr.bf16.mxu1 %v10147_v3  ;;  %v10234_v2 = vld [vmem:[%s11786_s29 + $0x3a0] ss:$8 sps:$4 sm:$0xff]  }
 0x1bb   : > { %7023 = vmatprep.subr.bf16.mxu0 %v10150_v4  ;;  %v10237_v3 = vld [vmem:[%s11778_s15 + $0x5f8] ss:$144 sps:$4 sm:$0xff]  }
 0x1bc   : > { %5926 = vmatmul.mubr.bf16.vlgmr.msra.gmra.mrb[0].mxu1 %v10139_v5  ;;  %v10238_v4 = vld [vmem:[%s11786_s29 + $0xca0] ss:$8 sps:$4 sm:$0xff]   ;;  %v10243_v5 = vld [vmem:[%s11786_s29 + $0x3b4] ss:$8 sps:$4 sm:$0xff]  }
 0x1bd   : > { %6943 = vmatmul.mubr.bf16.vlgmr.msra.gmra.mrb[0].mxu0 %v10142_v6  ;;  %6007 = vmatpush1.bf16.msra.mxu1 %v10145_v7  ;;  %v10246_v6 = vld [vmem:[%s11786_s29 + $0xcb4] ss:$8 sps:$4 sm:$0xff]  }
 0x1be   : > { %7024 = vmatpush1.bf16.msra.mxu0 %v10148_v8  ;;  %6008 = vmatprep.subr.bf16.mxu1 %v10153_v9  ;;  %v10247_v7 = vld [vmem:[%s11778_s15 + $0x6d4] ss:$144 sps:$4 sm:$0xff]   ;;  %v10249_v8 = vld [vmem:[%s11778_s15 + $0x71c] ss:$144 sps:$4 sm:$0xff]   ;;  %v10241_v9 = vld [vmem:[%s11786_s29 + $0x3b0] ss:$8 sps:$4 sm:$0xff]  }
 0x1bf   : > { %7025 = vmatprep.subr.bf16.mxu0 %v10156_v10  ;;  %5935 = vmatprep.mubr.bf16.mxu1 %v10157_v11  ;;  %v10244_v10 = vld [vmem:[%s11786_s29 + $0xcb0] ss:$8 sps:$4 sm:$0xff]   ;;  %v10254_v11 = vld [vmem:[%s11786_s29 + $0x3c4] ss:$8 sps:$4 sm:$0xff]  }
 0x1c0   : > { %6952 = vmatprep.mubr.bf16.mxu0 %v10159_v12  ;;  %v10258_v12 = vld [vmem:[%s11786_s29 + $0xcc4] ss:$8 sps:$4 sm:$0xff]  }
 0x1c1   : > { %6009 = vmatpush1.bf16.msra.mxu1 %v10151_v13  ;;  %v10251_v13 = vld [vmem:[%s11778_s15 + $0x6d0] ss:$144 sps:$4 sm:$0xff]  }
 0x1c2   : > { %7026 = vmatpush1.bf16.msra.mxu0 %v10154_v14  ;;  %6010 = vmatprep.subr.bf16.mxu1 %v10164_v15  ;;  %v10252_v14 = vld [vmem:[%s11786_s29 + $0x3c0] ss:$8 sps:$4 sm:$0xff]  }
 0x1c3   : > { %7027 = vmatprep.subr.bf16.mxu0 %v10168_v16  ;;  %v10255_v15 = vld [vmem:[%s11778_s15 + $0x718] ss:$144 sps:$4 sm:$0xff]  }
 0x1c4   : > { %5936 = vmatmul.mubr.bf16.gmra.mrb[4].mxu1 %v10161_v17  ;;  %v10256_v16 = vld [vmem:[%s11786_s29 + $0xcc0] ss:$8 sps:$4 sm:$0xff]   ;;  %v10261_v17 = vld [vmem:[%s11786_s29 + $0x3d4] ss:$8 sps:$4 sm:$0xff]  }
 0x1c5   : > { %6953 = vmatmul.mubr.bf16.gmra.mrb[4].mxu0 %v10165_v19  ;;  %6011 = vmatpush1.bf16.msra.mxu1 %v10162_v18  ;;  %v10264_v18 = vld [vmem:[%s11786_s29 + $0xcd4] ss:$8 sps:$4 sm:$0xff]  }
 0x1c6   : > { %7028 = vmatpush1.bf16.msra.mxu0 %v10166_v20  ;;  %6012 = vmatprep.subr.bf16.mxu1 %v10171_v21  ;;  %v10265_v19 = vld [vmem:[%s11778_s15 + $0x7f4] ss:$144 sps:$4 sm:$0xff]   ;;  %v10267_v20 = vld [vmem:[%s11778_s15 + $0x83c] ss:$144 sps:$4 sm:$0xff]   ;;  %v10259_v21 = vld [vmem:[%s11786_s29 + $0x3d0] ss:$8 sps:$4 sm:$0xff]  }
 0x1c7   : > { %7029 = vmatprep.subr.bf16.mxu0 %v10174_v22  ;;  %5945 = vmatprep.mubr.bf16.mxu1 %v10175_v23  ;;  %v10262_v22 = vld [vmem:[%s11786_s29 + $0xcd0] ss:$8 sps:$4 sm:$0xff]   ;;  %v10272_v23 = vld [vmem:[%s11786_s29 + $0x3e4] ss:$8 sps:$4 sm:$0xff]  }
 0x1c8   : > { %6962 = vmatprep.mubr.bf16.mxu0 %v10177_v24  ;;  %v10276_v24 = vld [vmem:[%s11786_s29 + $0xce4] ss:$8 sps:$4 sm:$0xff]  }
 0x1c9   : > { %6013 = vmatpush1.bf16.msra.mxu1 %v10169_v25  ;;  %v10269_v25 = vld [vmem:[%s11778_s15 + $0x7f0] ss:$144 sps:$4 sm:$0xff]  }
 0x1ca   : > { %7030 = vmatpush1.bf16.msra.mxu0 %v10172_v26  ;;  %6014 = vmatprep.subr.bf16.mxu1 %v10182_v27  ;;  %v10270_v26 = vld [vmem:[%s11786_s29 + $0x3e0] ss:$8 sps:$4 sm:$0xff]  }
 0x1cb   : > { %7031 = vmatprep.subr.bf16.mxu0 %v10186_v28  ;;  %v10273_v27 = vld [vmem:[%s11778_s15 + $0x838] ss:$144 sps:$4 sm:$0xff]  }
 0x1cc   : > { %5946 = vmatmul.mubr.bf16.gmra.mrb[8].mxu1 %v10179_v29  ;;  %v10274_v28 = vld [vmem:[%s11786_s29 + $0xce0] ss:$8 sps:$4 sm:$0xff]   ;;  %v10279_v29 = vld [vmem:[%s11786_s29 + $0x3f4] ss:$8 sps:$4 sm:$0xff]  }
 0x1cd   : > { %6963 = vmatmul.mubr.bf16.gmra.mrb[8].mxu0 %v10183_v31  ;;  %6015 = vmatpush1.bf16.msra.mxu1 %v10180_v30  ;;  %v10282_v30 = vld [vmem:[%s11786_s29 + $0xcf4] ss:$8 sps:$4 sm:$0xff]  }
 0x1ce   : > { %7032 = vmatpush1.bf16.msra.mxu0 %v10184_v32  ;;  %6016 = vmatprep.subr.bf16.mxu1 %v10189_v33  ;;  %v10285_v31 = vld [vmem:[%s11778_s15 + $0x1c] ss:$144 sps:$4 sm:$0xff]   ;;  %v10288_v32 = vld [vmem:[%s11778_s15 + $0x64] ss:$144 sps:$4 sm:$0xff]   ;;  %v10277_v33 = vld [vmem:[%s11786_s29 + $0x3f0] ss:$8 sps:$4 sm:$0xff]  }
 0x1cf   : > { %7033 = vmatprep.subr.bf16.mxu0 %v10192_v34  ;;  %5955 = vmatprep.mubr.bf16.mxu1 %v10193_v35  ;;  %v10280_v34 = vld [vmem:[%s11786_s29 + $0xcf0] ss:$8 sps:$4 sm:$0xff]   ;;  %v10291_v35 = vld [vmem:[%s11786_s29 + $0x404] ss:$8 sps:$4 sm:$0xff]  }
 0x1d0   : > { %6972 = vmatprep.mubr.bf16.mxu0 %v10195_v36  ;;  %v10294_v36 = vld [vmem:[%s11786_s29 + $0xd04] ss:$8 sps:$4 sm:$0xff]  }
 0x1d1   : > { %6017 = vmatpush1.bf16.msra.mxu1 %v10187_v37  ;;  %v10283_v37 = vld [vmem:[%s11778_s15 + $0x18] ss:$144 sps:$4 sm:$0xff]  }
 0x1d2   : > { %7034 = vmatpush1.bf16.msra.mxu0 %v10190_v38  ;;  %6018 = vmatprep.subr.bf16.mxu1 %v10200_v39  ;;  %v10286_v38 = vld [vmem:[%s11778_s15 + $0x60] ss:$144 sps:$4 sm:$0xff]  }
 0x1d3   : > { %7035 = vmatprep.subr.bf16.mxu0 %v10204_v40  ;;  %v10289_v39 = vld [vmem:[%s11786_s29 + $0x400] ss:$8 sps:$4 sm:$0xff]  }
 0x1d4   : > { %5956 = vmatmul.mubr.bf16.gmra.mrb[12].mxu1 %v10197_v41  ;;  %v10292_v40 = vld [vmem:[%s11786_s29 + $0xd00] ss:$8 sps:$4 sm:$0xff]   ;;  %v10297_v41 = vld [vmem:[%s11786_s29 + $0x414] ss:$8 sps:$4 sm:$0xff]  }
 0x1d5   : > { %6973 = vmatmul.mubr.bf16.gmra.mrb[12].mxu0 %v10201_v43  ;;  %6019 = vmatpush1.bf16.msra.mxu1 %v10198_v42  ;;  %v10300_v42 = vld [vmem:[%s11786_s29 + $0xd14] ss:$8 sps:$4 sm:$0xff]  }
 0x1d6   : > { %7036 = vmatpush1.bf16.msra.mxu0 %v10202_v44  ;;  %6020 = vmatprep.subr.bf16.mxu1 %v10207_v45  ;;  %v10301_v43 = vld [vmem:[%s11778_s15 + $0x13c] ss:$144 sps:$4 sm:$0xff]   ;;  %v10303_v44 = vld [vmem:[%s11778_s15 + $0x184] ss:$144 sps:$4 sm:$0xff]   ;;  %v10295_v45 = vld [vmem:[%s11786_s29 + $0x410] ss:$8 sps:$4 sm:$0xff]  }
 0x1d7   : > { %7037 = vmatprep.subr.bf16.mxu0 %v10210_v46  ;;  %5965 = vmatprep.mubr.bf16.mxu1 %v10211_v47  ;;  %v10298_v46 = vld [vmem:[%s11786_s29 + $0xd10] ss:$8 sps:$4 sm:$0xff]   ;;  %v10308_v47 = vld [vmem:[%s11786_s29 + $0x424] ss:$8 sps:$4 sm:$0xff]  }
 0x1d8   : > { %6982 = vmatprep.mubr.bf16.mxu0 %v10213_v48  ;;  %v10312_v48 = vld [vmem:[%s11786_s29 + $0xd24] ss:$8 sps:$4 sm:$0xff]  }
 0x1d9   : > { %6021 = vmatpush1.bf16.msra.mxu1 %v10205_v49  ;;  %v10305_v49 = vld [vmem:[%s11778_s15 + $0x138] ss:$144 sps:$4 sm:$0xff]  }
 0x1da   : > { %7038 = vmatpush1.bf16.msra.mxu0 %v10208_v50  ;;  %6022 = vmatprep.subr.bf16.mxu1 %v10218_v51  ;;  %v10306_v50 = vld [vmem:[%s11786_s29 + $0x420] ss:$8 sps:$4 sm:$0xff]  }
 0x1db   : > { %7039 = vmatprep.subr.bf16.mxu0 %v10222_v52  ;;  %v10309_v51 = vld [vmem:[%s11778_s15 + $0x180] ss:$144 sps:$4 sm:$0xff]  }
 0x1dc   : > { %5966 = vmatmul.mubr.bf16.gmra.mrb[16].mxu1 %v10215_v53  ;;  %v10310_v52 = vld [vmem:[%s11786_s29 + $0xd20] ss:$8 sps:$4 sm:$0xff]   ;;  %v10315_v53 = vld [vmem:[%s11786_s29 + $0x434] ss:$8 sps:$4 sm:$0xff]  }
 0x1dd   : > { %6983 = vmatmul.mubr.bf16.gmra.mrb[16].mxu0 %v10219_v55  ;;  %6023 = vmatpush1.bf16.msra.mxu1 %v10216_v54  ;;  %v10318_v54 = vld [vmem:[%s11786_s29 + $0xd34] ss:$8 sps:$4 sm:$0xff]  }
 0x1de   : > { %7040 = vmatpush1.bf16.msra.mxu0 %v10220_v56  ;;  %6024 = vmatprep.subr.bf16.mxu1 %v10225_v57  ;;  %v10319_v55 = vld [vmem:[%s11778_s15 + $0x25c] ss:$144 sps:$4 sm:$0xff]   ;;  %v10321_v56 = vld [vmem:[%s11778_s15 + $0x2a4] ss:$144 sps:$4 sm:$0xff]   ;;  %v10313_v57 = vld [vmem:[%s11786_s29 + $0x430] ss:$8 sps:$4 sm:$0xff]  }
 0x1df   : > { %7041 = vmatprep.subr.bf16.mxu0 %v10228_v58  ;;  %5975 = vmatprep.mubr.bf16.mxu1 %v10229_v59  ;;  %v10316_v58 = vld [vmem:[%s11786_s29 + $0xd30] ss:$8 sps:$4 sm:$0xff]   ;;  %v10326_v59 = vld [vmem:[%s11786_s29 + $0x444] ss:$8 sps:$4 sm:$0xff]  }
 0x1e0   : > { %6992 = vmatprep.mubr.bf16.mxu0 %v10231_v60  ;;  %v10330_v60 = vld [vmem:[%s11786_s29 + $0xd44] ss:$8 sps:$4 sm:$0xff]  }
 0x1e1   : > { %6025 = vmatpush1.bf16.msra.mxu1 %v10223_v61  ;;  %v10323_v61 = vld [vmem:[%s11778_s15 + $0x258] ss:$144 sps:$4 sm:$0xff]  }
 0x1e2   : > { %7042 = vmatpush1.bf16.msra.mxu0 %v10226_v62  ;;  %6026 = vmatprep.subr.bf16.mxu1 %v10236_v63  ;;  %v10324_v62 = vld [vmem:[%s11786_s29 + $0x440] ss:$8 sps:$4 sm:$0xff]  }
 0x1e3   : > { %7043 = vmatprep.subr.bf16.mxu0 %v10240_v0  ;;  %v10327_v63 = vld [vmem:[%s11778_s15 + $0x2a0] ss:$144 sps:$4 sm:$0xff]  }
 0x1e4   : > { %5976 = vmatmul.mubr.bf16.gmra.mrb[20].mxu1 %v10233_v1  ;;  %v10328_v0 = vld [vmem:[%s11786_s29 + $0xd40] ss:$8 sps:$4 sm:$0xff]   ;;  %v10333_v1 = vld [vmem:[%s11786_s29 + $0x454] ss:$8 sps:$4 sm:$0xff]  }
 0x1e5   : > { %6993 = vmatmul.mubr.bf16.gmra.mrb[20].mxu0 %v10237_v3  ;;  %6027 = vmatpush1.bf16.msra.mxu1 %v10234_v2  ;;  %v10336_v2 = vld [vmem:[%s11786_s29 + $0xd54] ss:$8 sps:$4 sm:$0xff]  }
 0x1e6   : > { %7044 = vmatpush1.bf16.msra.mxu0 %v10238_v4  ;;  %6028 = vmatprep.subr.bf16.mxu1 %v10243_v5  ;;  %v10337_v3 = vld [vmem:[%s11778_s15 + $0x37c] ss:$144 sps:$4 sm:$0xff]   ;;  %v10339_v4 = vld [vmem:[%s11778_s15 + $0x3c4] ss:$144 sps:$4 sm:$0xff]   ;;  %v10331_v5 = vld [vmem:[%s11786_s29 + $0x450] ss:$8 sps:$4 sm:$0xff]  }
 0x1e7   : > { %7045 = vmatprep.subr.bf16.mxu0 %v10246_v6  ;;  %5985 = vmatprep.mubr.bf16.mxu1 %v10247_v7  ;;  %v10334_v6 = vld [vmem:[%s11786_s29 + $0xd50] ss:$8 sps:$4 sm:$0xff]   ;;  %v10344_v7 = vld [vmem:[%s11786_s29 + $0x464] ss:$8 sps:$4 sm:$0xff]  }
 0x1e8   : > { %7002 = vmatprep.mubr.bf16.mxu0 %v10249_v8  ;;  %v10348_v8 = vld [vmem:[%s11786_s29 + $0xd64] ss:$8 sps:$4 sm:$0xff]  }
 0x1e9   : > { %6029 = vmatpush1.bf16.msra.mxu1 %v10241_v9  ;;  %v10341_v9 = vld [vmem:[%s11778_s15 + $0x378] ss:$144 sps:$4 sm:$0xff]  }
 0x1ea   : > { %7046 = vmatpush1.bf16.msra.mxu0 %v10244_v10  ;;  %6030 = vmatprep.subr.bf16.mxu1 %v10254_v11  ;;  %v10342_v10 = vld [vmem:[%s11786_s29 + $0x460] ss:$8 sps:$4 sm:$0xff]  }
 0x1eb   : > { %7047 = vmatprep.subr.bf16.mxu0 %v10258_v12  ;;  %v10345_v11 = vld [vmem:[%s11778_s15 + $0x3c0] ss:$144 sps:$4 sm:$0xff]  }
 0x1ec   : > { %5986 = vmatmul.mubr.bf16.gmra.mrb[24].mxu1 %v10251_v13  ;;  %v10346_v12 = vld [vmem:[%s11786_s29 + $0xd60] ss:$8 sps:$4 sm:$0xff]   ;;  %v10351_v13 = vld [vmem:[%s11786_s29 + $0x474] ss:$8 sps:$4 sm:$0xff]  }
 0x1ed   : > { %7003 = vmatmul.mubr.bf16.gmra.mrb[24].mxu0 %v10255_v15  ;;  %6031 = vmatpush1.bf16.msra.mxu1 %v10252_v14  ;;  %v10354_v14 = vld [vmem:[%s11786_s29 + $0xd74] ss:$8 sps:$4 sm:$0xff]  }
 0x1ee   : > { %7048 = vmatpush1.bf16.msra.mxu0 %v10256_v16  ;;  %6032 = vmatprep.subr.bf16.mxu1 %v10261_v17  ;;  %v10355_v15 = vld [vmem:[%s11778_s15 + $0x49c] ss:$144 sps:$4 sm:$0xff]   ;;  %v10357_v16 = vld [vmem:[%s11778_s15 + $0x4e4] ss:$144 sps:$4 sm:$0xff]   ;;  %v10349_v17 = vld [vmem:[%s11786_s29 + $0x470] ss:$8 sps:$4 sm:$0xff]  }
 0x1ef   : > { %7049 = vmatprep.subr.bf16.mxu0 %v10264_v18  ;;  %5995 = vmatprep.mubr.bf16.mxu1 %v10265_v19  ;;  %v10352_v18 = vld [vmem:[%s11786_s29 + $0xd70] ss:$8 sps:$4 sm:$0xff]   ;;  %v10362_v19 = vld [vmem:[%s11786_s29 + $0x484] ss:$8 sps:$4 sm:$0xff]  }
 0x1f0   : > { %7012 = vmatprep.mubr.bf16.mxu0 %v10267_v20  ;;  %v10366_v20 = vld [vmem:[%s11786_s29 + $0xd84] ss:$8 sps:$4 sm:$0xff]  }
 0x1f1   : > { %6033 = vmatpush1.bf16.msra.mxu1 %v10259_v21  ;;  %v10359_v21 = vld [vmem:[%s11778_s15 + $0x498] ss:$144 sps:$4 sm:$0xff]  }
 0x1f2   : > { %7050 = vmatpush1.bf16.msra.mxu0 %v10262_v22  ;;  %6034 = vmatprep.subr.bf16.mxu1 %v10272_v23  ;;  %v10360_v22 = vld [vmem:[%s11786_s29 + $0x480] ss:$8 sps:$4 sm:$0xff]  }
 0x1f3   : > { %7051 = vmatprep.subr.bf16.mxu0 %v10276_v24  ;;  %v10363_v23 = vld [vmem:[%s11778_s15 + $0x4e0] ss:$144 sps:$4 sm:$0xff]  }
 0x1f4   : > { %5996 = vmatmul.mubr.bf16.gmra.mrb[28].mxu1 %v10269_v25  ;;  %v10364_v24 = vld [vmem:[%s11786_s29 + $0xd80] ss:$8 sps:$4 sm:$0xff]   ;;  %v10369_v25 = vld [vmem:[%s11786_s29 + $0x494] ss:$8 sps:$4 sm:$0xff]  }
 0x1f5   : > { %7013 = vmatmul.mubr.bf16.gmra.mrb[28].mxu0 %v10273_v27  ;;  %6035 = vmatpush1.bf16.msra.mxu1 %v10270_v26  ;;  %v10372_v26 = vld [vmem:[%s11786_s29 + $0xd94] ss:$8 sps:$4 sm:$0xff]  }
 0x1f6   : > { %7052 = vmatpush1.bf16.msra.mxu0 %v10274_v28  ;;  %6036 = vmatprep.subr.bf16.mxu1 %v10279_v29  ;;  %v10373_v27 = vld [vmem:[%s11778_s15 + $0x5bc] ss:$144 sps:$4 sm:$0xff]   ;;  %v10375_v28 = vld [vmem:[%s11778_s15 + $0x604] ss:$144 sps:$4 sm:$0xff]   ;;  %v10367_v29 = vld [vmem:[%s11786_s29 + $0x490] ss:$8 sps:$4 sm:$0xff]  }
 0x1f7   : > { %7053 = vmatprep.subr.bf16.mxu0 %v10282_v30  ;;  %6038 = vmatprep.mubr.bf16.mxu1 %v10285_v31  ;;  %v10370_v30 = vld [vmem:[%s11786_s29 + $0xd90] ss:$8 sps:$4 sm:$0xff]   ;;  %v10380_v31 = vld [vmem:[%s11786_s29 + $0x4a4] ss:$8 sps:$4 sm:$0xff]  }
 0x1f8   : > { %7055 = vmatprep.mubr.bf16.mxu0 %v10288_v32  ;;  %v10384_v32 = vld [vmem:[%s11786_s29 + $0xda4] ss:$8 sps:$4 sm:$0xff]  }
 0x1f9   : > { %6037 = vmatpush1.bf16.msra.mxu1 %v10277_v33  ;;  %v10377_v33 = vld [vmem:[%s11778_s15 + $0x5b8] ss:$144 sps:$4 sm:$0xff]  }
 0x1fa   : > { %7054 = vmatpush1.bf16.msra.mxu0 %v10280_v34  ;;  %6119 = vmatprep.subr.bf16.mxu1 %v10291_v35  ;;  %v10378_v34 = vld [vmem:[%s11786_s29 + $0x4a0] ss:$8 sps:$4 sm:$0xff]  }
 0x1fb   : > { %7136 = vmatprep.subr.bf16.mxu0 %v10294_v36  ;;  %v10381_v35 = vld [vmem:[%s11778_s15 + $0x600] ss:$144 sps:$4 sm:$0xff]  }
 0x1fc   : > { %6039 = vmatmul.mubr.bf16.vlgmr.msra.gmra.mrb[0].mxu1 %v10283_v37  ;;  %v10382_v36 = vld [vmem:[%s11786_s29 + $0xda0] ss:$8 sps:$4 sm:$0xff]   ;;  %v10387_v37 = vld [vmem:[%s11786_s29 + $0x4b4] ss:$8 sps:$4 sm:$0xff]  }
 0x1fd   : > { %7056 = vmatmul.mubr.bf16.vlgmr.msra.gmra.mrb[0].mxu0 %v10286_v38  ;;  %6120 = vmatpush1.bf16.msra.mxu1 %v10289_v39  ;;  %v10390_v38 = vld [vmem:[%s11786_s29 + $0xdb4] ss:$8 sps:$4 sm:$0xff]  }
 0x1fe   : > { %7137 = vmatpush1.bf16.msra.mxu0 %v10292_v40  ;;  %6121 = vmatprep.subr.bf16.mxu1 %v10297_v41  ;;  %v10391_v39 = vld [vmem:[%s11778_s15 + $0x6dc] ss:$144 sps:$4 sm:$0xff]   ;;  %v10393_v40 = vld [vmem:[%s11778_s15 + $0x724] ss:$144 sps:$4 sm:$0xff]   ;;  %v10385_v41 = vld [vmem:[%s11786_s29 + $0x4b0] ss:$8 sps:$4 sm:$0xff]  }
 0x1ff   : > { %7138 = vmatprep.subr.bf16.mxu0 %v10300_v42  ;;  %6048 = vmatprep.mubr.bf16.mxu1 %v10301_v43  ;;  %v10388_v42 = vld [vmem:[%s11786_s29 + $0xdb0] ss:$8 sps:$4 sm:$0xff]   ;;  %v10398_v43 = vld [vmem:[%s11786_s29 + $0x4c4] ss:$8 sps:$4 sm:$0xff]  }
 0x200   : > { %7065 = vmatprep.mubr.bf16.mxu0 %v10303_v44  ;;  %v10402_v44 = vld [vmem:[%s11786_s29 + $0xdc4] ss:$8 sps:$4 sm:$0xff]  }
 0x201   : > { %6122 = vmatpush1.bf16.msra.mxu1 %v10295_v45  ;;  %v10395_v45 = vld [vmem:[%s11778_s15 + $0x6d8] ss:$144 sps:$4 sm:$0xff]  }
 0x202   : > { %7139 = vmatpush1.bf16.msra.mxu0 %v10298_v46  ;;  %6123 = vmatprep.subr.bf16.mxu1 %v10308_v47  ;;  %v10396_v46 = vld [vmem:[%s11786_s29 + $0x4c0] ss:$8 sps:$4 sm:$0xff]  }
 0x203   : > { %7140 = vmatprep.subr.bf16.mxu0 %v10312_v48  ;;  %v10399_v47 = vld [vmem:[%s11778_s15 + $0x720] ss:$144 sps:$4 sm:$0xff]  }
 0x204   : > { %6049 = vmatmul.mubr.bf16.gmra.mrb[4].mxu1 %v10305_v49  ;;  %v10400_v48 = vld [vmem:[%s11786_s29 + $0xdc0] ss:$8 sps:$4 sm:$0xff]   ;;  %v10405_v49 = vld [vmem:[%s11786_s29 + $0x4d4] ss:$8 sps:$4 sm:$0xff]  }
 0x205   : > { %7066 = vmatmul.mubr.bf16.gmra.mrb[4].mxu0 %v10309_v51  ;;  %6124 = vmatpush1.bf16.msra.mxu1 %v10306_v50  ;;  %v10408_v50 = vld [vmem:[%s11786_s29 + $0xdd4] ss:$8 sps:$4 sm:$0xff]  }
 0x206   : > { %7141 = vmatpush1.bf16.msra.mxu0 %v10310_v52  ;;  %6125 = vmatprep.subr.bf16.mxu1 %v10315_v53  ;;  %v10409_v51 = vld [vmem:[%s11778_s15 + $0x7fc] ss:$144 sps:$4 sm:$0xff]   ;;  %v10411_v52 = vld [vmem:[%s11778_s15 + $0x844] ss:$144 sps:$4 sm:$0xff]   ;;  %v10403_v53 = vld [vmem:[%s11786_s29 + $0x4d0] ss:$8 sps:$4 sm:$0xff]  }
 0x207   : > { %7142 = vmatprep.subr.bf16.mxu0 %v10318_v54  ;;  %6058 = vmatprep.mubr.bf16.mxu1 %v10319_v55  ;;  %v10406_v54 = vld [vmem:[%s11786_s29 + $0xdd0] ss:$8 sps:$4 sm:$0xff]   ;;  %v10416_v55 = vld [vmem:[%s11786_s29 + $0x4e4] ss:$8 sps:$4 sm:$0xff]  }
 0x208   : > { %7075 = vmatprep.mubr.bf16.mxu0 %v10321_v56  ;;  %v10420_v56 = vld [vmem:[%s11786_s29 + $0xde4] ss:$8 sps:$4 sm:$0xff]  }
 0x209   : > { %6126 = vmatpush1.bf16.msra.mxu1 %v10313_v57  ;;  %v10413_v57 = vld [vmem:[%s11778_s15 + $0x7f8] ss:$144 sps:$4 sm:$0xff]  }
 0x20a   : > { %7143 = vmatpush1.bf16.msra.mxu0 %v10316_v58  ;;  %6127 = vmatprep.subr.bf16.mxu1 %v10326_v59  ;;  %v10414_v58 = vld [vmem:[%s11786_s29 + $0x4e0] ss:$8 sps:$4 sm:$0xff]  }
 0x20b   : > { %7144 = vmatprep.subr.bf16.mxu0 %v10330_v60  ;;  %v10417_v59 = vld [vmem:[%s11778_s15 + $0x840] ss:$144 sps:$4 sm:$0xff]  }
 0x20c   : > { %6059 = vmatmul.mubr.bf16.gmra.mrb[8].mxu1 %v10323_v61  ;;  %v10418_v60 = vld [vmem:[%s11786_s29 + $0xde0] ss:$8 sps:$4 sm:$0xff]   ;;  %v10423_v61 = vld [vmem:[%s11786_s29 + $0x4f4] ss:$8 sps:$4 sm:$0xff]  }
 0x20d   : > { %7076 = vmatmul.mubr.bf16.gmra.mrb[8].mxu0 %v10327_v63  ;;  %6128 = vmatpush1.bf16.msra.mxu1 %v10324_v62  ;;  %v10426_v62 = vld [vmem:[%s11786_s29 + $0xdf4] ss:$8 sps:$4 sm:$0xff]  }
 0x20e   : > { %7145 = vmatpush1.bf16.msra.mxu0 %v10328_v0  ;;  %6129 = vmatprep.subr.bf16.mxu1 %v10333_v1  ;;  %v10429_v63 = vld [vmem:[%s11778_s15 + $0x24] ss:$144 sps:$4 sm:$0xff]   ;;  %v10432_v0 = vld [vmem:[%s11778_s15 + $0x6c] ss:$144 sps:$4 sm:$0xff]   ;;  %v10421_v1 = vld [vmem:[%s11786_s29 + $0x4f0] ss:$8 sps:$4 sm:$0xff]  }
 0x20f   : > { %7146 = vmatprep.subr.bf16.mxu0 %v10336_v2  ;;  %6068 = vmatprep.mubr.bf16.mxu1 %v10337_v3  ;;  %v10424_v2 = vld [vmem:[%s11786_s29 + $0xdf0] ss:$8 sps:$4 sm:$0xff]   ;;  %v10435_v3 = vld [vmem:[%s11786_s29 + $0x504] ss:$8 sps:$4 sm:$0xff]  }
 0x210   : > { %7085 = vmatprep.mubr.bf16.mxu0 %v10339_v4  ;;  %v10438_v4 = vld [vmem:[%s11786_s29 + $0xe04] ss:$8 sps:$4 sm:$0xff]  }
 0x211   : > { %6130 = vmatpush1.bf16.msra.mxu1 %v10331_v5  ;;  %v10427_v5 = vld [vmem:[%s11778_s15 + $0x20] ss:$144 sps:$4 sm:$0xff]  }
 0x212   : > { %7147 = vmatpush1.bf16.msra.mxu0 %v10334_v6  ;;  %6131 = vmatprep.subr.bf16.mxu1 %v10344_v7  ;;  %v10430_v6 = vld [vmem:[%s11778_s15 + $0x68] ss:$144 sps:$4 sm:$0xff]  }
 0x213   : > { %7148 = vmatprep.subr.bf16.mxu0 %v10348_v8  ;;  %v10433_v7 = vld [vmem:[%s11786_s29 + $0x500] ss:$8 sps:$4 sm:$0xff]  }
 0x214   : > { %6069 = vmatmul.mubr.bf16.gmra.mrb[12].mxu1 %v10341_v9  ;;  %v10436_v8 = vld [vmem:[%s11786_s29 + $0xe00] ss:$8 sps:$4 sm:$0xff]   ;;  %v10441_v9 = vld [vmem:[%s11786_s29 + $0x514] ss:$8 sps:$4 sm:$0xff]  }
 0x215   : > { %7086 = vmatmul.mubr.bf16.gmra.mrb[12].mxu0 %v10345_v11  ;;  %6132 = vmatpush1.bf16.msra.mxu1 %v10342_v10  ;;  %v10444_v10 = vld [vmem:[%s11786_s29 + $0xe14] ss:$8 sps:$4 sm:$0xff]  }
 0x216   : > { %7149 = vmatpush1.bf16.msra.mxu0 %v10346_v12  ;;  %6133 = vmatprep.subr.bf16.mxu1 %v10351_v13  ;;  %v10445_v11 = vld [vmem:[%s11778_s15 + $0x144] ss:$144 sps:$4 sm:$0xff]   ;;  %v10447_v12 = vld [vmem:[%s11778_s15 + $0x18c] ss:$144 sps:$4 sm:$0xff]   ;;  %v10439_v13 = vld [vmem:[%s11786_s29 + $0x510] ss:$8 sps:$4 sm:$0xff]  }
 0x217   : > { %7150 = vmatprep.subr.bf16.mxu0 %v10354_v14  ;;  %6078 = vmatprep.mubr.bf16.mxu1 %v10355_v15  ;;  %v10442_v14 = vld [vmem:[%s11786_s29 + $0xe10] ss:$8 sps:$4 sm:$0xff]   ;;  %v10452_v15 = vld [vmem:[%s11786_s29 + $0x524] ss:$8 sps:$4 sm:$0xff]  }
 0x218   : > { %7095 = vmatprep.mubr.bf16.mxu0 %v10357_v16  ;;  %v10456_v16 = vld [vmem:[%s11786_s29 + $0xe24] ss:$8 sps:$4 sm:$0xff]  }
 0x219   : > { %6134 = vmatpush1.bf16.msra.mxu1 %v10349_v17  ;;  %v10449_v17 = vld [vmem:[%s11778_s15 + $0x140] ss:$144 sps:$4 sm:$0xff]  }
 0x21a   : > { %7151 = vmatpush1.bf16.msra.mxu0 %v10352_v18  ;;  %6135 = vmatprep.subr.bf16.mxu1 %v10362_v19  ;;  %v10450_v18 = vld [vmem:[%s11786_s29 + $0x520] ss:$8 sps:$4 sm:$0xff]  }
 0x21b   : > { %7152 = vmatprep.subr.bf16.mxu0 %v10366_v20  ;;  %v10453_v19 = vld [vmem:[%s11778_s15 + $0x188] ss:$144 sps:$4 sm:$0xff]  }
 0x21c   : > { %6079 = vmatmul.mubr.bf16.gmra.mrb[16].mxu1 %v10359_v21  ;;  %v10454_v20 = vld [vmem:[%s11786_s29 + $0xe20] ss:$8 sps:$4 sm:$0xff]   ;;  %v10459_v21 = vld [vmem:[%s11786_s29 + $0x534] ss:$8 sps:$4 sm:$0xff]  }
 0x21d   : > { %7096 = vmatmul.mubr.bf16.gmra.mrb[16].mxu0 %v10363_v23  ;;  %6136 = vmatpush1.bf16.msra.mxu1 %v10360_v22  ;;  %v10462_v22 = vld [vmem:[%s11786_s29 + $0xe34] ss:$8 sps:$4 sm:$0xff]  }
 0x21e   : > { %7153 = vmatpush1.bf16.msra.mxu0 %v10364_v24  ;;  %6137 = vmatprep.subr.bf16.mxu1 %v10369_v25  ;;  %v10463_v23 = vld [vmem:[%s11778_s15 + $0x264] ss:$144 sps:$4 sm:$0xff]   ;;  %v10465_v24 = vld [vmem:[%s11778_s15 + $0x2ac] ss:$144 sps:$4 sm:$0xff]   ;;  %v10457_v25 = vld [vmem:[%s11786_s29 + $0x530] ss:$8 sps:$4 sm:$0xff]  }
 0x21f   : > { %7154 = vmatprep.subr.bf16.mxu0 %v10372_v26  ;;  %6088 = vmatprep.mubr.bf16.mxu1 %v10373_v27  ;;  %v10460_v26 = vld [vmem:[%s11786_s29 + $0xe30] ss:$8 sps:$4 sm:$0xff]   ;;  %v10470_v27 = vld [vmem:[%s11786_s29 + $0x544] ss:$8 sps:$4 sm:$0xff]  }
 0x220   : > { %7105 = vmatprep.mubr.bf16.mxu0 %v10375_v28  ;;  %v10474_v28 = vld [vmem:[%s11786_s29 + $0xe44] ss:$8 sps:$4 sm:$0xff]  }
 0x221   : > { %6138 = vmatpush1.bf16.msra.mxu1 %v10367_v29  ;;  %v10467_v29 = vld [vmem:[%s11778_s15 + $0x260] ss:$144 sps:$4 sm:$0xff]  }
 0x222   : > { %7155 = vmatpush1.bf16.msra.mxu0 %v10370_v30  ;;  %6139 = vmatprep.subr.bf16.mxu1 %v10380_v31  ;;  %v10468_v30 = vld [vmem:[%s11786_s29 + $0x540] ss:$8 sps:$4 sm:$0xff]  }
 0x223   : > { %7156 = vmatprep.subr.bf16.mxu0 %v10384_v32  ;;  %v10471_v31 = vld [vmem:[%s11778_s15 + $0x2a8] ss:$144 sps:$4 sm:$0xff]  }
 0x224   : > { %6089 = vmatmul.mubr.bf16.gmra.mrb[20].mxu1 %v10377_v33  ;;  %v10472_v32 = vld [vmem:[%s11786_s29 + $0xe40] ss:$8 sps:$4 sm:$0xff]   ;;  %v10477_v33 = vld [vmem:[%s11786_s29 + $0x554] ss:$8 sps:$4 sm:$0xff]  }
 0x225   : > { %7106 = vmatmul.mubr.bf16.gmra.mrb[20].mxu0 %v10381_v35  ;;  %6140 = vmatpush1.bf16.msra.mxu1 %v10378_v34  ;;  %v10480_v34 = vld [vmem:[%s11786_s29 + $0xe54] ss:$8 sps:$4 sm:$0xff]  }
 0x226   : > { %7157 = vmatpush1.bf16.msra.mxu0 %v10382_v36  ;;  %6141 = vmatprep.subr.bf16.mxu1 %v10387_v37  ;;  %v10481_v35 = vld [vmem:[%s11778_s15 + $0x384] ss:$144 sps:$4 sm:$0xff]   ;;  %v10483_v36 = vld [vmem:[%s11778_s15 + $0x3cc] ss:$144 sps:$4 sm:$0xff]   ;;  %v10475_v37 = vld [vmem:[%s11786_s29 + $0x550] ss:$8 sps:$4 sm:$0xff]  }
 0x227   : > { %7158 = vmatprep.subr.bf16.mxu0 %v10390_v38  ;;  %6098 = vmatprep.mubr.bf16.mxu1 %v10391_v39  ;;  %v10478_v38 = vld [vmem:[%s11786_s29 + $0xe50] ss:$8 sps:$4 sm:$0xff]   ;;  %v10488_v39 = vld [vmem:[%s11786_s29 + $0x564] ss:$8 sps:$4 sm:$0xff]  }
 0x228   : > { %7115 = vmatprep.mubr.bf16.mxu0 %v10393_v40  ;;  %v10492_v40 = vld [vmem:[%s11786_s29 + $0xe64] ss:$8 sps:$4 sm:$0xff]  }
 0x229   : > { %6142 = vmatpush1.bf16.msra.mxu1 %v10385_v41  ;;  %v10485_v41 = vld [vmem:[%s11778_s15 + $0x380] ss:$144 sps:$4 sm:$0xff]  }
 0x22a   : > { %7159 = vmatpush1.bf16.msra.mxu0 %v10388_v42  ;;  %6143 = vmatprep.subr.bf16.mxu1 %v10398_v43  ;;  %v10486_v42 = vld [vmem:[%s11786_s29 + $0x560] ss:$8 sps:$4 sm:$0xff]  }
 0x22b   : > { %7160 = vmatprep.subr.bf16.mxu0 %v10402_v44  ;;  %v10489_v43 = vld [vmem:[%s11778_s15 + $0x3c8] ss:$144 sps:$4 sm:$0xff]  }
 0x22c   : > { %6099 = vmatmul.mubr.bf16.gmra.mrb[24].mxu1 %v10395_v45  ;;  %v10490_v44 = vld [vmem:[%s11786_s29 + $0xe60] ss:$8 sps:$4 sm:$0xff]   ;;  %v10495_v45 = vld [vmem:[%s11786_s29 + $0x574] ss:$8 sps:$4 sm:$0xff]  }
 0x22d   : > { %7116 = vmatmul.mubr.bf16.gmra.mrb[24].mxu0 %v10399_v47  ;;  %6144 = vmatpush1.bf16.msra.mxu1 %v10396_v46  ;;  %v10498_v46 = vld [vmem:[%s11786_s29 + $0xe74] ss:$8 sps:$4 sm:$0xff]  }
 0x22e   : > { %7161 = vmatpush1.bf16.msra.mxu0 %v10400_v48  ;;  %6145 = vmatprep.subr.bf16.mxu1 %v10405_v49  ;;  %v10499_v47 = vld [vmem:[%s11778_s15 + $0x4a4] ss:$144 sps:$4 sm:$0xff]   ;;  %v10501_v48 = vld [vmem:[%s11778_s15 + $0x4ec] ss:$144 sps:$4 sm:$0xff]   ;;  %v10493_v49 = vld [vmem:[%s11786_s29 + $0x570] ss:$8 sps:$4 sm:$0xff]  }
 0x22f   : > { %7162 = vmatprep.subr.bf16.mxu0 %v10408_v50  ;;  %6108 = vmatprep.mubr.bf16.mxu1 %v10409_v51  ;;  %v10496_v50 = vld [vmem:[%s11786_s29 + $0xe70] ss:$8 sps:$4 sm:$0xff]   ;;  %v10506_v51 = vld [vmem:[%s11786_s29 + $0x584] ss:$8 sps:$4 sm:$0xff]  }
 0x230   : > { %7125 = vmatprep.mubr.bf16.mxu0 %v10411_v52  ;;  %v10510_v52 = vld [vmem:[%s11786_s29 + $0xe84] ss:$8 sps:$4 sm:$0xff]  }
 0x231   : > { %6146 = vmatpush1.bf16.msra.mxu1 %v10403_v53  ;;  %v10503_v53 = vld [vmem:[%s11778_s15 + $0x4a0] ss:$144 sps:$4 sm:$0xff]  }
 0x232   : > { %7163 = vmatpush1.bf16.msra.mxu0 %v10406_v54  ;;  %6147 = vmatprep.subr.bf16.mxu1 %v10416_v55  ;;  %v10504_v54 = vld [vmem:[%s11786_s29 + $0x580] ss:$8 sps:$4 sm:$0xff]  }
 0x233   : > { %7164 = vmatprep.subr.bf16.mxu0 %v10420_v56  ;;  %v10507_v55 = vld [vmem:[%s11778_s15 + $0x4e8] ss:$144 sps:$4 sm:$0xff]  }
 0x234   : > { %6109 = vmatmul.mubr.bf16.gmra.mrb[28].mxu1 %v10413_v57  ;;  %v10508_v56 = vld [vmem:[%s11786_s29 + $0xe80] ss:$8 sps:$4 sm:$0xff]   ;;  %v10513_v57 = vld [vmem:[%s11786_s29 + $0x594] ss:$8 sps:$4 sm:$0xff]  }
 0x235   : > { %7126 = vmatmul.mubr.bf16.gmra.mrb[28].mxu0 %v10417_v59  ;;  %6148 = vmatpush1.bf16.msra.mxu1 %v10414_v58  ;;  %v10516_v58 = vld [vmem:[%s11786_s29 + $0xe94] ss:$8 sps:$4 sm:$0xff]  }
 0x236   : > { %7165 = vmatpush1.bf16.msra.mxu0 %v10418_v60  ;;  %6149 = vmatprep.subr.bf16.mxu1 %v10423_v61  ;;  %v10517_v59 = vld [vmem:[%s11778_s15 + $0x5c4] ss:$144 sps:$4 sm:$0xff]   ;;  %v10519_v60 = vld [vmem:[%s11778_s15 + $0x60c] ss:$144 sps:$4 sm:$0xff]   ;;  %v10511_v61 = vld [vmem:[%s11786_s29 + $0x590] ss:$8 sps:$4 sm:$0xff]  }
 0x237   : > { %7166 = vmatprep.subr.bf16.mxu0 %v10426_v62  ;;  %6151 = vmatprep.mubr.bf16.mxu1 %v10429_v63  ;;  %v10514_v62 = vld [vmem:[%s11786_s29 + $0xe90] ss:$8 sps:$4 sm:$0xff]   ;;  %v10524_v63 = vld [vmem:[%s11786_s29 + $0x5a4] ss:$8 sps:$4 sm:$0xff]  }
 0x238   : > { %7168 = vmatprep.mubr.bf16.mxu0 %v10432_v0  ;;  %v10528_v0 = vld [vmem:[%s11786_s29 + $0xea4] ss:$8 sps:$4 sm:$0xff]  }
 0x239   : > { %6150 = vmatpush1.bf16.msra.mxu1 %v10421_v1  ;;  %v10521_v1 = vld [vmem:[%s11778_s15 + $0x5c0] ss:$144 sps:$4 sm:$0xff]  }
 0x23a   : > { %7167 = vmatpush1.bf16.msra.mxu0 %v10424_v2  ;;  %6232 = vmatprep.subr.bf16.mxu1 %v10435_v3  ;;  %v10522_v2 = vld [vmem:[%s11786_s29 + $0x5a0] ss:$8 sps:$4 sm:$0xff]  }
 0x23b   : > { %7249 = vmatprep.subr.bf16.mxu0 %v10438_v4  ;;  %v10525_v3 = vld [vmem:[%s11778_s15 + $0x608] ss:$144 sps:$4 sm:$0xff]  }
 0x23c   : > { %6152 = vmatmul.mubr.bf16.vlgmr.msra.gmra.mrb[0].mxu1 %v10427_v5  ;;  %v10526_v4 = vld [vmem:[%s11786_s29 + $0xea0] ss:$8 sps:$4 sm:$0xff]   ;;  %v10531_v5 = vld [vmem:[%s11786_s29 + $0x5b4] ss:$8 sps:$4 sm:$0xff]  }
 0x23d   : > { %7169 = vmatmul.mubr.bf16.vlgmr.msra.gmra.mrb[0].mxu0 %v10430_v6  ;;  %6233 = vmatpush1.bf16.msra.mxu1 %v10433_v7  ;;  %v10534_v6 = vld [vmem:[%s11786_s29 + $0xeb4] ss:$8 sps:$4 sm:$0xff]  }
 0x23e   : > { %7250 = vmatpush1.bf16.msra.mxu0 %v10436_v8  ;;  %6234 = vmatprep.subr.bf16.mxu1 %v10441_v9  ;;  %v10535_v7 = vld [vmem:[%s11778_s15 + $0x6e4] ss:$144 sps:$4 sm:$0xff]   ;;  %v10537_v8 = vld [vmem:[%s11778_s15 + $0x72c] ss:$144 sps:$4 sm:$0xff]   ;;  %v10529_v9 = vld [vmem:[%s11786_s29 + $0x5b0] ss:$8 sps:$4 sm:$0xff]  }
 0x23f   : > { %7251 = vmatprep.subr.bf16.mxu0 %v10444_v10  ;;  %6161 = vmatprep.mubr.bf16.mxu1 %v10445_v11  ;;  %v10532_v10 = vld [vmem:[%s11786_s29 + $0xeb0] ss:$8 sps:$4 sm:$0xff]   ;;  %v10542_v11 = vld [vmem:[%s11786_s29 + $0x5c4] ss:$8 sps:$4 sm:$0xff]  }
 0x240   : > { %7178 = vmatprep.mubr.bf16.mxu0 %v10447_v12  ;;  %v10546_v12 = vld [vmem:[%s11786_s29 + $0xec4] ss:$8 sps:$4 sm:$0xff]  }
 0x241   : > { %6235 = vmatpush1.bf16.msra.mxu1 %v10439_v13  ;;  %v10539_v13 = vld [vmem:[%s11778_s15 + $0x6e0] ss:$144 sps:$4 sm:$0xff]  }
 0x242   : > { %7252 = vmatpush1.bf16.msra.mxu0 %v10442_v14  ;;  %6236 = vmatprep.subr.bf16.mxu1 %v10452_v15  ;;  %v10540_v14 = vld [vmem:[%s11786_s29 + $0x5c0] ss:$8 sps:$4 sm:$0xff]  }
 0x243   : > { %7253 = vmatprep.subr.bf16.mxu0 %v10456_v16  ;;  %v10543_v15 = vld [vmem:[%s11778_s15 + $0x728] ss:$144 sps:$4 sm:$0xff]  }
 0x244   : > { %6162 = vmatmul.mubr.bf16.gmra.mrb[4].mxu1 %v10449_v17  ;;  %v10544_v16 = vld [vmem:[%s11786_s29 + $0xec0] ss:$8 sps:$4 sm:$0xff]   ;;  %v10549_v17 = vld [vmem:[%s11786_s29 + $0x5d4] ss:$8 sps:$4 sm:$0xff]  }
 0x245   : > { %7179 = vmatmul.mubr.bf16.gmra.mrb[4].mxu0 %v10453_v19  ;;  %6237 = vmatpush1.bf16.msra.mxu1 %v10450_v18  ;;  %v10552_v18 = vld [vmem:[%s11786_s29 + $0xed4] ss:$8 sps:$4 sm:$0xff]  }
 0x246   : > { %7254 = vmatpush1.bf16.msra.mxu0 %v10454_v20  ;;  %6238 = vmatprep.subr.bf16.mxu1 %v10459_v21  ;;  %v10553_v19 = vld [vmem:[%s11778_s15 + $0x804] ss:$144 sps:$4 sm:$0xff]   ;;  %v10555_v20 = vld [vmem:[%s11778_s15 + $0x84c] ss:$144 sps:$4 sm:$0xff]   ;;  %v10547_v21 = vld [vmem:[%s11786_s29 + $0x5d0] ss:$8 sps:$4 sm:$0xff]  }
 0x247   : > { %7255 = vmatprep.subr.bf16.mxu0 %v10462_v22  ;;  %6171 = vmatprep.mubr.bf16.mxu1 %v10463_v23  ;;  %v10550_v22 = vld [vmem:[%s11786_s29 + $0xed0] ss:$8 sps:$4 sm:$0xff]   ;;  %v10560_v23 = vld [vmem:[%s11786_s29 + $0x5e4] ss:$8 sps:$4 sm:$0xff]  }
 0x248   : > { %7188 = vmatprep.mubr.bf16.mxu0 %v10465_v24  ;;  %v10564_v24 = vld [vmem:[%s11786_s29 + $0xee4] ss:$8 sps:$4 sm:$0xff]  }
 0x249   : > { %6239 = vmatpush1.bf16.msra.mxu1 %v10457_v25  ;;  %v10557_v25 = vld [vmem:[%s11778_s15 + $0x800] ss:$144 sps:$4 sm:$0xff]  }
 0x24a   : > { %7256 = vmatpush1.bf16.msra.mxu0 %v10460_v26  ;;  %6240 = vmatprep.subr.bf16.mxu1 %v10470_v27  ;;  %v10558_v26 = vld [vmem:[%s11786_s29 + $0x5e0] ss:$8 sps:$4 sm:$0xff]  }
 0x24b   : > { %7257 = vmatprep.subr.bf16.mxu0 %v10474_v28  ;;  %v10561_v27 = vld [vmem:[%s11778_s15 + $0x848] ss:$144 sps:$4 sm:$0xff]  }
 0x24c   : > { %6172 = vmatmul.mubr.bf16.gmra.mrb[8].mxu1 %v10467_v29  ;;  %v10562_v28 = vld [vmem:[%s11786_s29 + $0xee0] ss:$8 sps:$4 sm:$0xff]   ;;  %v10567_v29 = vld [vmem:[%s11786_s29 + $0x5f4] ss:$8 sps:$4 sm:$0xff]  }
 0x24d   : > { %7189 = vmatmul.mubr.bf16.gmra.mrb[8].mxu0 %v10471_v31  ;;  %6241 = vmatpush1.bf16.msra.mxu1 %v10468_v30  ;;  %v10570_v30 = vld [vmem:[%s11786_s29 + $0xef4] ss:$8 sps:$4 sm:$0xff]  }
 0x24e   : > { %7258 = vmatpush1.bf16.msra.mxu0 %v10472_v32  ;;  %6242 = vmatprep.subr.bf16.mxu1 %v10477_v33  ;;  %v10573_v31 = vld [vmem:[%s11778_s15 + $0x2c] ss:$144 sps:$4 sm:$0xff]   ;;  %v10576_v32 = vld [vmem:[%s11778_s15 + $0x74] ss:$144 sps:$4 sm:$0xff]   ;;  %v10565_v33 = vld [vmem:[%s11786_s29 + $0x5f0] ss:$8 sps:$4 sm:$0xff]  }
 0x24f   : > { %7259 = vmatprep.subr.bf16.mxu0 %v10480_v34  ;;  %6181 = vmatprep.mubr.bf16.mxu1 %v10481_v35  ;;  %v10568_v34 = vld [vmem:[%s11786_s29 + $0xef0] ss:$8 sps:$4 sm:$0xff]   ;;  %v10579_v35 = vld [vmem:[%s11786_s29 + $0x604] ss:$8 sps:$4 sm:$0xff]  }
 0x250   : > { %7198 = vmatprep.mubr.bf16.mxu0 %v10483_v36  ;;  %v10582_v36 = vld [vmem:[%s11786_s29 + $0xf04] ss:$8 sps:$4 sm:$0xff]  }
 0x251   : > { %6243 = vmatpush1.bf16.msra.mxu1 %v10475_v37  ;;  %v10571_v37 = vld [vmem:[%s11778_s15 + $0x28] ss:$144 sps:$4 sm:$0xff]  }
 0x252   : > { %7260 = vmatpush1.bf16.msra.mxu0 %v10478_v38  ;;  %6244 = vmatprep.subr.bf16.mxu1 %v10488_v39  ;;  %v10574_v38 = vld [vmem:[%s11778_s15 + $0x70] ss:$144 sps:$4 sm:$0xff]  }
 0x253   : > { %7261 = vmatprep.subr.bf16.mxu0 %v10492_v40  ;;  %v10577_v39 = vld [vmem:[%s11786_s29 + $0x600] ss:$8 sps:$4 sm:$0xff]  }
 0x254   : > { %6182 = vmatmul.mubr.bf16.gmra.mrb[12].mxu1 %v10485_v41  ;;  %v10580_v40 = vld [vmem:[%s11786_s29 + $0xf00] ss:$8 sps:$4 sm:$0xff]   ;;  %v10585_v41 = vld [vmem:[%s11786_s29 + $0x614] ss:$8 sps:$4 sm:$0xff]  }
 0x255   : > { %7199 = vmatmul.mubr.bf16.gmra.mrb[12].mxu0 %v10489_v43  ;;  %6245 = vmatpush1.bf16.msra.mxu1 %v10486_v42  ;;  %v10588_v42 = vld [vmem:[%s11786_s29 + $0xf14] ss:$8 sps:$4 sm:$0xff]  }
 0x256   : > { %7262 = vmatpush1.bf16.msra.mxu0 %v10490_v44  ;;  %6246 = vmatprep.subr.bf16.mxu1 %v10495_v45  ;;  %v10589_v43 = vld [vmem:[%s11778_s15 + $0x14c] ss:$144 sps:$4 sm:$0xff]   ;;  %v10591_v44 = vld [vmem:[%s11778_s15 + $0x194] ss:$144 sps:$4 sm:$0xff]   ;;  %v10583_v45 = vld [vmem:[%s11786_s29 + $0x610] ss:$8 sps:$4 sm:$0xff]  }
 0x257   : > { %7263 = vmatprep.subr.bf16.mxu0 %v10498_v46  ;;  %6191 = vmatprep.mubr.bf16.mxu1 %v10499_v47  ;;  %v10586_v46 = vld [vmem:[%s11786_s29 + $0xf10] ss:$8 sps:$4 sm:$0xff]   ;;  %v10596_v47 = vld [vmem:[%s11786_s29 + $0x624] ss:$8 sps:$4 sm:$0xff]  }
 0x258   : > { %7208 = vmatprep.mubr.bf16.mxu0 %v10501_v48  ;;  %v10600_v48 = vld [vmem:[%s11786_s29 + $0xf24] ss:$8 sps:$4 sm:$0xff]  }
 0x259   : > { %6247 = vmatpush1.bf16.msra.mxu1 %v10493_v49  ;;  %v10593_v49 = vld [vmem:[%s11778_s15 + $0x148] ss:$144 sps:$4 sm:$0xff]  }
 0x25a   : > { %7264 = vmatpush1.bf16.msra.mxu0 %v10496_v50  ;;  %6248 = vmatprep.subr.bf16.mxu1 %v10506_v51  ;;  %v10594_v50 = vld [vmem:[%s11786_s29 + $0x620] ss:$8 sps:$4 sm:$0xff]  }
 0x25b   : > { %7265 = vmatprep.subr.bf16.mxu0 %v10510_v52  ;;  %v10597_v51 = vld [vmem:[%s11778_s15 + $0x190] ss:$144 sps:$4 sm:$0xff]  }
 0x25c   : > { %6192 = vmatmul.mubr.bf16.gmra.mrb[16].mxu1 %v10503_v53  ;;  %v10598_v52 = vld [vmem:[%s11786_s29 + $0xf20] ss:$8 sps:$4 sm:$0xff]   ;;  %v10603_v53 = vld [vmem:[%s11786_s29 + $0x634] ss:$8 sps:$4 sm:$0xff]  }
 0x25d   : > { %7209 = vmatmul.mubr.bf16.gmra.mrb[16].mxu0 %v10507_v55  ;;  %6249 = vmatpush1.bf16.msra.mxu1 %v10504_v54  ;;  %v10606_v54 = vld [vmem:[%s11786_s29 + $0xf34] ss:$8 sps:$4 sm:$0xff]  }
 0x25e   : > { %7266 = vmatpush1.bf16.msra.mxu0 %v10508_v56  ;;  %6250 = vmatprep.subr.bf16.mxu1 %v10513_v57  ;;  %v10607_v55 = vld [vmem:[%s11778_s15 + $0x26c] ss:$144 sps:$4 sm:$0xff]   ;;  %v10609_v56 = vld [vmem:[%s11778_s15 + $0x2b4] ss:$144 sps:$4 sm:$0xff]   ;;  %v10601_v57 = vld [vmem:[%s11786_s29 + $0x630] ss:$8 sps:$4 sm:$0xff]  }
 0x25f   : > { %7267 = vmatprep.subr.bf16.mxu0 %v10516_v58  ;;  %6201 = vmatprep.mubr.bf16.mxu1 %v10517_v59  ;;  %v10604_v58 = vld [vmem:[%s11786_s29 + $0xf30] ss:$8 sps:$4 sm:$0xff]   ;;  %v10614_v59 = vld [vmem:[%s11786_s29 + $0x644] ss:$8 sps:$4 sm:$0xff]  }
 0x260   : > { %7218 = vmatprep.mubr.bf16.mxu0 %v10519_v60  ;;  %v10618_v60 = vld [vmem:[%s11786_s29 + $0xf44] ss:$8 sps:$4 sm:$0xff]  }
 0x261   : > { %6251 = vmatpush1.bf16.msra.mxu1 %v10511_v61  ;;  %v10611_v61 = vld [vmem:[%s11778_s15 + $0x268] ss:$144 sps:$4 sm:$0xff]  }
 0x262   : > { %7268 = vmatpush1.bf16.msra.mxu0 %v10514_v62  ;;  %6252 = vmatprep.subr.bf16.mxu1 %v10524_v63  ;;  %v10612_v62 = vld [vmem:[%s11786_s29 + $0x640] ss:$8 sps:$4 sm:$0xff]  }
 0x263   : > { %7269 = vmatprep.subr.bf16.mxu0 %v10528_v0  ;;  %v10615_v63 = vld [vmem:[%s11778_s15 + $0x2b0] ss:$144 sps:$4 sm:$0xff]  }
 0x264   : > { %6202 = vmatmul.mubr.bf16.gmra.mrb[20].mxu1 %v10521_v1  ;;  %v10616_v0 = vld [vmem:[%s11786_s29 + $0xf40] ss:$8 sps:$4 sm:$0xff]   ;;  %v10621_v1 = vld [vmem:[%s11786_s29 + $0x654] ss:$8 sps:$4 sm:$0xff]  }
 0x265   : > { %7219 = vmatmul.mubr.bf16.gmra.mrb[20].mxu0 %v10525_v3  ;;  %6253 = vmatpush1.bf16.msra.mxu1 %v10522_v2  ;;  %v10624_v2 = vld [vmem:[%s11786_s29 + $0xf54] ss:$8 sps:$4 sm:$0xff]  }
 0x266   : > { %7270 = vmatpush1.bf16.msra.mxu0 %v10526_v4  ;;  %6254 = vmatprep.subr.bf16.mxu1 %v10531_v5  ;;  %v10625_v3 = vld [vmem:[%s11778_s15 + $0x38c] ss:$144 sps:$4 sm:$0xff]   ;;  %v10627_v4 = vld [vmem:[%s11778_s15 + $0x3d4] ss:$144 sps:$4 sm:$0xff]   ;;  %v10619_v5 = vld [vmem:[%s11786_s29 + $0x650] ss:$8 sps:$4 sm:$0xff]  }
 0x267   : > { %7271 = vmatprep.subr.bf16.mxu0 %v10534_v6  ;;  %6211 = vmatprep.mubr.bf16.mxu1 %v10535_v7  ;;  %v10622_v6 = vld [vmem:[%s11786_s29 + $0xf50] ss:$8 sps:$4 sm:$0xff]   ;;  %v10632_v7 = vld [vmem:[%s11786_s29 + $0x664] ss:$8 sps:$4 sm:$0xff]  }
 0x268   : > { %7228 = vmatprep.mubr.bf16.mxu0 %v10537_v8  ;;  %v10636_v8 = vld [vmem:[%s11786_s29 + $0xf64] ss:$8 sps:$4 sm:$0xff]  }
 0x269   : > { %6255 = vmatpush1.bf16.msra.mxu1 %v10529_v9  ;;  %v10629_v9 = vld [vmem:[%s11778_s15 + $0x388] ss:$144 sps:$4 sm:$0xff]  }
 0x26a   : > { %7272 = vmatpush1.bf16.msra.mxu0 %v10532_v10  ;;  %6256 = vmatprep.subr.bf16.mxu1 %v10542_v11  ;;  %v10630_v10 = vld [vmem:[%s11786_s29 + $0x660] ss:$8 sps:$4 sm:$0xff]  }
 0x26b   : > { %7273 = vmatprep.subr.bf16.mxu0 %v10546_v12  ;;  %v10633_v11 = vld [vmem:[%s11778_s15 + $0x3d0] ss:$144 sps:$4 sm:$0xff]  }
 0x26c   : > { %6212 = vmatmul.mubr.bf16.gmra.mrb[24].mxu1 %v10539_v13  ;;  %v10634_v12 = vld [vmem:[%s11786_s29 + $0xf60] ss:$8 sps:$4 sm:$0xff]   ;;  %v10639_v13 = vld [vmem:[%s11786_s29 + $0x674] ss:$8 sps:$4 sm:$0xff]  }
 0x26d   : > { %7229 = vmatmul.mubr.bf16.gmra.mrb[24].mxu0 %v10543_v15  ;;  %6257 = vmatpush1.bf16.msra.mxu1 %v10540_v14  ;;  %v10642_v14 = vld [vmem:[%s11786_s29 + $0xf74] ss:$8 sps:$4 sm:$0xff]  }
 0x26e   : > { %7274 = vmatpush1.bf16.msra.mxu0 %v10544_v16  ;;  %6258 = vmatprep.subr.bf16.mxu1 %v10549_v17  ;;  %v10643_v15 = vld [vmem:[%s11778_s15 + $0x4ac] ss:$144 sps:$4 sm:$0xff]   ;;  %v10645_v16 = vld [vmem:[%s11778_s15 + $0x4f4] ss:$144 sps:$4 sm:$0xff]   ;;  %v10637_v17 = vld [vmem:[%s11786_s29 + $0x670] ss:$8 sps:$4 sm:$0xff]  }
 0x26f   : > { %7275 = vmatprep.subr.bf16.mxu0 %v10552_v18  ;;  %6221 = vmatprep.mubr.bf16.mxu1 %v10553_v19  ;;  %v10640_v18 = vld [vmem:[%s11786_s29 + $0xf70] ss:$8 sps:$4 sm:$0xff]   ;;  %v10650_v19 = vld [vmem:[%s11786_s29 + $0x684] ss:$8 sps:$4 sm:$0xff]  }
 0x270   : > { %7238 = vmatprep.mubr.bf16.mxu0 %v10555_v20  ;;  %v10654_v20 = vld [vmem:[%s11786_s29 + $0xf84] ss:$8 sps:$4 sm:$0xff]  }
 0x271   : > { %6259 = vmatpush1.bf16.msra.mxu1 %v10547_v21  ;;  %v10647_v21 = vld [vmem:[%s11778_s15 + $0x4a8] ss:$144 sps:$4 sm:$0xff]  }
 0x272   : > { %7276 = vmatpush1.bf16.msra.mxu0 %v10550_v22  ;;  %6260 = vmatprep.subr.bf16.mxu1 %v10560_v23  ;;  %v10648_v22 = vld [vmem:[%s11786_s29 + $0x680] ss:$8 sps:$4 sm:$0xff]  }
 0x273   : > { %7277 = vmatprep.subr.bf16.mxu0 %v10564_v24  ;;  %v10651_v23 = vld [vmem:[%s11778_s15 + $0x4f0] ss:$144 sps:$4 sm:$0xff]  }
 0x274   : > { %6222 = vmatmul.mubr.bf16.gmra.mrb[28].mxu1 %v10557_v25  ;;  %v10652_v24 = vld [vmem:[%s11786_s29 + $0xf80] ss:$8 sps:$4 sm:$0xff]   ;;  %v10657_v25 = vld [vmem:[%s11786_s29 + $0x694] ss:$8 sps:$4 sm:$0xff]  }
 0x275   : > { %7239 = vmatmul.mubr.bf16.gmra.mrb[28].mxu0 %v10561_v27  ;;  %6261 = vmatpush1.bf16.msra.mxu1 %v10558_v26  ;;  %v10660_v26 = vld [vmem:[%s11786_s29 + $0xf94] ss:$8 sps:$4 sm:$0xff]  }
 0x276   : > { %7278 = vmatpush1.bf16.msra.mxu0 %v10562_v28  ;;  %6262 = vmatprep.subr.bf16.mxu1 %v10567_v29  ;;  %v10661_v27 = vld [vmem:[%s11778_s15 + $0x5cc] ss:$144 sps:$4 sm:$0xff]   ;;  %v10663_v28 = vld [vmem:[%s11778_s15 + $0x614] ss:$144 sps:$4 sm:$0xff]   ;;  %v10655_v29 = vld [vmem:[%s11786_s29 + $0x690] ss:$8 sps:$4 sm:$0xff]  }
 0x277   : > { %7279 = vmatprep.subr.bf16.mxu0 %v10570_v30  ;;  %6264 = vmatprep.mubr.bf16.mxu1 %v10573_v31  ;;  %v10658_v30 = vld [vmem:[%s11786_s29 + $0xf90] ss:$8 sps:$4 sm:$0xff]   ;;  %v10668_v31 = vld [vmem:[%s11786_s29 + $0x6a4] ss:$8 sps:$4 sm:$0xff]  }
 0x278   : > { %7281 = vmatprep.mubr.bf16.mxu0 %v10576_v32  ;;  %v10672_v32 = vld [vmem:[%s11786_s29 + $0xfa4] ss:$8 sps:$4 sm:$0xff]  }
 0x279   : > { %6263 = vmatpush1.bf16.msra.mxu1 %v10565_v33  ;;  %v10665_v33 = vld [vmem:[%s11778_s15 + $0x5c8] ss:$144 sps:$4 sm:$0xff]  }
 0x27a   : > { %7280 = vmatpush1.bf16.msra.mxu0 %v10568_v34  ;;  %6345 = vmatprep.subr.bf16.mxu1 %v10579_v35  ;;  %v10666_v34 = vld [vmem:[%s11786_s29 + $0x6a0] ss:$8 sps:$4 sm:$0xff]  }
 0x27b   : > { %7362 = vmatprep.subr.bf16.mxu0 %v10582_v36  ;;  %v10669_v35 = vld [vmem:[%s11778_s15 + $0x610] ss:$144 sps:$4 sm:$0xff]  }
 0x27c   : > { %6265 = vmatmul.mubr.bf16.vlgmr.msra.gmra.mrb[0].mxu1 %v10571_v37  ;;  %v10670_v36 = vld [vmem:[%s11786_s29 + $0xfa0] ss:$8 sps:$4 sm:$0xff]   ;;  %v10675_v37 = vld [vmem:[%s11786_s29 + $0x6b4] ss:$8 sps:$4 sm:$0xff]  }
 0x27d   : > { %7282 = vmatmul.mubr.bf16.vlgmr.msra.gmra.mrb[0].mxu0 %v10574_v38  ;;  %6346 = vmatpush1.bf16.msra.mxu1 %v10577_v39  ;;  %v10678_v38 = vld [vmem:[%s11786_s29 + $0xfb4] ss:$8 sps:$4 sm:$0xff]  }
 0x27e   : > { %7363 = vmatpush1.bf16.msra.mxu0 %v10580_v40  ;;  %6347 = vmatprep.subr.bf16.mxu1 %v10585_v41  ;;  %v10679_v39 = vld [vmem:[%s11778_s15 + $0x6ec] ss:$144 sps:$4 sm:$0xff]   ;;  %v10681_v40 = vld [vmem:[%s11778_s15 + $0x734] ss:$144 sps:$4 sm:$0xff]   ;;  %v10673_v41 = vld [vmem:[%s11786_s29 + $0x6b0] ss:$8 sps:$4 sm:$0xff]  }
 0x27f   : > { %7364 = vmatprep.subr.bf16.mxu0 %v10588_v42  ;;  %6274 = vmatprep.mubr.bf16.mxu1 %v10589_v43  ;;  %v10676_v42 = vld [vmem:[%s11786_s29 + $0xfb0] ss:$8 sps:$4 sm:$0xff]   ;;  %v10686_v43 = vld [vmem:[%s11786_s29 + $0x6c4] ss:$8 sps:$4 sm:$0xff]  }
 0x280   : > { %7291 = vmatprep.mubr.bf16.mxu0 %v10591_v44  ;;  %v10690_v44 = vld [vmem:[%s11786_s29 + $0xfc4] ss:$8 sps:$4 sm:$0xff]  }
 0x281   : > { %6348 = vmatpush1.bf16.msra.mxu1 %v10583_v45  ;;  %v10683_v45 = vld [vmem:[%s11778_s15 + $0x6e8] ss:$144 sps:$4 sm:$0xff]  }
 0x282   : > { %7365 = vmatpush1.bf16.msra.mxu0 %v10586_v46  ;;  %6349 = vmatprep.subr.bf16.mxu1 %v10596_v47  ;;  %v10684_v46 = vld [vmem:[%s11786_s29 + $0x6c0] ss:$8 sps:$4 sm:$0xff]  }
 0x283   : > { %7366 = vmatprep.subr.bf16.mxu0 %v10600_v48  ;;  %v10687_v47 = vld [vmem:[%s11778_s15 + $0x730] ss:$144 sps:$4 sm:$0xff]  }
 0x284   : > { %6275 = vmatmul.mubr.bf16.gmra.mrb[4].mxu1 %v10593_v49  ;;  %v10688_v48 = vld [vmem:[%s11786_s29 + $0xfc0] ss:$8 sps:$4 sm:$0xff]   ;;  %v10693_v49 = vld [vmem:[%s11786_s29 + $0x6d4] ss:$8 sps:$4 sm:$0xff]  }
 0x285   : > { %7292 = vmatmul.mubr.bf16.gmra.mrb[4].mxu0 %v10597_v51  ;;  %6350 = vmatpush1.bf16.msra.mxu1 %v10594_v50  ;;  %v10696_v50 = vld [vmem:[%s11786_s29 + $0xfd4] ss:$8 sps:$4 sm:$0xff]  }
 0x286   : > { %7367 = vmatpush1.bf16.msra.mxu0 %v10598_v52  ;;  %6351 = vmatprep.subr.bf16.mxu1 %v10603_v53  ;;  %v10697_v51 = vld [vmem:[%s11778_s15 + $0x80c] ss:$144 sps:$4 sm:$0xff]   ;;  %v10699_v52 = vld [vmem:[%s11778_s15 + $0x854] ss:$144 sps:$4 sm:$0xff]   ;;  %v10691_v53 = vld [vmem:[%s11786_s29 + $0x6d0] ss:$8 sps:$4 sm:$0xff]  }
 0x287   : > { %7368 = vmatprep.subr.bf16.mxu0 %v10606_v54  ;;  %6284 = vmatprep.mubr.bf16.mxu1 %v10607_v55  ;;  %v10694_v54 = vld [vmem:[%s11786_s29 + $0xfd0] ss:$8 sps:$4 sm:$0xff]   ;;  %v10704_v55 = vld [vmem:[%s11786_s29 + $0x6e4] ss:$8 sps:$4 sm:$0xff]  }
 0x288   : > { %7301 = vmatprep.mubr.bf16.mxu0 %v10609_v56  ;;  %v10708_v56 = vld [vmem:[%s11786_s29 + $0xfe4] ss:$8 sps:$4 sm:$0xff]  }
 0x289   : > { %6352 = vmatpush1.bf16.msra.mxu1 %v10601_v57  ;;  %v10701_v57 = vld [vmem:[%s11778_s15 + $0x808] ss:$144 sps:$4 sm:$0xff]  }
 0x28a   : > { %7369 = vmatpush1.bf16.msra.mxu0 %v10604_v58  ;;  %6353 = vmatprep.subr.bf16.mxu1 %v10614_v59  ;;  %v10702_v58 = vld [vmem:[%s11786_s29 + $0x6e0] ss:$8 sps:$4 sm:$0xff]  }
 0x28b   : > { %7370 = vmatprep.subr.bf16.mxu0 %v10618_v60  ;;  %v10705_v59 = vld [vmem:[%s11778_s15 + $0x850] ss:$144 sps:$4 sm:$0xff]  }
 0x28c   : > { %6285 = vmatmul.mubr.bf16.gmra.mrb[8].mxu1 %v10611_v61  ;;  %v10706_v60 = vld [vmem:[%s11786_s29 + $0xfe0] ss:$8 sps:$4 sm:$0xff]   ;;  %v10711_v61 = vld [vmem:[%s11786_s29 + $0x6f4] ss:$8 sps:$4 sm:$0xff]  }
 0x28d   : > { %7302 = vmatmul.mubr.bf16.gmra.mrb[8].mxu0 %v10615_v63  ;;  %6354 = vmatpush1.bf16.msra.mxu1 %v10612_v62  ;;  %v10714_v62 = vld [vmem:[%s11786_s29 + $0xff4] ss:$8 sps:$4 sm:$0xff]  }
 0x28e   : > { %7371 = vmatpush1.bf16.msra.mxu0 %v10616_v0  ;;  %6355 = vmatprep.subr.bf16.mxu1 %v10621_v1  ;;  %v10717_v63 = vld [vmem:[%s11778_s15 + $0x34] ss:$144 sps:$4 sm:$0xff]   ;;  %v10720_v0 = vld [vmem:[%s11778_s15 + $0x7c] ss:$144 sps:$4 sm:$0xff]   ;;  %v10709_v1 = vld [vmem:[%s11786_s29 + $0x6f0] ss:$8 sps:$4 sm:$0xff]  }
 0x28f   : > { %7372 = vmatprep.subr.bf16.mxu0 %v10624_v2  ;;  %6294 = vmatprep.mubr.bf16.mxu1 %v10625_v3  ;;  %v10712_v2 = vld [vmem:[%s11786_s29 + $0xff0] ss:$8 sps:$4 sm:$0xff]   ;;  %v10723_v3 = vld [vmem:[%s11786_s29 + $0x704] ss:$8 sps:$4 sm:$0xff]  }
 0x290   : > { %7311 = vmatprep.mubr.bf16.mxu0 %v10627_v4  ;;  %v10726_v4 = vld [vmem:[%s11786_s29 + $0x1004] ss:$8 sps:$4 sm:$0xff]  }
 0x291   : > { %6356 = vmatpush1.bf16.msra.mxu1 %v10619_v5  ;;  %v10715_v5 = vld [vmem:[%s11778_s15 + $0x30] ss:$144 sps:$4 sm:$0xff]  }
 0x292   : > { %7373 = vmatpush1.bf16.msra.mxu0 %v10622_v6  ;;  %6357 = vmatprep.subr.bf16.mxu1 %v10632_v7  ;;  %v10718_v6 = vld [vmem:[%s11778_s15 + $0x78] ss:$144 sps:$4 sm:$0xff]  }
 0x293   : > { %7374 = vmatprep.subr.bf16.mxu0 %v10636_v8  ;;  %v10721_v7 = vld [vmem:[%s11786_s29 + $0x700] ss:$8 sps:$4 sm:$0xff]  }
 0x294   : > { %6295 = vmatmul.mubr.bf16.gmra.mrb[12].mxu1 %v10629_v9  ;;  %v10724_v8 = vld [vmem:[%s11786_s29 + $0x1000] ss:$8 sps:$4 sm:$0xff]   ;;  %v10729_v9 = vld [vmem:[%s11786_s29 + $0x714] ss:$8 sps:$4 sm:$0xff]  }
 0x295   : > { %7312 = vmatmul.mubr.bf16.gmra.mrb[12].mxu0 %v10633_v11  ;;  %6358 = vmatpush1.bf16.msra.mxu1 %v10630_v10  ;;  %v10732_v10 = vld [vmem:[%s11786_s29 + $0x1014] ss:$8 sps:$4 sm:$0xff]  }
 0x296   : > { %7375 = vmatpush1.bf16.msra.mxu0 %v10634_v12  ;;  %6359 = vmatprep.subr.bf16.mxu1 %v10639_v13  ;;  %v10733_v11 = vld [vmem:[%s11778_s15 + $0x154] ss:$144 sps:$4 sm:$0xff]   ;;  %v10735_v12 = vld [vmem:[%s11778_s15 + $0x19c] ss:$144 sps:$4 sm:$0xff]   ;;  %v10727_v13 = vld [vmem:[%s11786_s29 + $0x710] ss:$8 sps:$4 sm:$0xff]  }
 0x297   : > { %7376 = vmatprep.subr.bf16.mxu0 %v10642_v14  ;;  %6304 = vmatprep.mubr.bf16.mxu1 %v10643_v15  ;;  %v10730_v14 = vld [vmem:[%s11786_s29 + $0x1010] ss:$8 sps:$4 sm:$0xff]   ;;  %v10740_v15 = vld [vmem:[%s11786_s29 + $0x724] ss:$8 sps:$4 sm:$0xff]  }
 0x298   : > { %7321 = vmatprep.mubr.bf16.mxu0 %v10645_v16  ;;  %v10744_v16 = vld [vmem:[%s11786_s29 + $0x1024] ss:$8 sps:$4 sm:$0xff]  }
 0x299   : > { %6360 = vmatpush1.bf16.msra.mxu1 %v10637_v17  ;;  %v10737_v17 = vld [vmem:[%s11778_s15 + $0x150] ss:$144 sps:$4 sm:$0xff]  }
 0x29a   : > { %7377 = vmatpush1.bf16.msra.mxu0 %v10640_v18  ;;  %6361 = vmatprep.subr.bf16.mxu1 %v10650_v19  ;;  %v10738_v18 = vld [vmem:[%s11786_s29 + $0x720] ss:$8 sps:$4 sm:$0xff]  }
 0x29b   : > { %7378 = vmatprep.subr.bf16.mxu0 %v10654_v20  ;;  %v10741_v19 = vld [vmem:[%s11778_s15 + $0x198] ss:$144 sps:$4 sm:$0xff]  }
 0x29c   : > { %6305 = vmatmul.mubr.bf16.gmra.mrb[16].mxu1 %v10647_v21  ;;  %v10742_v20 = vld [vmem:[%s11786_s29 + $0x1020] ss:$8 sps:$4 sm:$0xff]   ;;  %v10747_v21 = vld [vmem:[%s11786_s29 + $0x734] ss:$8 sps:$4 sm:$0xff]  }
 0x29d   : > { %7322 = vmatmul.mubr.bf16.gmra.mrb[16].mxu0 %v10651_v23  ;;  %6362 = vmatpush1.bf16.msra.mxu1 %v10648_v22  ;;  %v10750_v22 = vld [vmem:[%s11786_s29 + $0x1034] ss:$8 sps:$4 sm:$0xff]  }
 0x29e   : > { %7379 = vmatpush1.bf16.msra.mxu0 %v10652_v24  ;;  %6363 = vmatprep.subr.bf16.mxu1 %v10657_v25  ;;  %v10751_v23 = vld [vmem:[%s11778_s15 + $0x274] ss:$144 sps:$4 sm:$0xff]   ;;  %v10753_v24 = vld [vmem:[%s11778_s15 + $0x2bc] ss:$144 sps:$4 sm:$0xff]   ;;  %v10745_v25 = vld [vmem:[%s11786_s29 + $0x730] ss:$8 sps:$4 sm:$0xff]  }
 0x29f   : > { %7380 = vmatprep.subr.bf16.mxu0 %v10660_v26  ;;  %6314 = vmatprep.mubr.bf16.mxu1 %v10661_v27  ;;  %v10748_v26 = vld [vmem:[%s11786_s29 + $0x1030] ss:$8 sps:$4 sm:$0xff]   ;;  %v10758_v27 = vld [vmem:[%s11786_s29 + $0x744] ss:$8 sps:$4 sm:$0xff]  }
 0x2a0   : > { %7331 = vmatprep.mubr.bf16.mxu0 %v10663_v28  ;;  %v10762_v28 = vld [vmem:[%s11786_s29 + $0x1044] ss:$8 sps:$4 sm:$0xff]  }
 0x2a1   : > { %6364 = vmatpush1.bf16.msra.mxu1 %v10655_v29  ;;  %v10755_v29 = vld [vmem:[%s11778_s15 + $0x270] ss:$144 sps:$4 sm:$0xff]  }
 0x2a2   : > { %7381 = vmatpush1.bf16.msra.mxu0 %v10658_v30  ;;  %6365 = vmatprep.subr.bf16.mxu1 %v10668_v31  ;;  %v10756_v30 = vld [vmem:[%s11786_s29 + $0x740] ss:$8 sps:$4 sm:$0xff]  }
 0x2a3   : > { %7382 = vmatprep.subr.bf16.mxu0 %v10672_v32  ;;  %v10759_v31 = vld [vmem:[%s11778_s15 + $0x2b8] ss:$144 sps:$4 sm:$0xff]  }
 0x2a4   : > { %6315 = vmatmul.mubr.bf16.gmra.mrb[20].mxu1 %v10665_v33  ;;  %v10760_v32 = vld [vmem:[%s11786_s29 + $0x1040] ss:$8 sps:$4 sm:$0xff]   ;;  %v10765_v33 = vld [vmem:[%s11786_s29 + $0x754] ss:$8 sps:$4 sm:$0xff]  }
 0x2a5   : > { %7332 = vmatmul.mubr.bf16.gmra.mrb[20].mxu0 %v10669_v35  ;;  %6366 = vmatpush1.bf16.msra.mxu1 %v10666_v34  ;;  %v10768_v34 = vld [vmem:[%s11786_s29 + $0x1054] ss:$8 sps:$4 sm:$0xff]  }
 0x2a6   : > { %7383 = vmatpush1.bf16.msra.mxu0 %v10670_v36  ;;  %6367 = vmatprep.subr.bf16.mxu1 %v10675_v37  ;;  %v10769_v35 = vld [vmem:[%s11778_s15 + $0x394] ss:$144 sps:$4 sm:$0xff]   ;;  %v10771_v36 = vld [vmem:[%s11778_s15 + $0x3dc] ss:$144 sps:$4 sm:$0xff]   ;;  %v10763_v37 = vld [vmem:[%s11786_s29 + $0x750] ss:$8 sps:$4 sm:$0xff]  }
 0x2a7   : > { %7384 = vmatprep.subr.bf16.mxu0 %v10678_v38  ;;  %6324 = vmatprep.mubr.bf16.mxu1 %v10679_v39  ;;  %v10766_v38 = vld [vmem:[%s11786_s29 + $0x1050] ss:$8 sps:$4 sm:$0xff]   ;;  %v10776_v39 = vld [vmem:[%s11786_s29 + $0x764] ss:$8 sps:$4 sm:$0xff]  }
 0x2a8   : > { %7341 = vmatprep.mubr.bf16.mxu0 %v10681_v40  ;;  %v10780_v40 = vld [vmem:[%s11786_s29 + $0x1064] ss:$8 sps:$4 sm:$0xff]  }
 0x2a9   : > { %6368 = vmatpush1.bf16.msra.mxu1 %v10673_v41  ;;  %v10773_v41 = vld [vmem:[%s11778_s15 + $0x390] ss:$144 sps:$4 sm:$0xff]  }
 0x2aa   : > { %7385 = vmatpush1.bf16.msra.mxu0 %v10676_v42  ;;  %6369 = vmatprep.subr.bf16.mxu1 %v10686_v43  ;;  %v10774_v42 = vld [vmem:[%s11786_s29 + $0x760] ss:$8 sps:$4 sm:$0xff]  }
 0x2ab   : > { %7386 = vmatprep.subr.bf16.mxu0 %v10690_v44  ;;  %v10777_v43 = vld [vmem:[%s11778_s15 + $0x3d8] ss:$144 sps:$4 sm:$0xff]  }
 0x2ac   : > { %6325 = vmatmul.mubr.bf16.gmra.mrb[24].mxu1 %v10683_v45  ;;  %v10778_v44 = vld [vmem:[%s11786_s29 + $0x1060] ss:$8 sps:$4 sm:$0xff]   ;;  %v10783_v45 = vld [vmem:[%s11786_s29 + $0x774] ss:$8 sps:$4 sm:$0xff]  }
 0x2ad   : > { %7342 = vmatmul.mubr.bf16.gmra.mrb[24].mxu0 %v10687_v47  ;;  %6370 = vmatpush1.bf16.msra.mxu1 %v10684_v46  ;;  %v10786_v46 = vld [vmem:[%s11786_s29 + $0x1074] ss:$8 sps:$4 sm:$0xff]  }
 0x2ae   : > { %7387 = vmatpush1.bf16.msra.mxu0 %v10688_v48  ;;  %6371 = vmatprep.subr.bf16.mxu1 %v10693_v49  ;;  %v10787_v47 = vld [vmem:[%s11778_s15 + $0x4b4] ss:$144 sps:$4 sm:$0xff]   ;;  %v10789_v48 = vld [vmem:[%s11778_s15 + $0x4fc] ss:$144 sps:$4 sm:$0xff]   ;;  %v10781_v49 = vld [vmem:[%s11786_s29 + $0x770] ss:$8 sps:$4 sm:$0xff]  }
 0x2af   : > { %7388 = vmatprep.subr.bf16.mxu0 %v10696_v50  ;;  %6334 = vmatprep.mubr.bf16.mxu1 %v10697_v51  ;;  %v10784_v50 = vld [vmem:[%s11786_s29 + $0x1070] ss:$8 sps:$4 sm:$0xff]   ;;  %v10794_v51 = vld [vmem:[%s11786_s29 + $0x784] ss:$8 sps:$4 sm:$0xff]  }
 0x2b0   : > { %7351 = vmatprep.mubr.bf16.mxu0 %v10699_v52  ;;  %v10798_v52 = vld [vmem:[%s11786_s29 + $0x1084] ss:$8 sps:$4 sm:$0xff]  }
 0x2b1   : > { %6372 = vmatpush1.bf16.msra.mxu1 %v10691_v53  ;;  %v10791_v53 = vld [vmem:[%s11778_s15 + $0x4b0] ss:$144 sps:$4 sm:$0xff]  }
 0x2b2   : > { %7389 = vmatpush1.bf16.msra.mxu0 %v10694_v54  ;;  %6373 = vmatprep.subr.bf16.mxu1 %v10704_v55  ;;  %v10792_v54 = vld [vmem:[%s11786_s29 + $0x780] ss:$8 sps:$4 sm:$0xff]  }
 0x2b3   : > { %7390 = vmatprep.subr.bf16.mxu0 %v10708_v56  ;;  %v10795_v55 = vld [vmem:[%s11778_s15 + $0x4f8] ss:$144 sps:$4 sm:$0xff]  }
 0x2b4   : > { %6335 = vmatmul.mubr.bf16.gmra.mrb[28].mxu1 %v10701_v57  ;;  %v10796_v56 = vld [vmem:[%s11786_s29 + $0x1080] ss:$8 sps:$4 sm:$0xff]   ;;  %v10801_v57 = vld [vmem:[%s11786_s29 + $0x794] ss:$8 sps:$4 sm:$0xff]  }
 0x2b5   : > { %7352 = vmatmul.mubr.bf16.gmra.mrb[28].mxu0 %v10705_v59  ;;  %6374 = vmatpush1.bf16.msra.mxu1 %v10702_v58  ;;  %v10804_v58 = vld [vmem:[%s11786_s29 + $0x1094] ss:$8 sps:$4 sm:$0xff]  }
 0x2b6   : > { %7391 = vmatpush1.bf16.msra.mxu0 %v10706_v60  ;;  %6375 = vmatprep.subr.bf16.mxu1 %v10711_v61  ;;  %v10805_v59 = vld [vmem:[%s11778_s15 + $0x5d4] ss:$144 sps:$4 sm:$0xff]   ;;  %v10807_v60 = vld [vmem:[%s11778_s15 + $0x61c] ss:$144 sps:$4 sm:$0xff]   ;;  %v10799_v61 = vld [vmem:[%s11786_s29 + $0x790] ss:$8 sps:$4 sm:$0xff]  }
 0x2b7   : > { %7392 = vmatprep.subr.bf16.mxu0 %v10714_v62  ;;  %6377 = vmatprep.mubr.bf16.mxu1 %v10717_v63  ;;  %v10802_v62 = vld [vmem:[%s11786_s29 + $0x1090] ss:$8 sps:$4 sm:$0xff]   ;;  %v10812_v63 = vld [vmem:[%s11786_s29 + $0x7a4] ss:$8 sps:$4 sm:$0xff]  }
 0x2b8   : > { %7394 = vmatprep.mubr.bf16.mxu0 %v10720_v0  ;;  %v10816_v0 = vld [vmem:[%s11786_s29 + $0x10a4] ss:$8 sps:$4 sm:$0xff]  }
 0x2b9   : > { %6376 = vmatpush1.bf16.msra.mxu1 %v10709_v1  ;;  %v10809_v1 = vld [vmem:[%s11778_s15 + $0x5d0] ss:$144 sps:$4 sm:$0xff]  }
 0x2ba   : > { %7393 = vmatpush1.bf16.msra.mxu0 %v10712_v2  ;;  %6458 = vmatprep.subr.bf16.mxu1 %v10723_v3  ;;  %v10810_v2 = vld [vmem:[%s11786_s29 + $0x7a0] ss:$8 sps:$4 sm:$0xff]  }
 0x2bb   : > { %7475 = vmatprep.subr.bf16.mxu0 %v10726_v4  ;;  %v10813_v3 = vld [vmem:[%s11778_s15 + $0x618] ss:$144 sps:$4 sm:$0xff]  }
 0x2bc   : > { %6378 = vmatmul.mubr.bf16.vlgmr.msra.gmra.mrb[0].mxu1 %v10715_v5  ;;  %v10814_v4 = vld [vmem:[%s11786_s29 + $0x10a0] ss:$8 sps:$4 sm:$0xff]   ;;  %v10819_v5 = vld [vmem:[%s11786_s29 + $0x7b4] ss:$8 sps:$4 sm:$0xff]  }
 0x2bd   : > { %7395 = vmatmul.mubr.bf16.vlgmr.msra.gmra.mrb[0].mxu0 %v10718_v6  ;;  %6459 = vmatpush1.bf16.msra.mxu1 %v10721_v7  ;;  %v10822_v6 = vld [vmem:[%s11786_s29 + $0x10b4] ss:$8 sps:$4 sm:$0xff]  }
 0x2be   : > { %7476 = vmatpush1.bf16.msra.mxu0 %v10724_v8  ;;  %6460 = vmatprep.subr.bf16.mxu1 %v10729_v9  ;;  %v10823_v7 = vld [vmem:[%s11778_s15 + $0x6f4] ss:$144 sps:$4 sm:$0xff]   ;;  %v10825_v8 = vld [vmem:[%s11778_s15 + $0x73c] ss:$144 sps:$4 sm:$0xff]   ;;  %v10817_v9 = vld [vmem:[%s11786_s29 + $0x7b0] ss:$8 sps:$4 sm:$0xff]  }
 0x2bf   : > { %7477 = vmatprep.subr.bf16.mxu0 %v10732_v10  ;;  %6387 = vmatprep.mubr.bf16.mxu1 %v10733_v11  ;;  %v10820_v10 = vld [vmem:[%s11786_s29 + $0x10b0] ss:$8 sps:$4 sm:$0xff]   ;;  %v10830_v11 = vld [vmem:[%s11786_s29 + $0x7c4] ss:$8 sps:$4 sm:$0xff]  }
 0x2c0   : > { %7404 = vmatprep.mubr.bf16.mxu0 %v10735_v12  ;;  %v10834_v12 = vld [vmem:[%s11786_s29 + $0x10c4] ss:$8 sps:$4 sm:$0xff]  }
 0x2c1   : > { %6461 = vmatpush1.bf16.msra.mxu1 %v10727_v13  ;;  %v10827_v13 = vld [vmem:[%s11778_s15 + $0x6f0] ss:$144 sps:$4 sm:$0xff]  }
 0x2c2   : > { %7478 = vmatpush1.bf16.msra.mxu0 %v10730_v14  ;;  %6462 = vmatprep.subr.bf16.mxu1 %v10740_v15  ;;  %v10828_v14 = vld [vmem:[%s11786_s29 + $0x7c0] ss:$8 sps:$4 sm:$0xff]  }
 0x2c3   : > { %7479 = vmatprep.subr.bf16.mxu0 %v10744_v16  ;;  %v10831_v15 = vld [vmem:[%s11778_s15 + $0x738] ss:$144 sps:$4 sm:$0xff]  }
 0x2c4   : > { %6388 = vmatmul.mubr.bf16.gmra.mrb[4].mxu1 %v10737_v17  ;;  %v10832_v16 = vld [vmem:[%s11786_s29 + $0x10c0] ss:$8 sps:$4 sm:$0xff]   ;;  %v10837_v17 = vld [vmem:[%s11786_s29 + $0x7d4] ss:$8 sps:$4 sm:$0xff]  }
 0x2c5   : > { %7405 = vmatmul.mubr.bf16.gmra.mrb[4].mxu0 %v10741_v19  ;;  %6463 = vmatpush1.bf16.msra.mxu1 %v10738_v18  ;;  %v10840_v18 = vld [vmem:[%s11786_s29 + $0x10d4] ss:$8 sps:$4 sm:$0xff]  }
 0x2c6   : > { %7480 = vmatpush1.bf16.msra.mxu0 %v10742_v20  ;;  %6464 = vmatprep.subr.bf16.mxu1 %v10747_v21  ;;  %v10841_v19 = vld [vmem:[%s11778_s15 + $0x814] ss:$144 sps:$4 sm:$0xff]   ;;  %v10843_v20 = vld [vmem:[%s11778_s15 + $0x85c] ss:$144 sps:$4 sm:$0xff]   ;;  %v10835_v21 = vld [vmem:[%s11786_s29 + $0x7d0] ss:$8 sps:$4 sm:$0xff]  }
 0x2c7   : > { %7481 = vmatprep.subr.bf16.mxu0 %v10750_v22  ;;  %6397 = vmatprep.mubr.bf16.mxu1 %v10751_v23  ;;  %v10838_v22 = vld [vmem:[%s11786_s29 + $0x10d0] ss:$8 sps:$4 sm:$0xff]   ;;  %v10848_v23 = vld [vmem:[%s11786_s29 + $0x7e4] ss:$8 sps:$4 sm:$0xff]  }
 0x2c8   : > { %7414 = vmatprep.mubr.bf16.mxu0 %v10753_v24  ;;  %v10852_v24 = vld [vmem:[%s11786_s29 + $0x10e4] ss:$8 sps:$4 sm:$0xff]  }
 0x2c9   : > { %6465 = vmatpush1.bf16.msra.mxu1 %v10745_v25  ;;  %v10845_v25 = vld [vmem:[%s11778_s15 + $0x810] ss:$144 sps:$4 sm:$0xff]  }
 0x2ca   : > { %7482 = vmatpush1.bf16.msra.mxu0 %v10748_v26  ;;  %6466 = vmatprep.subr.bf16.mxu1 %v10758_v27  ;;  %v10846_v26 = vld [vmem:[%s11786_s29 + $0x7e0] ss:$8 sps:$4 sm:$0xff]  }
 0x2cb   : > { %7483 = vmatprep.subr.bf16.mxu0 %v10762_v28  ;;  %v10849_v27 = vld [vmem:[%s11778_s15 + $0x858] ss:$144 sps:$4 sm:$0xff]  }
 0x2cc   : > { %6398 = vmatmul.mubr.bf16.gmra.mrb[8].mxu1 %v10755_v29  ;;  %v10850_v28 = vld [vmem:[%s11786_s29 + $0x10e0] ss:$8 sps:$4 sm:$0xff]   ;;  %v10855_v29 = vld [vmem:[%s11786_s29 + $0x7f4] ss:$8 sps:$4 sm:$0xff]  }
 0x2cd   : > { %7415 = vmatmul.mubr.bf16.gmra.mrb[8].mxu0 %v10759_v31  ;;  %6467 = vmatpush1.bf16.msra.mxu1 %v10756_v30  ;;  %v10858_v30 = vld [vmem:[%s11786_s29 + $0x10f4] ss:$8 sps:$4 sm:$0xff]  }
 0x2ce   : > { %7484 = vmatpush1.bf16.msra.mxu0 %v10760_v32  ;;  %6468 = vmatprep.subr.bf16.mxu1 %v10765_v33  ;;  %v10861_v31 = vld [vmem:[%s11778_s15 + $0x3c] ss:$144 sps:$4 sm:$0xff]   ;;  %v10864_v32 = vld [vmem:[%s11778_s15 + $0x84] ss:$144 sps:$4 sm:$0xff]   ;;  %v10853_v33 = vld [vmem:[%s11786_s29 + $0x7f0] ss:$8 sps:$4 sm:$0xff]  }
 0x2cf   : > { %7485 = vmatprep.subr.bf16.mxu0 %v10768_v34  ;;  %6407 = vmatprep.mubr.bf16.mxu1 %v10769_v35  ;;  %v10856_v34 = vld [vmem:[%s11786_s29 + $0x10f0] ss:$8 sps:$4 sm:$0xff]   ;;  %v10867_v35 = vld [vmem:[%s11786_s29 + $0x804] ss:$8 sps:$4 sm:$0xff]  }
 0x2d0   : > { %7424 = vmatprep.mubr.bf16.mxu0 %v10771_v36  ;;  %v10870_v36 = vld [vmem:[%s11786_s29 + $0x1104] ss:$8 sps:$4 sm:$0xff]  }
 0x2d1   : > { %6469 = vmatpush1.bf16.msra.mxu1 %v10763_v37  ;;  %v10859_v37 = vld [vmem:[%s11778_s15 + $0x38] ss:$144 sps:$4 sm:$0xff]  }
 0x2d2   : > { %7486 = vmatpush1.bf16.msra.mxu0 %v10766_v38  ;;  %6470 = vmatprep.subr.bf16.mxu1 %v10776_v39  ;;  %v10862_v38 = vld [vmem:[%s11778_s15 + $0x80] ss:$144 sps:$4 sm:$0xff]  }
 0x2d3   : > { %7487 = vmatprep.subr.bf16.mxu0 %v10780_v40  ;;  %v10865_v39 = vld [vmem:[%s11786_s29 + $0x800] ss:$8 sps:$4 sm:$0xff]  }
 0x2d4   : > { %6408 = vmatmul.mubr.bf16.gmra.mrb[12].mxu1 %v10773_v41  ;;  %v10868_v40 = vld [vmem:[%s11786_s29 + $0x1100] ss:$8 sps:$4 sm:$0xff]   ;;  %v10873_v41 = vld [vmem:[%s11786_s29 + $0x814] ss:$8 sps:$4 sm:$0xff]  }
 0x2d5   : > { %7425 = vmatmul.mubr.bf16.gmra.mrb[12].mxu0 %v10777_v43  ;;  %6471 = vmatpush1.bf16.msra.mxu1 %v10774_v42  ;;  %v10876_v42 = vld [vmem:[%s11786_s29 + $0x1114] ss:$8 sps:$4 sm:$0xff]  }
 0x2d6   : > { %7488 = vmatpush1.bf16.msra.mxu0 %v10778_v44  ;;  %6472 = vmatprep.subr.bf16.mxu1 %v10783_v45  ;;  %v10877_v43 = vld [vmem:[%s11778_s15 + $0x15c] ss:$144 sps:$4 sm:$0xff]   ;;  %v10879_v44 = vld [vmem:[%s11778_s15 + $0x1a4] ss:$144 sps:$4 sm:$0xff]   ;;  %v10871_v45 = vld [vmem:[%s11786_s29 + $0x810] ss:$8 sps:$4 sm:$0xff]  }
 0x2d7   : > { %7489 = vmatprep.subr.bf16.mxu0 %v10786_v46  ;;  %6417 = vmatprep.mubr.bf16.mxu1 %v10787_v47  ;;  %v10874_v46 = vld [vmem:[%s11786_s29 + $0x1110] ss:$8 sps:$4 sm:$0xff]   ;;  %v10884_v47 = vld [vmem:[%s11786_s29 + $0x824] ss:$8 sps:$4 sm:$0xff]  }
 0x2d8   : > { %7434 = vmatprep.mubr.bf16.mxu0 %v10789_v48  ;;  %v10888_v48 = vld [vmem:[%s11786_s29 + $0x1124] ss:$8 sps:$4 sm:$0xff]  }
 0x2d9   : > { %6473 = vmatpush1.bf16.msra.mxu1 %v10781_v49  ;;  %v10881_v49 = vld [vmem:[%s11778_s15 + $0x158] ss:$144 sps:$4 sm:$0xff]  }
 0x2da   : > { %7490 = vmatpush1.bf16.msra.mxu0 %v10784_v50  ;;  %6474 = vmatprep.subr.bf16.mxu1 %v10794_v51  ;;  %v10882_v50 = vld [vmem:[%s11786_s29 + $0x820] ss:$8 sps:$4 sm:$0xff]  }
 0x2db   : > { %7491 = vmatprep.subr.bf16.mxu0 %v10798_v52  ;;  %v10885_v51 = vld [vmem:[%s11778_s15 + $0x1a0] ss:$144 sps:$4 sm:$0xff]  }
 0x2dc   : > { %6418 = vmatmul.mubr.bf16.gmra.mrb[16].mxu1 %v10791_v53  ;;  %v10886_v52 = vld [vmem:[%s11786_s29 + $0x1120] ss:$8 sps:$4 sm:$0xff]   ;;  %v10891_v53 = vld [vmem:[%s11786_s29 + $0x834] ss:$8 sps:$4 sm:$0xff]  }
 0x2dd   : > { %7435 = vmatmul.mubr.bf16.gmra.mrb[16].mxu0 %v10795_v55  ;;  %6475 = vmatpush1.bf16.msra.mxu1 %v10792_v54  ;;  %v10894_v54 = vld [vmem:[%s11786_s29 + $0x1134] ss:$8 sps:$4 sm:$0xff]  }
 0x2de   : > { %7492 = vmatpush1.bf16.msra.mxu0 %v10796_v56  ;;  %6476 = vmatprep.subr.bf16.mxu1 %v10801_v57  ;;  %v10895_v55 = vld [vmem:[%s11778_s15 + $0x27c] ss:$144 sps:$4 sm:$0xff]   ;;  %v10897_v56 = vld [vmem:[%s11778_s15 + $0x2c4] ss:$144 sps:$4 sm:$0xff]   ;;  %v10889_v57 = vld [vmem:[%s11786_s29 + $0x830] ss:$8 sps:$4 sm:$0xff]  }
 0x2df   : > { %7493 = vmatprep.subr.bf16.mxu0 %v10804_v58  ;;  %6427 = vmatprep.mubr.bf16.mxu1 %v10805_v59  ;;  %v10892_v58 = vld [vmem:[%s11786_s29 + $0x1130] ss:$8 sps:$4 sm:$0xff]   ;;  %v10902_v59 = vld [vmem:[%s11786_s29 + $0x844] ss:$8 sps:$4 sm:$0xff]  }
 0x2e0   : > { %7444 = vmatprep.mubr.bf16.mxu0 %v10807_v60  ;;  %v10906_v60 = vld [vmem:[%s11786_s29 + $0x1144] ss:$8 sps:$4 sm:$0xff]  }
 0x2e1   : > { %6477 = vmatpush1.bf16.msra.mxu1 %v10799_v61  ;;  %v10899_v61 = vld [vmem:[%s11778_s15 + $0x278] ss:$144 sps:$4 sm:$0xff]  }
 0x2e2   : > { %7494 = vmatpush1.bf16.msra.mxu0 %v10802_v62  ;;  %6478 = vmatprep.subr.bf16.mxu1 %v10812_v63  ;;  %v10900_v62 = vld [vmem:[%s11786_s29 + $0x840] ss:$8 sps:$4 sm:$0xff]  }
 0x2e3   : > { %7495 = vmatprep.subr.bf16.mxu0 %v10816_v0  ;;  %v10903_v63 = vld [vmem:[%s11778_s15 + $0x2c0] ss:$144 sps:$4 sm:$0xff]  }
 0x2e4   : > { %6428 = vmatmul.mubr.bf16.gmra.mrb[20].mxu1 %v10809_v1  ;;  %v10904_v0 = vld [vmem:[%s11786_s29 + $0x1140] ss:$8 sps:$4 sm:$0xff]   ;;  %v10909_v1 = vld [vmem:[%s11786_s29 + $0x854] ss:$8 sps:$4 sm:$0xff]  }
 0x2e5   : > { %7445 = vmatmul.mubr.bf16.gmra.mrb[20].mxu0 %v10813_v3  ;;  %6479 = vmatpush1.bf16.msra.mxu1 %v10810_v2  ;;  %v10912_v2 = vld [vmem:[%s11786_s29 + $0x1154] ss:$8 sps:$4 sm:$0xff]  }
 0x2e6   : > { %7496 = vmatpush1.bf16.msra.mxu0 %v10814_v4  ;;  %6480 = vmatprep.subr.bf16.mxu1 %v10819_v5  ;;  %v10913_v3 = vld [vmem:[%s11778_s15 + $0x39c] ss:$144 sps:$4 sm:$0xff]   ;;  %v10915_v4 = vld [vmem:[%s11778_s15 + $0x3e4] ss:$144 sps:$4 sm:$0xff]   ;;  %v10907_v5 = vld [vmem:[%s11786_s29 + $0x850] ss:$8 sps:$4 sm:$0xff]  }
 0x2e7   : > { %7497 = vmatprep.subr.bf16.mxu0 %v10822_v6  ;;  %6437 = vmatprep.mubr.bf16.mxu1 %v10823_v7  ;;  %v10910_v6 = vld [vmem:[%s11786_s29 + $0x1150] ss:$8 sps:$4 sm:$0xff]   ;;  %v10920_v7 = vld [vmem:[%s11786_s29 + $0x864] ss:$8 sps:$4 sm:$0xff]  }
 0x2e8   : > { %7454 = vmatprep.mubr.bf16.mxu0 %v10825_v8  ;;  %v10924_v8 = vld [vmem:[%s11786_s29 + $0x1164] ss:$8 sps:$4 sm:$0xff]  }
 0x2e9   : > { %6481 = vmatpush1.bf16.msra.mxu1 %v10817_v9  ;;  %v10917_v9 = vld [vmem:[%s11778_s15 + $0x398] ss:$144 sps:$4 sm:$0xff]  }
 0x2ea   : > { %7498 = vmatpush1.bf16.msra.mxu0 %v10820_v10  ;;  %6482 = vmatprep.subr.bf16.mxu1 %v10830_v11  ;;  %v10918_v10 = vld [vmem:[%s11786_s29 + $0x860] ss:$8 sps:$4 sm:$0xff]  }
 0x2eb   : > { %7499 = vmatprep.subr.bf16.mxu0 %v10834_v12  ;;  %v10921_v11 = vld [vmem:[%s11778_s15 + $0x3e0] ss:$144 sps:$4 sm:$0xff]  }
 0x2ec   : > { %6438 = vmatmul.mubr.bf16.gmra.mrb[24].mxu1 %v10827_v13  ;;  %v10922_v12 = vld [vmem:[%s11786_s29 + $0x1160] ss:$8 sps:$4 sm:$0xff]   ;;  %v10927_v13 = vld [vmem:[%s11786_s29 + $0x874] ss:$8 sps:$4 sm:$0xff]  }
 0x2ed   : > { %7455 = vmatmul.mubr.bf16.gmra.mrb[24].mxu0 %v10831_v15  ;;  %6483 = vmatpush1.bf16.msra.mxu1 %v10828_v14  ;;  %v10930_v14 = vld [vmem:[%s11786_s29 + $0x1174] ss:$8 sps:$4 sm:$0xff]  }
 0x2ee   : > { %7500 = vmatpush1.bf16.msra.mxu0 %v10832_v16  ;;  %6484 = vmatprep.subr.bf16.mxu1 %v10837_v17  ;;  %v10931_v15 = vld [vmem:[%s11778_s15 + $0x4bc] ss:$144 sps:$4 sm:$0xff]   ;;  %v10933_v16 = vld [vmem:[%s11778_s15 + $0x504] ss:$144 sps:$4 sm:$0xff]   ;;  %v10925_v17 = vld [vmem:[%s11786_s29 + $0x870] ss:$8 sps:$4 sm:$0xff]  }
 0x2ef   : > { %7501 = vmatprep.subr.bf16.mxu0 %v10840_v18  ;;  %6447 = vmatprep.mubr.bf16.mxu1 %v10841_v19  ;;  %v10928_v18 = vld [vmem:[%s11786_s29 + $0x1170] ss:$8 sps:$4 sm:$0xff]   ;;  %v10938_v19 = vld [vmem:[%s11786_s29 + $0x884] ss:$8 sps:$4 sm:$0xff]  }
 0x2f0   : > { %7464 = vmatprep.mubr.bf16.mxu0 %v10843_v20  ;;  %v10942_v20 = vld [vmem:[%s11786_s29 + $0x1184] ss:$8 sps:$4 sm:$0xff]  }
 0x2f1   : > { %6485 = vmatpush1.bf16.msra.mxu1 %v10835_v21  ;;  %v10935_v21 = vld [vmem:[%s11778_s15 + $0x4b8] ss:$144 sps:$4 sm:$0xff]  }
 0x2f2   : > { %7502 = vmatpush1.bf16.msra.mxu0 %v10838_v22  ;;  %6486 = vmatprep.subr.bf16.mxu1 %v10848_v23  ;;  %v10936_v22 = vld [vmem:[%s11786_s29 + $0x880] ss:$8 sps:$4 sm:$0xff]  }
 0x2f3   : > { %7503 = vmatprep.subr.bf16.mxu0 %v10852_v24  ;;  %v10939_v23 = vld [vmem:[%s11778_s15 + $0x500] ss:$144 sps:$4 sm:$0xff]  }
 0x2f4   : > { %6448 = vmatmul.mubr.bf16.gmra.mrb[28].mxu1 %v10845_v25  ;;  %v10940_v24 = vld [vmem:[%s11786_s29 + $0x1180] ss:$8 sps:$4 sm:$0xff]   ;;  %v10945_v25 = vld [vmem:[%s11786_s29 + $0x894] ss:$8 sps:$4 sm:$0xff]  }
 0x2f5   : > { %7465 = vmatmul.mubr.bf16.gmra.mrb[28].mxu0 %v10849_v27  ;;  %6487 = vmatpush1.bf16.msra.mxu1 %v10846_v26  ;;  %v10948_v26 = vld [vmem:[%s11786_s29 + $0x1194] ss:$8 sps:$4 sm:$0xff]  }
 0x2f6   : > { %7504 = vmatpush1.bf16.msra.mxu0 %v10850_v28  ;;  %6488 = vmatprep.subr.bf16.mxu1 %v10855_v29  ;;  %v10949_v27 = vld [vmem:[%s11778_s15 + $0x5dc] ss:$144 sps:$4 sm:$0xff]   ;;  %v10951_v28 = vld [vmem:[%s11778_s15 + $0x624] ss:$144 sps:$4 sm:$0xff]   ;;  %v10943_v29 = vld [vmem:[%s11786_s29 + $0x890] ss:$8 sps:$4 sm:$0xff]  }
 0x2f7   : > { %7505 = vmatprep.subr.bf16.mxu0 %v10858_v30  ;;  %6490 = vmatprep.mubr.bf16.mxu1 %v10861_v31  ;;  %v10946_v30 = vld [vmem:[%s11786_s29 + $0x1190] ss:$8 sps:$4 sm:$0xff]   ;;  %v10956_v31 = vld [vmem:[%s11786_s29 + $0x8a4] ss:$8 sps:$4 sm:$0xff]  }
 0x2f8   : > { %7507 = vmatprep.mubr.bf16.mxu0 %v10864_v32  ;;  %v10960_v32 = vld [vmem:[%s11786_s29 + $0x11a4] ss:$8 sps:$4 sm:$0xff]  }
 0x2f9   : > { %6489 = vmatpush1.bf16.msra.mxu1 %v10853_v33  ;;  %v10953_v33 = vld [vmem:[%s11778_s15 + $0x5d8] ss:$144 sps:$4 sm:$0xff]  }
 0x2fa   : > { %7506 = vmatpush1.bf16.msra.mxu0 %v10856_v34  ;;  %6571 = vmatprep.subr.bf16.mxu1 %v10867_v35  ;;  %v10954_v34 = vld [vmem:[%s11786_s29 + $0x8a0] ss:$8 sps:$4 sm:$0xff]  }
 0x2fb   : > { %7588 = vmatprep.subr.bf16.mxu0 %v10870_v36  ;;  %v10957_v35 = vld [vmem:[%s11778_s15 + $0x620] ss:$144 sps:$4 sm:$0xff]  }
 0x2fc   : > { %6491 = vmatmul.mubr.bf16.vlgmr.msra.gmra.mrb[0].mxu1 %v10859_v37  ;;  %v10958_v36 = vld [vmem:[%s11786_s29 + $0x11a0] ss:$8 sps:$4 sm:$0xff]   ;;  %v10963_v37 = vld [vmem:[%s11786_s29 + $0x8b4] ss:$8 sps:$4 sm:$0xff]  }
 0x2fd   : > { %7508 = vmatmul.mubr.bf16.vlgmr.msra.gmra.mrb[0].mxu0 %v10862_v38  ;;  %6572 = vmatpush1.bf16.msra.mxu1 %v10865_v39  ;;  %v10966_v38 = vld [vmem:[%s11786_s29 + $0x11b4] ss:$8 sps:$4 sm:$0xff]  }
 0x2fe   : > { %7589 = vmatpush1.bf16.msra.mxu0 %v10868_v40  ;;  %6573 = vmatprep.subr.bf16.mxu1 %v10873_v41  ;;  %v10967_v39 = vld [vmem:[%s11778_s15 + $0x6fc] ss:$144 sps:$4 sm:$0xff]   ;;  %v10969_v40 = vld [vmem:[%s11778_s15 + $0x744] ss:$144 sps:$4 sm:$0xff]   ;;  %v10961_v41 = vld [vmem:[%s11786_s29 + $0x8b0] ss:$8 sps:$4 sm:$0xff]  }
 0x2ff   : > { %7590 = vmatprep.subr.bf16.mxu0 %v10876_v42  ;;  %6500 = vmatprep.mubr.bf16.mxu1 %v10877_v43  ;;  %v10964_v42 = vld [vmem:[%s11786_s29 + $0x11b0] ss:$8 sps:$4 sm:$0xff]   ;;  %v10974_v43 = vld [vmem:[%s11786_s29 + $0x8c4] ss:$8 sps:$4 sm:$0xff]  }
 0x300   : > { %7517 = vmatprep.mubr.bf16.mxu0 %v10879_v44  ;;  %v10978_v44 = vld [vmem:[%s11786_s29 + $0x11c4] ss:$8 sps:$4 sm:$0xff]  }
 0x301   : > { %6574 = vmatpush1.bf16.msra.mxu1 %v10871_v45  ;;  %v10971_v45 = vld [vmem:[%s11778_s15 + $0x6f8] ss:$144 sps:$4 sm:$0xff]  }
 0x302   : > { %7591 = vmatpush1.bf16.msra.mxu0 %v10874_v46  ;;  %6575 = vmatprep.subr.bf16.mxu1 %v10884_v47  ;;  %v10972_v46 = vld [vmem:[%s11786_s29 + $0x8c0] ss:$8 sps:$4 sm:$0xff]  }
 0x303   : > { %7592 = vmatprep.subr.bf16.mxu0 %v10888_v48  ;;  %v10975_v47 = vld [vmem:[%s11778_s15 + $0x740] ss:$144 sps:$4 sm:$0xff]  }
 0x304   : > { %6501 = vmatmul.mubr.bf16.gmra.mrb[4].mxu1 %v10881_v49  ;;  %v10976_v48 = vld [vmem:[%s11786_s29 + $0x11c0] ss:$8 sps:$4 sm:$0xff]   ;;  %v10981_v49 = vld [vmem:[%s11786_s29 + $0x8d4] ss:$8 sps:$4 sm:$0xff]  }
 0x305   : > { %7518 = vmatmul.mubr.bf16.gmra.mrb[4].mxu0 %v10885_v51  ;;  %6576 = vmatpush1.bf16.msra.mxu1 %v10882_v50  ;;  %v10984_v50 = vld [vmem:[%s11786_s29 + $0x11d4] ss:$8 sps:$4 sm:$0xff]  }
 0x306   : > { %7593 = vmatpush1.bf16.msra.mxu0 %v10886_v52  ;;  %6577 = vmatprep.subr.bf16.mxu1 %v10891_v53  ;;  %v10985_v51 = vld [vmem:[%s11778_s15 + $0x81c] ss:$144 sps:$4 sm:$0xff]   ;;  %v10987_v52 = vld [vmem:[%s11778_s15 + $0x864] ss:$144 sps:$4 sm:$0xff]   ;;  %v10979_v53 = vld [vmem:[%s11786_s29 + $0x8d0] ss:$8 sps:$4 sm:$0xff]  }
 0x307   : > { %7594 = vmatprep.subr.bf16.mxu0 %v10894_v54  ;;  %6510 = vmatprep.mubr.bf16.mxu1 %v10895_v55  ;;  %v10982_v54 = vld [vmem:[%s11786_s29 + $0x11d0] ss:$8 sps:$4 sm:$0xff]   ;;  %v10992_v55 = vld [vmem:[%s11786_s29 + $0x8e4] ss:$8 sps:$4 sm:$0xff]  }
 0x308   : > { %7527 = vmatprep.mubr.bf16.mxu0 %v10897_v56  ;;  %v10996_v56 = vld [vmem:[%s11786_s29 + $0x11e4] ss:$8 sps:$4 sm:$0xff]  }
 0x309   : > { %6578 = vmatpush1.bf16.msra.mxu1 %v10889_v57  ;;  %v10989_v57 = vld [vmem:[%s11778_s15 + $0x818] ss:$144 sps:$4 sm:$0xff]  }
 0x30a   : > { %7595 = vmatpush1.bf16.msra.mxu0 %v10892_v58  ;;  %6579 = vmatprep.subr.bf16.mxu1 %v10902_v59  ;;  %v10990_v58 = vld [vmem:[%s11786_s29 + $0x8e0] ss:$8 sps:$4 sm:$0xff]  }
 0x30b   : > { %7596 = vmatprep.subr.bf16.mxu0 %v10906_v60  ;;  %v10993_v59 = vld [vmem:[%s11778_s15 + $0x860] ss:$144 sps:$4 sm:$0xff]  }
 0x30c   : > { %6511 = vmatmul.mubr.bf16.gmra.mrb[8].mxu1 %v10899_v61  ;;  %v10994_v60 = vld [vmem:[%s11786_s29 + $0x11e0] ss:$8 sps:$4 sm:$0xff]   ;;  %v10999_v61 = vld [vmem:[%s11786_s29 + $0x8f4] ss:$8 sps:$4 sm:$0xff]  }
 0x30d   : > { %7528 = vmatmul.mubr.bf16.gmra.mrb[8].mxu0 %v10903_v63  ;;  %6580 = vmatpush1.bf16.msra.mxu1 %v10900_v62  ;;  %v11002_v62 = vld [vmem:[%s11786_s29 + $0x11f4] ss:$8 sps:$4 sm:$0xff]  }
 0x30e   : > { %7597 = vmatpush1.bf16.msra.mxu0 %v10904_v0  ;;  %6581 = vmatprep.subr.bf16.mxu1 %v10909_v1  ;;  %v11005_v63 = vld [vmem:[%s11778_s15 + $0x44] ss:$144 sps:$4 sm:$0xff]   ;;  %v11008_v0 = vld [vmem:[%s11778_s15 + $0x8c] ss:$144 sps:$4 sm:$0xff]   ;;  %v10997_v1 = vld [vmem:[%s11786_s29 + $0x8f0] ss:$8 sps:$4 sm:$0xff]  }
 0x30f   : > { %7598 = vmatprep.subr.bf16.mxu0 %v10912_v2  ;;  %6520 = vmatprep.mubr.bf16.mxu1 %v10913_v3  ;;  %v11000_v2 = vld [vmem:[%s11786_s29 + $0x11f0] ss:$8 sps:$4 sm:$0xff]  }
 0x310   : > { %7537 = vmatprep.mubr.bf16.mxu0 %v10915_v4  ;;  %v11003_v3 = vld [vmem:[%s11778_s15 + $0x40] ss:$144 sps:$4 sm:$0xff]   ;;  %v11006_v4 = vld [vmem:[%s11778_s15 + $0x88] ss:$144 sps:$4 sm:$0xff]  }
 0x311   : > { %6582 = vmatpush1.bf16.msra.mxu1 %v10907_v5  ;;  %v11009_v5 = vld [vmem:[%s11778_s15 + $0x164] ss:$144 sps:$4 sm:$0xff]  }
 0x312   : > { %7599 = vmatpush1.bf16.msra.mxu0 %v10910_v6  ;;  %6583 = vmatprep.subr.bf16.mxu1 %v10920_v7  ;;  %v11011_v6 = vld [vmem:[%s11778_s15 + $0x1ac] ss:$144 sps:$4 sm:$0xff]   ;;  %v11013_v7 = vld [vmem:[%s11778_s15 + $0x160] ss:$144 sps:$4 sm:$0xff]  }
 0x313   : > { %7600 = vmatprep.subr.bf16.mxu0 %v10924_v8  ;;  %v11014_v8 = vld [vmem:[%s11778_s15 + $0x1a8] ss:$144 sps:$4 sm:$0xff]  }
 0x314   : > { %6521 = vmatmul.mubr.bf16.gmra.mrb[12].mxu1 %v10917_v9  ;;  %v11015_v9 = vld [vmem:[%s11778_s15 + $0x284] ss:$144 sps:$4 sm:$0xff]  }
 0x315   : > { %7538 = vmatmul.mubr.bf16.gmra.mrb[12].mxu0 %v10921_v11  ;;  %6584 = vmatpush1.bf16.msra.mxu1 %v10918_v10  ;;  %v11017_v10 = vld [vmem:[%s11778_s15 + $0x2cc] ss:$144 sps:$4 sm:$0xff]   ;;  %v11019_v11 = vld [vmem:[%s11778_s15 + $0x280] ss:$144 sps:$4 sm:$0xff]  }
 0x316   : > { %7601 = vmatpush1.bf16.msra.mxu0 %v10922_v12  ;;  %6585 = vmatprep.subr.bf16.mxu1 %v10927_v13  ;;  %v11020_v12 = vld [vmem:[%s11778_s15 + $0x2c8] ss:$144 sps:$4 sm:$0xff]   ;;  %v11021_v13 = vld [vmem:[%s11778_s15 + $0x3a4] ss:$144 sps:$4 sm:$0xff]  }
 0x317   : > { %7602 = vmatprep.subr.bf16.mxu0 %v10930_v14  ;;  %6530 = vmatprep.mubr.bf16.mxu1 %v10931_v15  ;;  %v11023_v14 = vld [vmem:[%s11778_s15 + $0x3ec] ss:$144 sps:$4 sm:$0xff]   ;;  %v11025_v15 = vld [vmem:[%s11778_s15 + $0x3a0] ss:$144 sps:$4 sm:$0xff]  }
 0x318   : > { %7547 = vmatprep.mubr.bf16.mxu0 %v10933_v16  ;;  %v11026_v16 = vld [vmem:[%s11778_s15 + $0x3e8] ss:$144 sps:$4 sm:$0xff]  }
 0x319   : > { %6586 = vmatpush1.bf16.msra.mxu1 %v10925_v17  ;;  %v11027_v17 = vld [vmem:[%s11778_s15 + $0x4c4] ss:$144 sps:$4 sm:$0xff]  }
 0x31a   : > { %7603 = vmatpush1.bf16.msra.mxu0 %v10928_v18  ;;  %6587 = vmatprep.subr.bf16.mxu1 %v10938_v19  ;;  %v11029_v18 = vld [vmem:[%s11778_s15 + $0x50c] ss:$144 sps:$4 sm:$0xff]   ;;  %v11031_v19 = vld [vmem:[%s11778_s15 + $0x4c0] ss:$144 sps:$4 sm:$0xff]  }
 0x31b   : > { %7604 = vmatprep.subr.bf16.mxu0 %v10942_v20  ;;  %v11032_v20 = vld [vmem:[%s11778_s15 + $0x508] ss:$144 sps:$4 sm:$0xff]  }
 0x31c   : > { %6531 = vmatmul.mubr.bf16.gmra.mrb[16].mxu1 %v10935_v21  ;;  %v11033_v21 = vld [vmem:[%s11778_s15 + $0x5e4] ss:$144 sps:$4 sm:$0xff]  }
 0x31d   : > { %7548 = vmatmul.mubr.bf16.gmra.mrb[16].mxu0 %v10939_v23  ;;  %6588 = vmatpush1.bf16.msra.mxu1 %v10936_v22  ;;  %v11035_v22 = vld [vmem:[%s11778_s15 + $0x62c] ss:$144 sps:$4 sm:$0xff]   ;;  %v11037_v23 = vld [vmem:[%s11778_s15 + $0x5e0] ss:$144 sps:$4 sm:$0xff]  }
 0x31e   : > { %7605 = vmatpush1.bf16.msra.mxu0 %v10940_v24  ;;  %6589 = vmatprep.subr.bf16.mxu1 %v10945_v25  ;;  %v11038_v24 = vld [vmem:[%s11778_s15 + $0x628] ss:$144 sps:$4 sm:$0xff]   ;;  %v11039_v25 = vld [vmem:[%s11778_s15 + $0x704] ss:$144 sps:$4 sm:$0xff]  }
 0x31f   : > { %7606 = vmatprep.subr.bf16.mxu0 %v10948_v26  ;;  %6540 = vmatprep.mubr.bf16.mxu1 %v10949_v27  ;;  %v11041_v26 = vld [vmem:[%s11778_s15 + $0x74c] ss:$144 sps:$4 sm:$0xff]   ;;  %v11043_v27 = vld [vmem:[%s11778_s15 + $0x700] ss:$144 sps:$4 sm:$0xff]  }
 0x320   : > { %7557 = vmatprep.mubr.bf16.mxu0 %v10951_v28  ;;  %v11044_v28 = vld [vmem:[%s11778_s15 + $0x748] ss:$144 sps:$4 sm:$0xff]  }
 0x321   : > { %6590 = vmatpush1.bf16.msra.mxu1 %v10943_v29  ;;  %v11045_v29 = vld [vmem:[%s11778_s15 + $0x824] ss:$144 sps:$4 sm:$0xff]  }
 0x322   : > { %7607 = vmatpush1.bf16.msra.mxu0 %v10946_v30  ;;  %6591 = vmatprep.subr.bf16.mxu1 %v10956_v31  ;;  %v11047_v30 = vld [vmem:[%s11778_s15 + $0x86c] ss:$144 sps:$4 sm:$0xff]   ;;  %v11049_v31 = vld [vmem:[%s11778_s15 + $0x820] ss:$144 sps:$4 sm:$0xff]  }
 0x323   : > { %7608 = vmatprep.subr.bf16.mxu0 %v10960_v32  ;;  %v11050_v32 = vld [vmem:[%s11778_s15 + $0x868] ss:$144 sps:$4 sm:$0xff]  }
 0x324   : > { %6541 = vmatmul.mubr.bf16.gmra.mrb[20].mxu1 %v10953_v33 }
 0x325   : > { %7558 = vmatmul.mubr.bf16.gmra.mrb[20].mxu0 %v10957_v35  ;;  %6592 = vmatpush1.bf16.msra.mxu1 %v10954_v34  ;;  %v451_v34 = vld [vmem:[%s11810_s24] sm:$0xff] }
 0x326   : > { %7609 = vmatpush1.bf16.msra.mxu0 %v10958_v36  ;;  %6593 = vmatprep.subr.bf16.mxu1 %v10963_v37 }
 0x327   : > { %7610 = vmatprep.subr.bf16.mxu0 %v10966_v38  ;;  %6550 = vmatprep.mubr.bf16.mxu1 %v10967_v39  ;;  %v452_v38 = vld [vmem:[%s11810_s24 + $0x8] sm:$0xff] }
 0x328   : > { %7567 = vmatprep.mubr.bf16.mxu0 %v10969_v40 }
 0x329   : > { %6594 = vmatpush1.bf16.msra.mxu1 %v10961_v41 }
 0x32a   : > { %7611 = vmatpush1.bf16.msra.mxu0 %v10964_v42  ;;  %6595 = vmatprep.subr.bf16.mxu1 %v10974_v43  ;;  %v453_v42 = vld [vmem:[%s11810_s24 + $0x10] sm:$0xff] }
 0x32b   : > { %7612 = vmatprep.subr.bf16.mxu0 %v10978_v44 }
 0x32c   : > { %6551 = vmatmul.mubr.bf16.gmra.mrb[24].mxu1 %v10971_v45 }
 0x32d   : > { %7568 = vmatmul.mubr.bf16.gmra.mrb[24].mxu0 %v10975_v47  ;;  %6596 = vmatpush1.bf16.msra.mxu1 %v10972_v46  ;;  %v454_v47 = vld [vmem:[%s11810_s24 + $0x18] sm:$0xff] }
 0x32e   : > { %7613 = vmatpush1.bf16.msra.mxu0 %v10976_v48  ;;  %6597 = vmatprep.subr.bf16.mxu1 %v10981_v49 }
 0x32f   : > { %7614 = vmatprep.subr.bf16.mxu0 %v10984_v50  ;;  %6560 = vmatprep.mubr.bf16.mxu1 %v10985_v51 }
 0x330   : > { %7577 = vmatprep.mubr.bf16.mxu0 %v10987_v52 }
 0x331   : > { %6598 = vmatpush1.bf16.msra.mxu1 %v10979_v53 }
 0x332   : > { %7615 = vmatpush1.bf16.msra.mxu0 %v10982_v54  ;;  %6599 = vmatprep.subr.bf16.mxu1 %v10992_v55  ;;  %v455_v54 = vld [vmem:[%s11810_s24 + $0x20] sm:$0xff] }
 0x333   : > { %7616 = vmatprep.subr.bf16.mxu0 %v10996_v56 }
 0x334   : > { %6561 = vmatmul.mubr.bf16.gmra.mrb[28].mxu1 %v10989_v57 }
 0x335   : > { %7578 = vmatmul.mubr.bf16.gmra.mrb[28].mxu0 %v10993_v59  ;;  %6600 = vmatpush1.bf16.msra.mxu1 %v10990_v58  ;;  %v456_v58 = vld [vmem:[%s11810_s24 + $0x28] sm:$0xff] }
 0x336   : > { %7617 = vmatpush1.bf16.msra.mxu0 %v10994_v60  ;;  %6601 = vmatprep.subr.bf16.mxu1 %v10999_v61 }
 0x337   : > { %7618 = vmatprep.subr.bf16.mxu0 %v11002_v62  ;;  %6603 = vmatprep.mubr.bf16.mxu1 %v11005_v63  ;;  %v457_v62 = vld [vmem:[%s11810_s24 + $0x30] sm:$0xff] }
 0x338   : > { %7620 = vmatprep.mubr.bf16.mxu0 %v11008_v0 }
 0x339   : > { %6602 = vmatpush1.bf16.msra.mxu1 %v10997_v1 }
 0x33a   : > { %7619 = vmatpush1.bf16.msra.mxu0 %v11000_v2 }
 0x33c   : > { %6604 = vmatmul.mubr.bf16.vlgmr.msra.gmra.mrb[0].mxu1 %v11003_v3  ;;  %v458_v3 = vld [vmem:[%s11810_s24 + $0x38] sm:$0xff] }
 0x33d   : > { %7621 = vmatmul.mubr.bf16.vlgmr.msra.gmra.mrb[0].mxu0 %v11006_v4  ;;  %6613 = vmatprep.mubr.bf16.mxu1 %v11009_v5 }
 0x33e   : > { %7630 = vmatprep.mubr.bf16.mxu0 %v11011_v6 }
 0x344   : > { %6614 = vmatmul.mubr.bf16.gmra.mrb[4].mxu1 %v11013_v7 }
 0x345   : > { %7631 = vmatmul.mubr.bf16.gmra.mrb[4].mxu0 %v11014_v8  ;;  %6623 = vmatprep.mubr.bf16.mxu1 %v11015_v9 }
 0x346   : > { %7640 = vmatprep.mubr.bf16.mxu0 %v11017_v10  ;;  %v459_v10 = vld [vmem:[%s11810_s24 + $0x40] sm:$0xff] }
 0x34c   : > { %6624 = vmatmul.mubr.bf16.gmra.mrb[8].mxu1 %v11019_v11 }
 0x34d   : > { %7641 = vmatmul.mubr.bf16.gmra.mrb[8].mxu0 %v11020_v12  ;;  %6633 = vmatprep.mubr.bf16.mxu1 %v11021_v13 }
 0x34e   : > { %7650 = vmatprep.mubr.bf16.mxu0 %v11023_v14  ;;  %v460_v14 = vld [vmem:[%s11810_s24 + $0x48] sm:$0xff] }
 0x354   : > { %6634 = vmatmul.mubr.bf16.gmra.mrb[12].mxu1 %v11025_v15 }
 0x355   : > { %7651 = vmatmul.mubr.bf16.gmra.mrb[12].mxu0 %v11026_v16  ;;  %6643 = vmatprep.mubr.bf16.mxu1 %v11027_v17 }
 0x356   : > { %7660 = vmatprep.mubr.bf16.mxu0 %v11029_v18  ;;  %v461_v18 = vld [vmem:[%s11810_s24 + $0x50] sm:$0xff] }
 0x35c   : > { %6644 = vmatmul.mubr.bf16.gmra.mrb[16].mxu1 %v11031_v19 }
 0x35d   : > { %7661 = vmatmul.mubr.bf16.gmra.mrb[16].mxu0 %v11032_v20  ;;  %6653 = vmatprep.mubr.bf16.mxu1 %v11033_v21 }
 0x35e   : > { %7670 = vmatprep.mubr.bf16.mxu0 %v11035_v22 }
 0x364   : > { %6654 = vmatmul.mubr.bf16.gmra.mrb[20].mxu1 %v11037_v23  ;;  %v462_v23 = vld [vmem:[%s11810_s24 + $0x58] sm:$0xff] }
 0x365   : > { %7671 = vmatmul.mubr.bf16.gmra.mrb[20].mxu0 %v11038_v24  ;;  %6663 = vmatprep.mubr.bf16.mxu1 %v11039_v25 }
 0x366   : > { %7680 = vmatprep.mubr.bf16.mxu0 %v11041_v26 }
 0x36c   : > { %6664 = vmatmul.mubr.bf16.gmra.mrb[24].mxu1 %v11043_v27 }
 0x36d   : > { %7681 = vmatmul.mubr.bf16.gmra.mrb[24].mxu0 %v11044_v28  ;;  %6673 = vmatprep.mubr.bf16.mxu1 %v11045_v29 }
 0x36e   : > { %7690 = vmatprep.mubr.bf16.mxu0 %v11047_v30  ;;  %v463_v30 = vld [vmem:[%s11810_s24 + $0x60] sm:$0xff] }
 0x374   : > { %6674 = vmatmul.mubr.bf16.gmra.mrb[28].mxu1 %v11049_v31 }
 0x375   : > { %7691 = vmatmul.mubr.bf16.gmra.mrb[28].mxu0 %v11050_v32 }
 0x40f   : > { %v6605_v33 = vpop.f32.mrb[0].mxu1 }
 0x410   : > { %v7622_v35 = vpop.f32.mrb[0].mxu0  ;;  %v6607_v37 = vpop.f32.mrb[1].mxu1 }
 0x411   : > { %v9051_v36 = vadd.f32 %v7622_v35, %v6605_v33  ;;  %v7624_v39 = vpop.f32.mrb[1].mxu0  ;;  %v6609_v41 = vpop.f32.mrb[2].mxu1 }
 0x412   : > { %v9052_v40 = vadd.f32 %v7624_v39, %v6607_v37  ;;  %v7626_v43 = vpop.f32.mrb[2].mxu0  ;;  %v6611_v46 = vpop.f32.mrb[3].mxu1 }
 0x413   : > { %v7701_v44 = vadd.f32 %v9051_v36, %v451_v34  ;;  %v9053_v45 = vadd.f32 %v7626_v43, %v6609_v41  ;;  %v7628_v48 = vpop.f32.mrb[3].mxu0  ;;  %v464_v34 = vld [vmem:[%s11810_s24 + $0x68] sm:$0xff]  ;;  %v466_v43 = vld [vmem:[%s11810_s24 + $0x78] sm:$0xff] }
 0x414   : > { %v7702_v49 = vadd.f32 %v9052_v40, %v452_v38  ;;  %v9054_v50 = vadd.f32 %v7628_v48, %v6611_v46  ;;  %v465_v38 = vld [vmem:[%s11810_s24 + $0x70] sm:$0xff] }
 0x415   : > { %7733 = vst [vmem:[%s11810_s24] sm:$0xff] %v7701_v44  ;;  %v7703_v51 = vadd.f32 %v9053_v45, %v453_v42 }
 0x416   : > { %7734 = vst [vmem:[%s11810_s24 + $0x8] sm:$0xff] %v7702_v49  ;;  %v7704_v52 = vadd.f32 %v9054_v50, %v454_v47  ;;  %v467_v50 = vld [vmem:[%s11810_s24 + $0x80] sm:$0xff] }
 0x417   : > { %7735 = vst [vmem:[%s11810_s24 + $0x10] sm:$0xff] %v7703_v51  ;;  %v6615_v53 = vpop.f32.mrb[4].mxu1 }
 0x418   : > { %7736 = vst [vmem:[%s11810_s24 + $0x18] sm:$0xff] %v7704_v52  ;;  %v7632_v55 = vpop.f32.mrb[4].mxu0  ;;  %v6617_v57 = vpop.f32.mrb[5].mxu1 }
 0x419   : > { %v9055_v56 = vadd.f32 %v7632_v55, %v6615_v53  ;;  %v7634_v59 = vpop.f32.mrb[5].mxu0  ;;  %v6619_v61 = vpop.f32.mrb[6].mxu1 }
 0x41a   : > { %v9056_v60 = vadd.f32 %v7634_v59, %v6617_v57  ;;  %v7636_v63 = vpop.f32.mrb[6].mxu0  ;;  %v6621_v2 = vpop.f32.mrb[7].mxu1 }
 0x41b   : > { %v7705_v0 = vadd.f32 %v9055_v56, %v455_v54  ;;  %v9057_v1 = vadd.f32 %v7636_v63, %v6619_v61  ;;  %v7638_v4 = vpop.f32.mrb[7].mxu0  ;;  %v468_v54 = vld [vmem:[%s11810_s24 + $0x88] sm:$0xff]  ;;  %v470_v63 = vld [vmem:[%s11810_s24 + $0x98] sm:$0xff] }
 0x41c   : > { %v7706_v5 = vadd.f32 %v9056_v60, %v456_v58  ;;  %v9058_v6 = vadd.f32 %v7638_v4, %v6621_v2  ;;  %v469_v58 = vld [vmem:[%s11810_s24 + $0x90] sm:$0xff] }
 0x41d   : > { %7737 = vst [vmem:[%s11810_s24 + $0x20] sm:$0xff] %v7705_v0  ;;  %v7707_v7 = vadd.f32 %v9057_v1, %v457_v62 }
 0x41e   : > { %7738 = vst [vmem:[%s11810_s24 + $0x28] sm:$0xff] %v7706_v5  ;;  %v7708_v8 = vadd.f32 %v9058_v6, %v458_v3  ;;  %v471_v6 = vld [vmem:[%s11810_s24 + $0xa0] sm:$0xff] }
 0x41f   : > { %7739 = vst [vmem:[%s11810_s24 + $0x30] sm:$0xff] %v7707_v7  ;;  %v6625_v9 = vpop.f32.mrb[8].mxu1 }
 0x420   : > { %7740 = vst [vmem:[%s11810_s24 + $0x38] sm:$0xff] %v7708_v8  ;;  %v7642_v11 = vpop.f32.mrb[8].mxu0  ;;  %v6627_v13 = vpop.f32.mrb[9].mxu1 }
 0x421   : > { %v9059_v12 = vadd.f32 %v7642_v11, %v6625_v9  ;;  %v7644_v15 = vpop.f32.mrb[9].mxu0  ;;  %v6629_v17 = vpop.f32.mrb[10].mxu1 }
 0x422   : > { %v9060_v16 = vadd.f32 %v7644_v15, %v6627_v13  ;;  %v7646_v19 = vpop.f32.mrb[10].mxu0  ;;  %v6631_v22 = vpop.f32.mrb[11].mxu1 }
 0x423   : > { %v7709_v20 = vadd.f32 %v9059_v12, %v459_v10  ;;  %v9061_v21 = vadd.f32 %v7646_v19, %v6629_v17  ;;  %v7648_v24 = vpop.f32.mrb[11].mxu0  ;;  %v472_v10 = vld [vmem:[%s11810_s24 + $0xa8] sm:$0xff]  ;;  %v474_v19 = vld [vmem:[%s11810_s24 + $0xb8] sm:$0xff] }
 0x424   : > { %v7710_v25 = vadd.f32 %v9060_v16, %v460_v14  ;;  %v9062_v26 = vadd.f32 %v7648_v24, %v6631_v22  ;;  %v473_v14 = vld [vmem:[%s11810_s24 + $0xb0] sm:$0xff] }
 0x425   : > { %7741 = vst [vmem:[%s11810_s24 + $0x40] sm:$0xff] %v7709_v20  ;;  %v7711_v27 = vadd.f32 %v9061_v21, %v461_v18 }
 0x426   : > { %7742 = vst [vmem:[%s11810_s24 + $0x48] sm:$0xff] %v7710_v25  ;;  %v7712_v28 = vadd.f32 %v9062_v26, %v462_v23  ;;  %v475_v26 = vld [vmem:[%s11810_s24 + $0xc0] sm:$0xff] }
 0x427   : > { %7743 = vst [vmem:[%s11810_s24 + $0x50] sm:$0xff] %v7711_v27  ;;  %v6635_v29 = vpop.f32.mrb[12].mxu1 }
 0x428   : > { %7744 = vst [vmem:[%s11810_s24 + $0x58] sm:$0xff] %v7712_v28  ;;  %v7652_v31 = vpop.f32.mrb[12].mxu0  ;;  %v6637_v33 = vpop.f32.mrb[13].mxu1 }
 0x429   : > { %v9063_v32 = vadd.f32 %v7652_v31, %v6635_v29  ;;  %v7654_v35 = vpop.f32.mrb[13].mxu0  ;;  %v6639_v37 = vpop.f32.mrb[14].mxu1 }
 0x42a   : > { %v9064_v36 = vadd.f32 %v7654_v35, %v6637_v33  ;;  %v7656_v39 = vpop.f32.mrb[14].mxu0  ;;  %v6641_v42 = vpop.f32.mrb[15].mxu1 }
 0x42b   : > { %v7713_v40 = vadd.f32 %v9063_v32, %v463_v30  ;;  %v9065_v41 = vadd.f32 %v7656_v39, %v6639_v37  ;;  %v7658_v44 = vpop.f32.mrb[15].mxu0  ;;  %v476_v30 = vld [vmem:[%s11810_s24 + $0xc8] sm:$0xff]  ;;  %v478_v39 = vld [vmem:[%s11810_s24 + $0xd8] sm:$0xff] }
 0x42c   : > { %v7714_v45 = vadd.f32 %v9064_v36, %v464_v34  ;;  %v9066_v46 = vadd.f32 %v7658_v44, %v6641_v42  ;;  %v477_v34 = vld [vmem:[%s11810_s24 + $0xd0] sm:$0xff] }
 0x42d   : > { %7745 = vst [vmem:[%s11810_s24 + $0x60] sm:$0xff] %v7713_v40  ;;  %v7715_v47 = vadd.f32 %v9065_v41, %v465_v38 }
 0x42e   : > { %7746 = vst [vmem:[%s11810_s24 + $0x68] sm:$0xff] %v7714_v45  ;;  %v7716_v48 = vadd.f32 %v9066_v46, %v466_v43  ;;  %v479_v46 = vld [vmem:[%s11810_s24 + $0xe0] sm:$0xff] }
 0x42f   : > { %7747 = vst [vmem:[%s11810_s24 + $0x70] sm:$0xff] %v7715_v47  ;;  %v6645_v49 = vpop.f32.mrb[16].mxu1 }
 0x430   : > { %7748 = vst [vmem:[%s11810_s24 + $0x78] sm:$0xff] %v7716_v48  ;;  %v7662_v51 = vpop.f32.mrb[16].mxu0  ;;  %v6647_v53 = vpop.f32.mrb[17].mxu1 }
 0x431   : > { %v9067_v52 = vadd.f32 %v7662_v51, %v6645_v49  ;;  %v7664_v55 = vpop.f32.mrb[17].mxu0  ;;  %v6649_v57 = vpop.f32.mrb[18].mxu1 }
 0x432   : > { %v9068_v56 = vadd.f32 %v7664_v55, %v6647_v53  ;;  %v7666_v59 = vpop.f32.mrb[18].mxu0  ;;  %v6651_v62 = vpop.f32.mrb[19].mxu1 }
 0x433   : > { %v7717_v60 = vadd.f32 %v9067_v52, %v467_v50  ;;  %v9069_v61 = vadd.f32 %v7666_v59, %v6649_v57  ;;  %v7668_v0 = vpop.f32.mrb[19].mxu0  ;;  %v480_v50 = vld [vmem:[%s11810_s24 + $0xe8] sm:$0xff]  ;;  %v482_v59 = vld [vmem:[%s11810_s24 + $0xf8] sm:$0xff] }
 0x434   : > { %v7718_v1 = vadd.f32 %v9068_v56, %v468_v54  ;;  %v9070_v2 = vadd.f32 %v7668_v0, %v6651_v62  ;;  %v481_v54 = vld [vmem:[%s11810_s24 + $0xf0] sm:$0xff] }
 0x435   : > { %7749 = vst [vmem:[%s11810_s24 + $0x80] sm:$0xff] %v7717_v60  ;;  %v7719_v3 = vadd.f32 %v9069_v61, %v469_v58 }
 0x436   : > { %7750 = vst [vmem:[%s11810_s24 + $0x88] sm:$0xff] %v7718_v1  ;;  %v7720_v4 = vadd.f32 %v9070_v2, %v470_v63  ;;  %v7803_v1 = vlaneseq (!%p9039_p0) }
 0x437   : > { %7751 = vst [vmem:[%s11810_s24 + $0x90] sm:$0xff] %v7719_v3  ;;  %v6655_v5 = vpop.f32.mrb[20].mxu1  ;;  %v7801_v3 = vld [vmem:[%s343_s20] sm:$0x3] (!%p9039_p0) }
 0x438   : > { %7752 = vst [vmem:[%s11810_s24 + $0x98] sm:$0xff] %v7720_v4  ;;  %v7672_v7 = vpop.f32.mrb[20].mxu0  ;;  %v6657_v9 = vpop.f32.mrb[21].mxu1  ;;  %v7804_v2 = vshrl.u32 (!%p9039_p0), %v7803_v1, 7  ;;  %v7845_v4 = vld [vmem:[%s352_s8] sm:$0x3] (!%p9039_p0) }
 0x439   : > { %v9071_v8 = vadd.f32 %v7672_v7, %v6655_v5  ;;  %v7674_v11 = vpop.f32.mrb[21].mxu0  ;;  %v6659_v13 = vpop.f32.mrb[22].mxu1  ;;  %v7769_v5 = vld [vmem:[%s11810_s24] sm:$0xff] (!%p9039_p0)  ;;  %v7889_v7 = vld [vmem:[%s361_s28] sm:$0x3] (!%p9039_p0) }
 0x43a   : > { %v9072_v12 = vadd.f32 %v7674_v11, %v6657_v9  ;;  %v7676_v15 = vpop.f32.mrb[22].mxu0  ;;  %v6661_v18 = vpop.f32.mrb[23].mxu1  ;;  %v7809_v9 = vsub.s32 (!%p9039_p0), 1, %v7804_v2  ;;  %v7772_v11 = vld [vmem:[%s11810_s24 + $0x18] sm:$0xff] (!%p9039_p0) }
 0x43b   : > { %v7721_v16 = vadd.f32 %v9071_v8, %v471_v6  ;;  %v9073_v17 = vadd.f32 %v7676_v15, %v6659_v13  ;;  %v7678_v20 = vpop.f32.mrb[23].mxu0  ;;  %v7805_v6 = vsub.s32 (!%p9039_p0), 0, %v7804_v2  ;;  %v7770_v8 = vld [vmem:[%s11810_s24 + $0x8] sm:$0xff] (!%p9039_p0) }
 0x43c   : > { %v7722_v21 = vadd.f32 %v9072_v12, %v472_v10  ;;  %v9074_v22 = vadd.f32 %v7678_v20, %v6661_v18  ;;  %v7771_v10 = vld [vmem:[%s11810_s24 + $0x10] sm:$0xff] (!%p9039_p0)  ;;  %v7773_v12 = vld [vmem:[%s11810_s24 + $0x20] sm:$0xff] (!%p9039_p0)  ;;  %v12789_v15 = vrot.slane (!%p9039_p0), %v7801_v3, %v7809_v9  ;;  %v7776_v18 = vld [vmem:[%s11810_s24 + $0x38] sm:$0xff] (!%p9039_p0)  ;;  %v12796_v20 = vrot.slane (!%p9039_p0), %v7845_v4, %v7809_v9 }
 0x43d   : > { %7753 = vst [vmem:[%s11810_s24 + $0xa0] sm:$0xff] %v7721_v16  ;;  %v7723_v23 = vadd.f32 %v9073_v17, %v473_v14  ;;  %v12785_v13 = vrot.slane (!%p9039_p0), %v7801_v3, %v7805_v6  ;;  %v12787_v14 = vrot.slane (!%p9039_p0), %v7845_v4, %v7805_v6  ;;  %v7774_v16 = vld [vmem:[%s11810_s24 + $0x28] sm:$0xff] (!%p9039_p0)  ;;  %v7775_v17 = vld [vmem:[%s11810_s24 + $0x30] sm:$0xff] (!%p9039_p0)  ;;  %v7785_v2 = vld [vmem:[%s11810_s24 + $0x80] sm:$0xff] (!%p9039_p0) }
 0x43e   : > { %7754 = vst [vmem:[%s11810_s24 + $0xa8] sm:$0xff] %v7722_v21  ;;  %v7724_v24 = vadd.f32 %v9074_v22, %v474_v19  ;;  %v12794_v19 = vrot.slane (!%p9039_p0), %v7889_v7, %v7805_v6  ;;  %v12798_v21 = vrot.slane (!%p9039_p0), %v7889_v7, %v7809_v9  ;;  %v7786_v3 = vld [vmem:[%s11810_s24 + $0x88] sm:$0xff] (!%p9039_p0) }
 0x43f   : > { %7755 = vst [vmem:[%s11810_s24 + $0xb0] sm:$0xff] %v7723_v23  ;;  %v6665_v25 = vpop.f32.mrb[24].mxu1  ;;  %v7813_v22 = vadd.f32 (!%p9039_p0), %v12785_v13, %v7769_v5  ;;  %v7814_v23 = vadd.f32 (!%p9039_p0), %v12789_v15, %v7770_v8  ;;  %v7787_v8 = vld [vmem:[%s11810_s24 + $0x90] sm:$0xff] (!%p9039_p0)  ;;  %v7788_v9 = vld [vmem:[%s11810_s24 + $0x98] sm:$0xff] (!%p9039_p0) }
 0x440   : > { %7756 = vst [vmem:[%s11810_s24 + $0xb8] sm:$0xff] %v7724_v24  ;;  %v7682_v27 = vpop.f32.mrb[24].mxu0  ;;  %v6667_v29 = vpop.f32.mrb[25].mxu1  ;;  %v7815_v24 = vadd.f32 (!%p9039_p0), %v12785_v13, %v7771_v10 }
 0x441   : > { %v9075_v28 = vadd.f32 %v7682_v27, %v6665_v25  ;;  %v7684_v31 = vpop.f32.mrb[25].mxu0  ;;  %v6669_v33 = vpop.f32.mrb[26].mxu1  ;;  %v7816_v25 = vadd.f32 (!%p9039_p0), %v12789_v15, %v7772_v11  ;;  %v7818_v27 = vadd.f32 (!%p9039_p0), %v12789_v15, %v7774_v16 }
 0x442   : > { %v9076_v32 = vadd.f32 %v7684_v31, %v6667_v29  ;;  %v7686_v35 = vpop.f32.mrb[26].mxu0  ;;  %v6671_v38 = vpop.f32.mrb[27].mxu1  ;;  %v7820_v29 = vadd.f32 (!%p9039_p0), %v12789_v15, %v7776_v18  ;;  %v7858_v31 = vmul.f32 (!%p9039_p0), %v12796_v20, %v7814_v23 }
 0x443   : > { %v7725_v36 = vadd.f32 %v9075_v28, %v475_v26  ;;  %v9077_v37 = vadd.f32 %v7686_v35, %v6669_v33  ;;  %v7688_v40 = vpop.f32.mrb[27].mxu0  ;;  %v7817_v26 = vadd.f32 (!%p9039_p0), %v12785_v13, %v7773_v12  ;;  %v7819_v28 = vadd.f32 (!%p9039_p0), %v12785_v13, %v7775_v17  ;;  %v7778_v35 = vld [vmem:[%s11810_s24 + $0x48] sm:$0xff] (!%p9039_p0) }
 0x444   : > { %v7726_v41 = vadd.f32 %v9076_v32, %v476_v30  ;;  %v9078_v42 = vadd.f32 %v7688_v40, %v6671_v38  ;;  %v7857_v30 = vmul.f32 (!%p9039_p0), %v12787_v14, %v7813_v22  ;;  %v7859_v32 = vmul.f32 (!%p9039_p0), %v12787_v14, %v7815_v24  ;;  %v7779_v40 = vld [vmem:[%s11810_s24 + $0x50] sm:$0xff] (!%p9039_p0)  ;;  %v7789_v10 = vld [vmem:[%s11810_s24 + $0xa0] sm:$0xff] (!%p9039_p0) }
 0x445   : > { %7757 = vst [vmem:[%s11810_s24 + $0xc0] sm:$0xff] %v7725_v36  ;;  %v7727_v43 = vadd.f32 %v9077_v37, %v477_v34  ;;  %v7860_v33 = vmul.f32 (!%p9039_p0), %v12796_v20, %v7816_v25  ;;  %v7777_v34 = vld [vmem:[%s11810_s24 + $0x40] sm:$0xff] (!%p9039_p0)  ;;  %v7861_v36 = vmul.f32 (!%p9039_p0), %v12787_v14, %v7817_v26  ;;  %v7862_v37 = vmul.f32 (!%p9039_p0), %v12796_v20, %v7818_v27  ;;  %v7790_v18 = vld [vmem:[%s11810_s24 + $0xa8] sm:$0xff] (!%p9039_p0) }
 0x446   : > { %7758 = vst [vmem:[%s11810_s24 + $0xc8] sm:$0xff] %v7726_v41  ;;  %v7728_v44 = vadd.f32 %v9078_v42, %v478_v39  ;;  %v7863_v38 = vmul.f32 (!%p9039_p0), %v12787_v14, %v7819_v28  ;;  %v7864_v39 = vmul.f32 (!%p9039_p0), %v12796_v20, %v7820_v29  ;;  %v7780_v41 = vld [vmem:[%s11810_s24 + $0x58] sm:$0xff] (!%p9039_p0)  ;;  %v7781_v42 = vld [vmem:[%s11810_s24 + $0x60] sm:$0xff] (!%p9039_p0)  ;;  %v7791_v22 = vld [vmem:[%s11810_s24 + $0xb0] sm:$0xff] (!%p9039_p0)  ;;  %v7829_v28 = vadd.f32 (!%p9039_p0), %v12785_v13, %v7785_v2 }
 0x447   : > { %7759 = vst [vmem:[%s11810_s24 + $0xd0] sm:$0xff] %v7727_v43  ;;  %v6675_v45 = vpop.f32.mrb[28].mxu1  ;;  %v7901_v43 = vadd.f32 (!%p9039_p0), %v12794_v19, %v7857_v30  ;;  %v7792_v23 = vld [vmem:[%s11810_s24 + $0xb8] sm:$0xff] (!%p9039_p0)  ;;  %v7830_v29 = vadd.f32 (!%p9039_p0), %v12789_v15, %v7786_v3  ;;  %v7831_v30 = vadd.f32 (!%p9039_p0), %v12785_v13, %v7787_v8 }
 0x448   : > { %7760 = vst [vmem:[%s11810_s24 + $0xd8] sm:$0xff] %v7728_v44  ;;  %v7692_v47 = vpop.f32.mrb[28].mxu0  ;;  %v6677_v49 = vpop.f32.mrb[29].mxu1  ;;  %v7902_v44 = vadd.f32 (!%p9039_p0), %v12798_v21, %v7858_v31  ;;  %v7832_v31 = vadd.f32 (!%p9039_p0), %v12789_v15, %v7788_v9 }
 0x449   : > { %v9079_v48 = vadd.f32 %v7692_v47, %v6675_v45  ;;  %v7694_v51 = vpop.f32.mrb[29].mxu0  ;;  %v6679_v53 = vpop.f32.mrb[30].mxu1  ;;  %v7903_v45 = vadd.f32 (!%p9039_p0), %v12794_v19, %v7859_v32  ;;  %v7782_v47 = vld [vmem:[%s11810_s24 + $0x68] sm:$0xff] (!%p9039_p0)  ;;  %7933 = vst [vmem:[%s11810_s24] sm:$0xff] (!%p9039_p0), %v7901_v43  ;;  %v7833_v32 = vadd.f32 (!%p9039_p0), %v12785_v13, %v7789_v10 }
 0x44a   : > { %v9080_v52 = vadd.f32 %v7694_v51, %v6677_v49  ;;  %v7696_v55 = vpop.f32.mrb[30].mxu0  ;;  %v6681_v58 = vpop.f32.mrb[31].mxu1  ;;  %7768 = sbr.rel (%p9039_p0) target bundleno = 1125 (0x465), region = 68  ;;  %v7784_v49 = vld [vmem:[%s11810_s24 + $0x78] sm:$0xff] (!%p9039_p0)  ;;  %v7906_v51 = vadd.f32 (!%p9039_p0), %v12798_v21, %v7862_v37  ;;  %7934 = vst [vmem:[%s11810_s24 + $0x8] sm:$0xff] (!%p9039_p0), %v7902_v44  ;;  %v7874_v37 = vmul.f32 (!%p9039_p0), %v12796_v20, %v7830_v29 }
 0x44b   : > { %v7729_v56 = vadd.f32 %v9079_v48, %v479_v46  ;;  %v9081_v57 = vadd.f32 %v7696_v55, %v6679_v53  ;;  %v7698_v60 = vpop.f32.mrb[31].mxu0  ;;  %v7904_v46 = vadd.f32 (!%p9039_p0), %v12798_v21, %v7860_v33  ;;  %v7783_v48 = vld [vmem:[%s11810_s24 + $0x70] sm:$0xff] (!%p9039_p0)  ;;  %v7908_v53 = vadd.f32 (!%p9039_p0), %v12798_v21, %v7864_v39  ;;  %7935 = vst [vmem:[%s11810_s24 + $0x10] sm:$0xff] (!%p9039_p0), %v7903_v45 }
 0x44c   : > { %v7730_v61 = vadd.f32 %v9080_v52, %v480_v50  ;;  %v9082_v62 = vadd.f32 %v7698_v60, %v6681_v58  ;;  %v7905_v50 = vadd.f32 (!%p9039_p0), %v12794_v19, %v7861_v36  ;;  %v7907_v52 = vadd.f32 (!%p9039_p0), %v12794_v19, %v7863_v38  ;;  %7938 = vst [vmem:[%s11810_s24 + $0x28] sm:$0xff] (!%p9039_p0), %v7906_v51 }
 0x44d   : > { %7761 = vst [vmem:[%s11810_s24 + $0xe0] sm:$0xff] %v7729_v56  ;;  %v7731_v63 = vadd.f32 %v9081_v57, %v481_v54  ;;  %7936 = vst [vmem:[%s11810_s24 + $0x18] sm:$0xff] (!%p9039_p0), %v7904_v46  ;;  %v7821_v54 = vadd.f32 (!%p9039_p0), %v12785_v13, %v7777_v34  ;;  %v7822_v55 = vadd.f32 (!%p9039_p0), %v12789_v15, %v7778_v35 }
 0x44e   : > { %7762 = vst [vmem:[%s11810_s24 + $0xe8] sm:$0xff] %v7730_v61  ;;  %v7732_v0 = vadd.f32 %v9082_v62, %v482_v59  ;;  %v7823_v56 = vadd.f32 (!%p9039_p0), %v12785_v13, %v7779_v40  ;;  %v7824_v57 = vadd.f32 (!%p9039_p0), %v12789_v15, %v7780_v41  ;;  %7937 = vst [vmem:[%s11810_s24 + $0x20] sm:$0xff] (!%p9039_p0), %v7905_v50  ;;  %v7793_v40 = vld [vmem:[%s11810_s24 + $0xc0] sm:$0xff] (!%p9039_p0)  ;;  %v7794_v41 = vld [vmem:[%s11810_s24 + $0xc8] sm:$0xff] (!%p9039_p0) }
 0x44f   : > { %7763 = vst [vmem:[%s11810_s24 + $0xf0] sm:$0xff] %v7731_v63  ;;  %7939 = vst [vmem:[%s11810_s24 + $0x30] sm:$0xff] (!%p9039_p0), %v7907_v52  ;;  %v7825_v58 = vadd.f32 (!%p9039_p0), %v12785_v13, %v7781_v42  ;;  %v7826_v59 = vadd.f32 (!%p9039_p0), %v12789_v15, %v7782_v47  ;;  %v7827_v60 = vadd.f32 (!%p9039_p0), %v12785_v13, %v7783_v48  ;;  %v7795_v46 = vld [vmem:[%s11810_s24 + $0xd0] sm:$0xff] (!%p9039_p0)  ;;  %v7796_v47 = vld [vmem:[%s11810_s24 + $0xd8] sm:$0xff] (!%p9039_p0) }
 0x450   : > { %7764 = vst [vmem:[%s11810_s24 + $0xf8] sm:$0xff] %v7732_v0  ;;  %7940 = vst [vmem:[%s11810_s24 + $0x38] sm:$0xff] (!%p9039_p0), %v7908_v53  ;;  %v7828_v61 = vadd.f32 (!%p9039_p0), %v12789_v15, %v7784_v49  ;;  %v7865_v62 = vmul.f32 (!%p9039_p0), %v12787_v14, %v7821_v54  ;;  %v7866_v63 = vmul.f32 (!%p9039_p0), %v12796_v20, %v7822_v55 }
 0x451   : > { %v7867_v0 = vmul.f32 %v12787_v14, %v7823_v56  ;;  %v7868_v1 = vmul.f32 %v12796_v20, %v7824_v57  ;;  %v7869_v4 = vmul.f32 %v12787_v14, %v7825_v58  ;;  %v7870_v5 = vmul.f32 %v12796_v20, %v7826_v59 }
 0x452   : > { %v7871_v6 = vmul.f32 %v12787_v14, %v7827_v60  ;;  %v7872_v7 = vmul.f32 %v12796_v20, %v7828_v61  ;;  %v7909_v11 = vadd.f32 %v12794_v19, %v7865_v62  ;;  %v7910_v12 = vadd.f32 %v12798_v21, %v7866_v63 }
 0x453   : > { %v7911_v16 = vadd.f32 %v12794_v19, %v7867_v0  ;;  %v7912_v17 = vadd.f32 %v12798_v21, %v7868_v1  ;;  %v7913_v24 = vadd.f32 %v12794_v19, %v7869_v4  ;;  %v7914_v25 = vadd.f32 %v12798_v21, %v7870_v5 }
 0x454   : > { %v7915_v26 = vadd.f32 %v12794_v19, %v7871_v6  ;;  %v7916_v27 = vadd.f32 %v12798_v21, %v7872_v7  ;;  %7941 = vst [vmem:[%s11810_s24 + $0x40] sm:$0xff] %v7909_v11  ;;  %7942 = vst [vmem:[%s11810_s24 + $0x48] sm:$0xff] %v7910_v12  ;;  %v7834_v33 = vadd.f32 %v12789_v15, %v7790_v18  ;;  %v7797_v48 = vld [vmem:[%s11810_s24 + $0xe0] sm:$0xff] }
 0x455   : > { %7943 = vst [vmem:[%s11810_s24 + $0x50] sm:$0xff] %v7911_v16  ;;  %7944 = vst [vmem:[%s11810_s24 + $0x58] sm:$0xff] %v7912_v17  ;;  %v7835_v34 = vadd.f32 %v12785_v13, %v7791_v22  ;;  %v7836_v35 = vadd.f32 %v12789_v15, %v7792_v23  ;;  %v7873_v36 = vmul.f32 %v12787_v14, %v7829_v28  ;;  %v7798_v53 = vld [vmem:[%s11810_s24 + $0xe8] sm:$0xff] }
 0x456   : > { %7945 = vst [vmem:[%s11810_s24 + $0x60] sm:$0xff] %v7913_v24  ;;  %7946 = vst [vmem:[%s11810_s24 + $0x68] sm:$0xff] %v7914_v25  ;;  %v7875_v38 = vmul.f32 %v12787_v14, %v7831_v30  ;;  %v7876_v39 = vmul.f32 %v12796_v20, %v7832_v31  ;;  %v7877_v42 = vmul.f32 %v12787_v14, %v7833_v32  ;;  %v7799_v54 = vld [vmem:[%s11810_s24 + $0xf0] sm:$0xff] }
 0x457   : > { %7947 = vst [vmem:[%s11810_s24 + $0x70] sm:$0xff] %v7915_v26  ;;  %7948 = vst [vmem:[%s11810_s24 + $0x78] sm:$0xff] %v7916_v27  ;;  %v7878_v43 = vmul.f32 %v12796_v20, %v7834_v33  ;;  %v7879_v44 = vmul.f32 %v12787_v14, %v7835_v34  ;;  %v7880_v45 = vmul.f32 %v12796_v20, %v7836_v35  ;;  %v7800_v55 = vld [vmem:[%s11810_s24 + $0xf8] sm:$0xff] }
 0x458   : > { %v7917_v49 = vadd.f32 %v12794_v19, %v7873_v36  ;;  %v7918_v50 = vadd.f32 %v12798_v21, %v7874_v37  ;;  %v7919_v51 = vadd.f32 %v12794_v19, %v7875_v38  ;;  %v7920_v52 = vadd.f32 %v12798_v21, %v7876_v39 }
 0x459   : > { %v7921_v56 = vadd.f32 %v12794_v19, %v7877_v42  ;;  %v7922_v57 = vadd.f32 %v12798_v21, %v7878_v43  ;;  %v7923_v58 = vadd.f32 %v12794_v19, %v7879_v44  ;;  %v7924_v59 = vadd.f32 %v12798_v21, %v7880_v45 }
 0x45a   : > { %7949 = vst [vmem:[%s11810_s24 + $0x80] sm:$0xff] %v7917_v49  ;;  %7950 = vst [vmem:[%s11810_s24 + $0x88] sm:$0xff] %v7918_v50  ;;  %v7837_v60 = vadd.f32 %v12785_v13, %v7793_v40  ;;  %v7838_v61 = vadd.f32 %v12789_v15, %v7794_v41  ;;  %v7839_v62 = vadd.f32 %v12785_v13, %v7795_v46 }
 0x45b   : > { %7951 = vst [vmem:[%s11810_s24 + $0x90] sm:$0xff] %v7919_v51  ;;  %7952 = vst [vmem:[%s11810_s24 + $0x98] sm:$0xff] %v7920_v52  ;;  %v7840_v63 = vadd.f32 %v12789_v15, %v7796_v47  ;;  %v7841_v0 = vadd.f32 %v12785_v13, %v7797_v48  ;;  %v7842_v1 = vadd.f32 %v12789_v15, %v7798_v53 }
 0x45c   : > { %7953 = vst [vmem:[%s11810_s24 + $0xa0] sm:$0xff] %v7921_v56  ;;  %7954 = vst [vmem:[%s11810_s24 + $0xa8] sm:$0xff] %v7922_v57  ;;  %v7843_v2 = vadd.f32 %v12785_v13, %v7799_v54  ;;  %v7844_v3 = vadd.f32 %v12789_v15, %v7800_v55  ;;  %v7881_v4 = vmul.f32 %v12787_v14, %v7837_v60 }
 0x45d   : > { %7955 = vst [vmem:[%s11810_s24 + $0xb0] sm:$0xff] %v7923_v58  ;;  %7956 = vst [vmem:[%s11810_s24 + $0xb8] sm:$0xff] %v7924_v59  ;;  %v7882_v5 = vmul.f32 %v12796_v20, %v7838_v61  ;;  %v7883_v6 = vmul.f32 %v12787_v14, %v7839_v62  ;;  %v7884_v7 = vmul.f32 %v12796_v20, %v7840_v63 }
 0x45e   : > { %v7885_v8 = vmul.f32 %v12787_v14, %v7841_v0  ;;  %v7886_v9 = vmul.f32 %v12796_v20, %v7842_v1  ;;  %v7887_v13 = vmul.f32 %v12787_v14, %v7843_v2  ;;  %v7888_v15 = vmul.f32 %v12796_v20, %v7844_v3 }
 0x45f   : > { %v7925_v10 = vadd.f32 %v12794_v19, %v7881_v4  ;;  %v7926_v11 = vadd.f32 %v12798_v21, %v7882_v5  ;;  %v7927_v12 = vadd.f32 %v12794_v19, %v7883_v6  ;;  %v7928_v16 = vadd.f32 %v12798_v21, %v7884_v7 }
 0x460   : > { %v7929_v17 = vadd.f32 %v12794_v19, %v7885_v8  ;;  %v7930_v18 = vadd.f32 %v12798_v21, %v7886_v9  ;;  %v7931_v22 = vadd.f32 %v12794_v19, %v7887_v13  ;;  %v7932_v14 = vadd.f32 %v12798_v21, %v7888_v15 }
 0x461   : > { %7957 = vst [vmem:[%s11810_s24 + $0xc0] sm:$0xff] %v7925_v10  ;;  %7958 = vst [vmem:[%s11810_s24 + $0xc8] sm:$0xff] %v7926_v11 }
 0x462   : > { %7959 = vst [vmem:[%s11810_s24 + $0xd0] sm:$0xff] %v7927_v12  ;;  %7960 = vst [vmem:[%s11810_s24 + $0xd8] sm:$0xff] %v7928_v16 }
 0x463   : > { %7961 = vst [vmem:[%s11810_s24 + $0xe0] sm:$0xff] %v7929_v17  ;;  %7962 = vst [vmem:[%s11810_s24 + $0xe8] sm:$0xff] %v7930_v18 }
 0x464   : > { %7963 = vst [vmem:[%s11810_s24 + $0xf0] sm:$0xff] %v7931_v22  ;;  %7964 = vst [vmem:[%s11810_s24 + $0xf8] sm:$0xff] %v7932_v14 }
 0x465 PF: > { %s13128_s10 = sld [smem:[#allocation23_spill]]  ;;  %s13129_s12 = sld [smem:[#allocation38_spill]] }
 0x466   : > { %s7979_s5 = sshll.u32 %s11810_s24, 4  ;;  %s7966_s6 = scalar_lea.sflag [#allocation4], %s11793_s9  ;;  %s12959_s5 = int_to_ptr.vmem [resolvable:$true] %s7979_s5 }
 0x467   : > { %s11201_s18 = scalar_lea.vmem %s12959_s5, 4096  ;;  %p13130_p12 = scmp.ne.s32.totalorder %s13098_s21, 0 }
 0x468   : > { %p11202_p13 = scmp.ne.s32.totalorder %s12959_s5, %s11201_s18  ;;  %s11373_s15 = smov [#allocation11]  }
 0x469   : > { %s11205_s27 = sshll.u32 %s11373_s15, 4  ;;  %s11206_s27 = int_to_ptr.vmem [resolvable:$false] %s11205_s27 }
 0x46a   : > { %p11203_p11 = pnand %p11202_p13, %p13130_p12  ;;  %s11207_s1 = scalar_lea.vmem %s11206_s27, 8192 }
 0x46b   : > { %s9050_s26 = sshll.u32 %s13128_s10, 8  ;;  %p11208_p2 = scmp.lt.s32.totalorder %s12959_s5, %s11206_s27 }
 0x46c   : > { %s12956_s30 = scalar_lea.hbm %s13129_s12, %s9050_s26  ;;  %p11204_p5 = pneg %p11203_p11 }
 0x46d   : > { %p11209_p4 = scmp.lt.s32.totalorder %s11207_s1, %s11201_s18 }
 0x46f   : > { %p11210_p7 = por %p11209_p4, %p11208_p2 }
 0x471   : > { %p11211_p8 = pnand %p11210_p7, %p11204_p5 }
 0x473   : > { %11214 = shalt.err (!%p11211_p8)
}
 0x474   : > { %s11215_s23 = scalar_lea.hbm %s12956_s30, 4096  ;;  %s11219_s14 = scalar_lea.hbm %s13129_s12, 8192 }
 0x475   : > { %p11216_p1 = scmp.ne.s32.totalorder %s12956_s30, %s11215_s23  ;;  %p11220_p3 = scmp.lt.u32.totalorder %s12956_s30, %s13129_s12 }
 0x476   : > { %p11221_p6 = scmp.lt.u32.totalorder %s11219_s14, %s11215_s23  ;;  %p11223_p13 = scmp.lt.u32.totalorder %s11215_s23, %s12956_s30 }
 0x477   : > { %p11217_p10 = pnand %p11216_p1, %p13130_p12 }
 0x478   : > { %p11222_p0 = por %p11221_p6, %p11220_p3 }
 0x479   : > { %p11218_p9 = pneg %p11217_p10 }
 0x47a   : > { %p11224_p11 = por %p11223_p13, %p11222_p0 }
 0x47c   : > { %p11225_p5 = pnand %p11224_p11, %p11218_p9 }
 0x47e   : > { %11228 = shalt.err (!%p11225_p5)
}
 0x47f   : > { %s11374_s8 = smov 256   ;;  %s11375_s2 = smov 512  }
 0x480   : > { %s11376_s28 = smov 16  }
 0x481   : > { %9609 = dma.vmem_to_hbm [thread:$0]  (%p13130_p12), %s12959_s5, 4096, %s12956_s30, %s7966_s6, %s11374_s8, %s11375_s2, %s11376_s28  }
 0x482 PF: > { %s13131_s24 = sld [smem:[#allocation26_spill]]  ;;  %s13132_s4 = sld [smem:[#allocation17_spill]] }
 0x483   : > { %s13133_s16 = sld [smem:[#allocation31_spill]] }
 0x488   : > { %p9632_p2 = scmp.ge.s32.totalorder %s13131_s24, 2  ;;  %s7994_s10 = sand.u32 1, %s13132_s4  }
 0x489   : > { %p13134_p4 = scmp.ne.s32.totalorder %s13133_s16, 0  ;;  %s7995_s26 = scalar_lea.sflag [#allocation4], %s7994_s10 }
 0x48b   : > { %p9628_p7 = pnand %p9632_p2, %p13134_p4 }
 0x48d   : > { %11302 = dma.done.wait (!%p9628_p7), %s7995_s26, 4096  }
 0x48e   : > { %11304 = vsyncadd (!%p9628_p7), %s7995_s26, 4294963200  ;;  %s27_s6 = sadd.s32 1, %s13131_s24   ;;  %s13136_s21 = sld [smem:[#allocation18_spill]] }
 0x48f   : > { %p12990_p8 = scmp.ge.s32.totalorder %s27_s6, 10   ;;  %s13137_s20 = sld [smem:[#allocation30_spill]] }
 0x490   : > { %s13138_s9 = sld [smem:[#allocation19_spill]]  ;;  %s13139_s23 = sld [smem:[#allocation29_spill]] }
 0x491   : > { %s13140_s0 = sld [smem:[#allocation21_spill]]  ;;  %s13141_s26 = sld [smem:[#allocation32_spill]] }
 0x492   : > { %s13142_s27 = sld [smem:[#allocation24_spill]]  ;;  %s13143_s28 = sld [smem:[#allocation25_spill]] }
 0x493   : > { %s13144_s29 = sld [smem:[#allocation27_spill]]  ;;  %s13145_s30 = sld [smem:[#allocation28_spill]] }
 0x494   : > { %s13146_s18 = smov %s11311_s19  ;;  %s13147_s19 = smov %s13136_s21 }
 0x495   : > { %s13148_s21 = smov %s11323_s22  ;;  %s13150_s24 = smov %s11335_s25 }
 0x496   : > { %s13149_s22 = smov %s13138_s9  ;;  %26 = sbr.rel (!%p12990_p8) target bundleno = 21 (0x15), region = 141 }
 0x497   : > { %s13151_s25 = smov %s13140_s0 }
 0x49d   :  { %8000 = vsyncpa [#allocation3], 1 }
 0x49e   :  { %8002 = vsyncpa [#allocation3 + $0x1], 1 }
 0x49f   :  { %8003 = vsyncpa [#allocation6], 1 }
 0x4a0   :  { %8005 = vsyncpa [#allocation6 + $0x1], 1 }
 0x4a1   :  { %8006 = vsyncpa [#allocation9], 1 }
 0x4a2   :  { %8008 = vsyncpa [#allocation9 + $0x1], 1 }
 0x4a3   :  { %8009 = vsyncpa [#allocation4], 1 }
 0x4a4   :  { %8011 = vsyncpa [#allocation4 + $0x1], 1 }

</bundles_post_ra>
